<compile_context>
chip_gen: v5e
topology: v5e:2x2
jax: 0.10.0
libtpu: 0.0.40
codegen_flags: <defaults>
</compile_context>

<pallas_src>
import math
import functools

import jax
import jax.numpy as jnp
from jax import lax
from jax.experimental import pallas as pl
from jax.experimental.pallas import tpu as pltpu

d_k = d_v = 64
d_model = 512
n_heads = 8
assert d_k == d_v


# ---------------------------------------------------------------------------
# Kernel 1: fused Q/K/V projection, one (batch, seq-tile, head) step per grid
# point. Weights are pre-laid-out host-side as (H, d_model, d_k) so the head
# slice is a leading-dim block (no unaligned lane windows), and outputs land
# directly in head-major (B, H, S, d) layout for the attention kernel.
# ---------------------------------------------------------------------------
def _qkv_proj_kernel(xq_ref, xk_ref, xv_ref, wq_ref, wk_ref, wv_ref,
                     q_ref, k_ref, v_ref):
    xq = xq_ref[0].astype(jnp.bfloat16)          # (st, d_model)
    xk = xk_ref[0].astype(jnp.bfloat16)
    xv = xv_ref[0].astype(jnp.bfloat16)
    q = jnp.dot(xq, wq_ref[0], preferred_element_type=jnp.float32)
    k = jnp.dot(xk, wk_ref[0], preferred_element_type=jnp.float32)
    v = jnp.dot(xv, wv_ref[0], preferred_element_type=jnp.float32)
    q_ref[0, 0] = q.astype(q_ref.dtype)
    k_ref[0, 0] = k.astype(k_ref.dtype)
    v_ref[0, 0] = v.astype(v_ref.dtype)


def qkv_projection(x_q, x_k, x_v, w_q, w_k, w_v, *, seq_tile):
    B, S, _ = x_q.shape
    st = seq_tile
    n_s = S // st
    x_spec = pl.BlockSpec((1, st, d_model), lambda b, s, h: (b, s, 0))
    w_spec = pl.BlockSpec((1, d_model, d_k), lambda b, s, h: (h, 0, 0))
    o_spec = pl.BlockSpec((1, 1, st, d_k), lambda b, s, h: (b, h, s, 0))
    out_sh = jax.ShapeDtypeStruct((B, n_heads, S, d_k), jnp.bfloat16)
    return pl.pallas_call(
        _qkv_proj_kernel,
        grid=(B, n_s, n_heads),        # h fastest -> x tile reused across heads
        in_specs=[x_spec, x_spec, x_spec, w_spec, w_spec, w_spec],
        out_specs=(o_spec, o_spec, o_spec),
        out_shape=(out_sh, out_sh, out_sh),
        compiler_params=pltpu.CompilerParams(
            dimension_semantics=("parallel", "parallel", "parallel")),
    )(x_q, x_k, x_v, w_q, w_k, w_v)


# ---------------------------------------------------------------------------
# Kernel 2: scaled-dot-product attention. One grid step handles G heads of one
# batch (amortizes per-step overhead; mask block reused across heads).
# 1/sqrt(d_k) is already folded into W_Q, K is consumed un-transposed via
# dot_general, softmax math is f32, normalization via EUP approx reciprocal.
# ---------------------------------------------------------------------------
# TODO(synk): for large S (beyond ~1-2k on v7x) the (S,S) scores block must be
# flash-tiled (grid (B*H, S//tq, S//tk) with online-softmax scratch); that is
# only worthwhile if the full attn-probs output is dropped, since returning
# (B,H,S,S) forces O(S^2) HBM traffic anyway (module semantics require it).
def _attn_kernel(q_ref, k_ref, v_ref, m_ref, ctx_ref, attn_ref, *,
                 heads_per_step):
    masked = m_ref[0] != 0                        # (S, S) bool, shared across heads
    for h in range(heads_per_step):
        q = q_ref[0, h]                           # (S, d_k) bf16 (pre-scaled)
        k = k_ref[0, h]                           # (S, d_k) bf16
        v = v_ref[0, h]                           # (S, d_v) bf16
        # Contract over d_k without transposing K (no per-step XLU transpose).
        scores = lax.dot_general(q, k, (((1,), (1,)), ((), ())),
                                 preferred_element_type=jnp.float32)
        scores = jnp.where(masked, jnp.float32(-1e9), scores)
        mx = jnp.max(scores, axis=-1, keepdims=True)
        e = jnp.exp(scores - mx)
        s = jnp.sum(e, axis=-1, keepdims=True)
        attn = e * pl.reciprocal(s, approx=True)
        attn_ref[0, h] = attn                     # f32 (module returns probs)
        ctx = jnp.dot(attn.astype(v.dtype), v, preferred_element_type=jnp.float32)
        ctx_ref[0, h] = ctx.astype(ctx_ref.dtype)


def scaled_dot_product_attention(q, k, v, mask_i8, *, heads_per_step=n_heads):
    B, H, S, _ = q.shape
    G = heads_per_step                             # shrink on v7x (64 MiB VMEM)
    assert H % G == 0
    qkv_spec = pl.BlockSpec((1, G, S, d_k), lambda b, g: (b, g, 0, 0))
    return pl.pallas_call(
        functools.partial(_attn_kernel, heads_per_step=G),
        grid=(B, H // G),
        in_specs=[qkv_spec, qkv_spec, qkv_spec,
                  pl.BlockSpec((1, S, S), lambda b, g: (b, 0, 0))],   # int8 mask
        out_specs=(pl.BlockSpec((1, G, S, d_v), lambda b, g: (b, g, 0, 0)),
                   pl.BlockSpec((1, G, S, S), lambda b, g: (b, g, 0, 0))),
        out_shape=(jax.ShapeDtypeStruct((B, H, S, d_v), jnp.bfloat16),
                   jax.ShapeDtypeStruct((B, H, S, S), jnp.float32)),
        compiler_params=pltpu.CompilerParams(
            dimension_semantics=("parallel", "parallel")),
    )(q, k, v, mask_i8)


# ---------------------------------------------------------------------------
# Kernel 3: output projection + residual add + LayerNorm (fused), tiled over
# (batch, seq). W_fc is pre-laid-out as (H, d_v, d_model) so head-major ctx is
# consumed with per-head accumulating dots — no ctx transpose between kernels.
# ---------------------------------------------------------------------------
def _fc_ln_kernel(ctx_ref, w_ref, res_ref, out_ref):
    y = res_ref[0]                                 # (st, d_model) f32 residual
    for h in range(n_heads):
        y = y + jnp.dot(ctx_ref[0, h], w_ref[h],
                        preferred_element_type=jnp.float32)
    mean = jnp.mean(y, axis=-1, keepdims=True)
    var = jnp.mean((y - mean) ** 2, axis=-1, keepdims=True)
    out_ref[0] = (y - mean) * lax.rsqrt(var + 1e-5)


def fc_residual_layernorm(ctx, w_fc, residual, *, seq_tile):
    B, H, S, _ = ctx.shape
    st = seq_tile
    n_s = S // st
    return pl.pallas_call(
        _fc_ln_kernel,
        grid=(B, n_s),
        in_specs=[pl.BlockSpec((1, n_heads, st, d_v), lambda b, s: (b, 0, s, 0)),
                  pl.BlockSpec((n_heads, d_v, d_model), lambda b, s: (0, 0, 0)),
                  pl.BlockSpec((1, st, d_model), lambda b, s: (b, s, 0))],
        out_specs=pl.BlockSpec((1, st, d_model), lambda b, s: (b, s, 0)),
        out_shape=jax.ShapeDtypeStruct((B, S, d_model), jnp.float32),
        compiler_params=pltpu.CompilerParams(
            dimension_semantics=("parallel", "parallel")),
    )(ctx, w_fc, residual)


# ---------------------------------------------------------------------------
# One-time parameter preparation (free, host-side): fold 1/sqrt(d_k) into W_Q,
# re-layout weights per-head, cast MXU operands to bf16.
# ---------------------------------------------------------------------------
def prepare_params(params):
    scale = 1.0 / math.sqrt(d_k)
    wq = (params["W_Q"] * scale).reshape(d_model, n_heads, d_k).transpose(1, 0, 2)
    wk = params["W_K"].reshape(d_model, n_heads, d_k).transpose(1, 0, 2)
    wv = params["W_V"].reshape(d_model, n_heads, d_v).transpose(1, 0, 2)
    wfc = params["W_fc"].reshape(n_heads, d_v, d_model)
    return {"W_Q": wq.astype(jnp.bfloat16),
            "W_K": wk.astype(jnp.bfloat16),
            "W_V": wv.astype(jnp.bfloat16),
            "W_fc": wfc.astype(jnp.bfloat16)}


# ---------------------------------------------------------------------------
# Full MultiHeadAttention forward.
# ---------------------------------------------------------------------------
@jax.jit
def multi_head_attention(input_Q, input_K, input_V, attn_mask, kparams):
    B, S, _ = input_Q.shape
    st = S if S <= 512 else 512                    # sequence tile for proj / fc+LN
    assert S % st == 0
    mask_i8 = attn_mask.astype(jnp.int8)           # 4x less DMA than f32 mask

    Q, K, V = qkv_projection(input_Q, input_K, input_V,
                             kparams["W_Q"], kparams["W_K"], kparams["W_V"],
                             seq_tile=st)          # (B, H, S, d) bf16, no transposes
    ctx, attn = scaled_dot_product_attention(Q, K, V, mask_i8)
    out = fc_residual_layernorm(ctx, kparams["W_fc"], input_Q, seq_tile=st)
    return out, attn                               # attn: (B, n_heads, S, S) f32


# ---------------------------------------------------------------------------
# Pure-JAX f32 reference for verification (uses the original PyTorch layout).
# ---------------------------------------------------------------------------
def reference_mha(input_Q, input_K, input_V, attn_mask, params):
    B, S, _ = input_Q.shape
    residual = input_Q
    Q = (input_Q @ params["W_Q"]).reshape(B, S, n_heads, d_k).transpose(0, 2, 1, 3)
    K = (input_K @ params["W_K"]).reshape(B, S, n_heads, d_k).transpose(0, 2, 1, 3)
    V = (input_V @ params["W_V"]).reshape(B, S, n_heads, d_v).transpose(0, 2, 1, 3)
    scores = jnp.einsum("bhqd,bhkd->bhqk", Q, K) / math.sqrt(d_k)
    scores = jnp.where(attn_mask[:, None, :, :], -1e9, scores)
    attn = jax.nn.softmax(scores, axis=-1)
    ctx = jnp.einsum("bhqk,bhkd->bhqd", attn, V)
    ctx = ctx.transpose(0, 2, 1, 3).reshape(B, S, n_heads * d_v)
    out = ctx @ params["W_fc"] + residual
    mean = out.mean(-1, keepdims=True)
    var = ((out - mean) ** 2).mean(-1, keepdims=True)
    out = (out - mean) / jnp.sqrt(var + 1e-5)
    return out, attn


if __name__ == "__main__":
    key = jax.random.PRNGKey(0)
    B, S = 2, 8

    k1, k2, k3, k4, k5, k6, k7 = jax.random.split(key, 7)
    bound = 1.0 / math.sqrt(d_model)
    # Weights stored already transposed vs. PyTorch nn.Linear: y = x @ W.
    params = {
        "W_Q": jax.random.uniform(k1, (d_model, n_heads * d_k), jnp.float32, -bound, bound),
        "W_K": jax.random.uniform(k2, (d_model, n_heads * d_k), jnp.float32, -bound, bound),
        "W_V": jax.random.uniform(k3, (d_model, n_heads * d_v), jnp.float32, -bound, bound),
        "W_fc": jax.random.uniform(k4, (n_heads * d_v, d_model), jnp.float32,
                                   -1.0 / math.sqrt(n_heads * d_v),
                                   1.0 / math.sqrt(n_heads * d_v)),
    }
    kparams = prepare_params(params)

    input_Q = jax.random.normal(k5, (B, S, d_model), jnp.float32)
    input_K = jax.random.normal(k6, (B, S, d_model), jnp.float32)
    input_V = jax.random.normal(k7, (B, S, d_model), jnp.float32)
    # Causal mask: True (masked) above the diagonal.
    attn_mask = jnp.triu(jnp.ones((S, S), dtype=bool), k=1)[None].repeat(B, axis=0)

    out, attn = multi_head_attention(input_Q, input_K, input_V, attn_mask, kparams)
    out = jax.block_until_ready(out)
    attn = jax.block_until_ready(attn)

    out_ref, attn_ref = reference_mha(input_Q, input_K, input_V, attn_mask, params)
    assert out.shape == (B, S, d_model) and attn.shape == (B, n_heads, S, S)
    # Tolerances loosened for bf16 MXU operands (f32 accumulation, f32 softmax/LN).
    assert jnp.allclose(out, out_ref, atol=5e-2, rtol=5e-2)
    assert jnp.allclose(attn, attn_ref, atol=3e-2, rtol=3e-2)

    print("KERNEL_OK")
</pallas_src>

<mosaic_0001>
module attributes {stable_mosaic.version = 11 : i64} {
  func.func @_qkv_proj_kernel(%arg0: i32, %arg1: i32, %arg2: i32, %arg3: memref<1x8x512xf32, #tpu.memory_space<vmem>>, %arg4: memref<1x8x512xf32, #tpu.memory_space<vmem>>, %arg5: memref<1x8x512xf32, #tpu.memory_space<vmem>>, %arg6: memref<1x512x64xbf16, #tpu.memory_space<vmem>>, %arg7: memref<1x512x64xbf16, #tpu.memory_space<vmem>>, %arg8: memref<1x512x64xbf16, #tpu.memory_space<vmem>>, %arg9: memref<1x1x8x64xbf16, #tpu.memory_space<vmem>>, %arg10: memref<1x1x8x64xbf16, #tpu.memory_space<vmem>>, %arg11: memref<1x1x8x64xbf16, #tpu.memory_space<vmem>>) attributes {dimension_semantics = [#tpu.dimension_semantics<parallel>, #tpu.dimension_semantics<parallel>, #tpu.dimension_semantics<parallel>], iteration_bounds = array<i64: 2, 1, 8>, scalar_prefetch = 0 : i64, scratch_operands = 0 : i64, tpu.core_type = #tpu.core_type<tc>, window_params = [{transform_indices = @transform_0, window_bounds = array<i64: 1, 8, 512>}, {transform_indices = @transform_1, window_bounds = array<i64: 1, 8, 512>}, {transform_indices = @transform_2, window_bounds = array<i64: 1, 8, 512>}, {transform_indices = @transform_3, window_bounds = array<i64: 1, 512, 64>}, {transform_indices = @transform_4, window_bounds = array<i64: 1, 512, 64>}, {transform_indices = @transform_5, window_bounds = array<i64: 1, 512, 64>}, {transform_indices = @transform_6, window_bounds = array<i64: 1, 1, 8, 64>}, {transform_indices = @transform_7, window_bounds = array<i64: 1, 1, 8, 64>}, {transform_indices = @transform_8, window_bounds = array<i64: 1, 1, 8, 64>}]} {
    %c0 = arith.constant 0 : index
    %c0_0 = arith.constant 0 : index
    %c0_1 = arith.constant 0 : index
    %0 = vector.load %arg3[%c0, %c0_0, %c0_1] : memref<1x8x512xf32, #tpu.memory_space<vmem>>, vector<1x8x512xf32>
    %1 = vector.shape_cast %0 : vector<1x8x512xf32> to vector<8x512xf32>
    %2 = arith.truncf %1 : vector<8x512xf32> to vector<8x512xbf16>
    %c0_2 = arith.constant 0 : index
    %c0_3 = arith.constant 0 : index
    %c0_4 = arith.constant 0 : index
    %3 = vector.load %arg4[%c0_2, %c0_3, %c0_4] : memref<1x8x512xf32, #tpu.memory_space<vmem>>, vector<1x8x512xf32>
    %4 = vector.shape_cast %3 : vector<1x8x512xf32> to vector<8x512xf32>
    %5 = arith.truncf %4 : vector<8x512xf32> to vector<8x512xbf16>
    %c0_5 = arith.constant 0 : index
    %c0_6 = arith.constant 0 : index
    %c0_7 = arith.constant 0 : index
    %6 = vector.load %arg5[%c0_5, %c0_6, %c0_7] : memref<1x8x512xf32, #tpu.memory_space<vmem>>, vector<1x8x512xf32>
    %7 = vector.shape_cast %6 : vector<1x8x512xf32> to vector<8x512xf32>
    %8 = arith.truncf %7 : vector<8x512xf32> to vector<8x512xbf16>
    %c0_8 = arith.constant 0 : index
    %c0_9 = arith.constant 0 : index
    %c0_10 = arith.constant 0 : index
    %9 = vector.load %arg6[%c0_8, %c0_9, %c0_10] : memref<1x512x64xbf16, #tpu.memory_space<vmem>>, vector<1x512x64xbf16>
    %10 = vector.shape_cast %9 : vector<1x512x64xbf16> to vector<512x64xbf16>
    %cst = arith.constant dense<0.000000e+00> : vector<8x64xf32>
    %11 = tpu.matmul %2, %10, %cst {dimension_numbers = #tpu.dot_dimension_numbers<[1], [0], [0], [1], [0, 0, 1, 1], [], []>} : vector<8x512xbf16>, vector<512x64xbf16>, vector<8x64xf32> -> vector<8x64xf32>
    %c0_11 = arith.constant 0 : index
    %c0_12 = arith.constant 0 : index
    %c0_13 = arith.constant 0 : index
    %12 = vector.load %arg7[%c0_11, %c0_12, %c0_13] : memref<1x512x64xbf16, #tpu.memory_space<vmem>>, vector<1x512x64xbf16>
    %13 = vector.shape_cast %12 : vector<1x512x64xbf16> to vector<512x64xbf16>
    %cst_14 = arith.constant dense<0.000000e+00> : vector<8x64xf32>
    %14 = tpu.matmul %5, %13, %cst_14 {dimension_numbers = #tpu.dot_dimension_numbers<[1], [0], [0], [1], [0, 0, 1, 1], [], []>} : vector<8x512xbf16>, vector<512x64xbf16>, vector<8x64xf32> -> vector<8x64xf32>
    %c0_15 = arith.constant 0 : index
    %c0_16 = arith.constant 0 : index
    %c0_17 = arith.constant 0 : index
    %15 = vector.load %arg8[%c0_15, %c0_16, %c0_17] : memref<1x512x64xbf16, #tpu.memory_space<vmem>>, vector<1x512x64xbf16>
    %16 = vector.shape_cast %15 : vector<1x512x64xbf16> to vector<512x64xbf16>
    %cst_18 = arith.constant dense<0.000000e+00> : vector<8x64xf32>
    %17 = tpu.matmul %8, %16, %cst_18 {dimension_numbers = #tpu.dot_dimension_numbers<[1], [0], [0], [1], [0, 0, 1, 1], [], []>} : vector<8x512xbf16>, vector<512x64xbf16>, vector<8x64xf32> -> vector<8x64xf32>
    %18 = arith.truncf %11 : vector<8x64xf32> to vector<8x64xbf16>
    %c0_19 = arith.constant 0 : index
    %c0_20 = arith.constant 0 : index
    %c0_21 = arith.constant 0 : index
    %c0_22 = arith.constant 0 : index
    %19 = vector.load %arg9[%c0_19, %c0_20, %c0_21, %c0_22] : memref<1x1x8x64xbf16, #tpu.memory_space<vmem>>, vector<1x1x8x64xbf16>
    %20 = vector.shape_cast %19 : vector<1x1x8x64xbf16> to vector<8x64xbf16>
    %21 = vector.shape_cast %18 : vector<8x64xbf16> to vector<1x1x8x64xbf16>
    tpu.vector_store %arg9[%c0_19, %c0_20, %c0_21, %c0_22], %21 {strides = array<i32>} : memref<1x1x8x64xbf16, #tpu.memory_space<vmem>>, vector<1x1x8x64xbf16>,
    %22 = arith.truncf %14 : vector<8x64xf32> to vector<8x64xbf16>
    %c0_23 = arith.constant 0 : index
    %c0_24 = arith.constant 0 : index
    %c0_25 = arith.constant 0 : index
    %c0_26 = arith.constant 0 : index
    %23 = vector.load %arg10[%c0_23, %c0_24, %c0_25, %c0_26] : memref<1x1x8x64xbf16, #tpu.memory_space<vmem>>, vector<1x1x8x64xbf16>
    %24 = vector.shape_cast %23 : vector<1x1x8x64xbf16> to vector<8x64xbf16>
    %25 = vector.shape_cast %22 : vector<8x64xbf16> to vector<1x1x8x64xbf16>
    tpu.vector_store %arg10[%c0_23, %c0_24, %c0_25, %c0_26], %25 {strides = array<i32>} : memref<1x1x8x64xbf16, #tpu.memory_space<vmem>>, vector<1x1x8x64xbf16>,
    %26 = arith.truncf %17 : vector<8x64xf32> to vector<8x64xbf16>
    %c0_27 = arith.constant 0 : index
    %c0_28 = arith.constant 0 : index
    %c0_29 = arith.constant 0 : index
    %c0_30 = arith.constant 0 : index
    %27 = vector.load %arg11[%c0_27, %c0_28, %c0_29, %c0_30] : memref<1x1x8x64xbf16, #tpu.memory_space<vmem>>, vector<1x1x8x64xbf16>
    %28 = vector.shape_cast %27 : vector<1x1x8x64xbf16> to vector<8x64xbf16>
    %29 = vector.shape_cast %26 : vector<8x64xbf16> to vector<1x1x8x64xbf16>
    tpu.vector_store %arg11[%c0_27, %c0_28, %c0_29, %c0_30], %29 {strides = array<i32>} : memref<1x1x8x64xbf16, #tpu.memory_space<vmem>>, vector<1x1x8x64xbf16>,
    return
  }
  func.func @transform_0(%arg0: i32, %arg1: i32, %arg2: i32) -> (i32, i32, i32) {
    %c0_i32 = arith.constant 0 : i32
    %c0_i32_0 = arith.constant 0 : i32
    return %arg0, %arg1, %c0_i32 : i32, i32, i32
  }
  func.func @transform_1(%arg0: i32, %arg1: i32, %arg2: i32) -> (i32, i32, i32) {
    %c0_i32 = arith.constant 0 : i32
    %c0_i32_0 = arith.constant 0 : i32
    return %arg0, %arg1, %c0_i32 : i32, i32, i32
  }
  func.func @transform_2(%arg0: i32, %arg1: i32, %arg2: i32) -> (i32, i32, i32) {
    %c0_i32 = arith.constant 0 : i32
    %c0_i32_0 = arith.constant 0 : i32
    return %arg0, %arg1, %c0_i32 : i32, i32, i32
  }
  func.func @transform_3(%arg0: i32, %arg1: i32, %arg2: i32) -> (i32, i32, i32) {
    %c0_i32 = arith.constant 0 : i32
    %c0_i32_0 = arith.constant 0 : i32
    %c0_i32_1 = arith.constant 0 : i32
    return %arg2, %c0_i32, %c0_i32_0 : i32, i32, i32
  }
  func.func @transform_4(%arg0: i32, %arg1: i32, %arg2: i32) -> (i32, i32, i32) {
    %c0_i32 = arith.constant 0 : i32
    %c0_i32_0 = arith.constant 0 : i32
    %c0_i32_1 = arith.constant 0 : i32
    return %arg2, %c0_i32, %c0_i32_0 : i32, i32, i32
  }
  func.func @transform_5(%arg0: i32, %arg1: i32, %arg2: i32) -> (i32, i32, i32) {
    %c0_i32 = arith.constant 0 : i32
    %c0_i32_0 = arith.constant 0 : i32
    %c0_i32_1 = arith.constant 0 : i32
    return %arg2, %c0_i32, %c0_i32_0 : i32, i32, i32
  }
  func.func @transform_6(%arg0: i32, %arg1: i32, %arg2: i32) -> (i32, i32, i32, i32) {
    %c0_i32 = arith.constant 0 : i32
    %c0_i32_0 = arith.constant 0 : i32
    return %arg0, %arg2, %arg1, %c0_i32 : i32, i32, i32, i32
  }
  func.func @transform_7(%arg0: i32, %arg1: i32, %arg2: i32) -> (i32, i32, i32, i32) {
    %c0_i32 = arith.constant 0 : i32
    %c0_i32_0 = arith.constant 0 : i32
    return %arg0, %arg2, %arg1, %c0_i32 : i32, i32, i32, i32
  }
  func.func @transform_8(%arg0: i32, %arg1: i32, %arg2: i32) -> (i32, i32, i32, i32) {
    %c0_i32 = arith.constant 0 : i32
    %c0_i32_0 = arith.constant 0 : i32
    return %arg0, %arg2, %arg1, %c0_i32 : i32, i32, i32, i32
  }
}

module attributes {stable_mosaic.version = 11 : i64} {
  func.func @_attn_kernel(%arg0: i32, %arg1: i32, %arg2: memref<1x8x8x64xbf16, #tpu.memory_space<vmem>>, %arg3: memref<1x8x8x64xbf16, #tpu.memory_space<vmem>>, %arg4: memref<1x8x8x64xbf16, #tpu.memory_space<vmem>>, %arg5: memref<1x8x8xi8, #tpu.memory_space<vmem>>, %arg6: memref<1x8x8x64xbf16, #tpu.memory_space<vmem>>, %arg7: memref<1x8x8x8xf32, #tpu.memory_space<vmem>>) attributes {dimension_semantics = [#tpu.dimension_semantics<parallel>, #tpu.dimension_semantics<parallel>], iteration_bounds = array<i64: 2, 1>, scalar_prefetch = 0 : i64, scratch_operands = 0 : i64, tpu.core_type = #tpu.core_type<tc>, window_params = [{transform_indices = @transform_0, window_bounds = array<i64: 1, 8, 8, 64>}, {transform_indices = @transform_1, window_bounds = array<i64: 1, 8, 8, 64>}, {transform_indices = @transform_2, window_bounds = array<i64: 1, 8, 8, 64>}, {transform_indices = @transform_3, window_bounds = array<i64: 1, 8, 8>}, {transform_indices = @transform_4, window_bounds = array<i64: 1, 8, 8, 64>}, {transform_indices = @transform_5, window_bounds = array<i64: 1, 8, 8, 8>}]} {
    %c0 = arith.constant 0 : index
    %c0_0 = arith.constant 0 : index
    %c0_1 = arith.constant 0 : index
    %0 = vector.load %arg5[%c0, %c0_0, %c0_1] : memref<1x8x8xi8, #tpu.memory_space<vmem>>, vector<1x8x8xi8>
    %1 = vector.shape_cast %0 : vector<1x8x8xi8> to vector<8x8xi8>
    %c0_i8 = arith.constant 0 : i8
    %2 = vector.broadcast %c0_i8 : i8 to vector<8x8xi8>
    %3 = arith.cmpi ne, %1, %2 : vector<8x8xi8>
    %c0_2 = arith.constant 0 : index
    %c0_3 = arith.constant 0 : index
    %c0_4 = arith.constant 0 : index
    %c0_5 = arith.constant 0 : index
    %4 = vector.load %arg2[%c0_2, %c0_3, %c0_4, %c0_5] : memref<1x8x8x64xbf16, #tpu.memory_space<vmem>>, vector<1x1x8x64xbf16>
    %5 = vector.shape_cast %4 : vector<1x1x8x64xbf16> to vector<8x64xbf16>
    %c0_6 = arith.constant 0 : index
    %c0_7 = arith.constant 0 : index
    %c0_8 = arith.constant 0 : index
    %c0_9 = arith.constant 0 : index
    %6 = vector.load %arg3[%c0_6, %c0_7, %c0_8, %c0_9] : memref<1x8x8x64xbf16, #tpu.memory_space<vmem>>, vector<1x1x8x64xbf16>
    %7 = vector.shape_cast %6 : vector<1x1x8x64xbf16> to vector<8x64xbf16>
    %c0_10 = arith.constant 0 : index
    %c0_11 = arith.constant 0 : index
    %c0_12 = arith.constant 0 : index
    %c0_13 = arith.constant 0 : index
    %8 = vector.load %arg4[%c0_10, %c0_11, %c0_12, %c0_13] : memref<1x8x8x64xbf16, #tpu.memory_space<vmem>>, vector<1x1x8x64xbf16>
    %9 = vector.shape_cast %8 : vector<1x1x8x64xbf16> to vector<8x64xbf16>
    %cst = arith.constant dense<0.000000e+00> : vector<8x8xf32>
    %10 = tpu.matmul %5, %7, %cst {dimension_numbers = #tpu.dot_dimension_numbers<[1], [1], [0], [0], [0, 0, 1, 0], [], []>} : vector<8x64xbf16>, vector<8x64xbf16>, vector<8x8xf32> -> vector<8x8xf32>
    %cst_14 = arith.constant -1.000000e+09 : f32
    %11 = vector.broadcast %cst_14 : f32 to vector<8x8xf32>
    %12 = arith.select %3, %11, %10 : vector<8x8xi1>, vector<8x8xf32>
    %cst_15 = arith.constant dense<0xFF800000> : vector<8xf32>
    %13 = vector.multi_reduction <maximumf>, %12, %cst_15 [1] : vector<8x8xf32> to vector<8xf32>
    %14 = vector.shape_cast %13 : vector<8xf32> to vector<8x1xf32>
    %15 = vector.broadcast %14 : vector<8x1xf32> to vector<8x8xf32>
    %16 = arith.subf %12, %15 : vector<8x8xf32>
    %17 = math.exp %16 : vector<8x8xf32>
    %cst_16 = arith.constant dense<0.000000e+00> : vector<8xf32>
    %18 = vector.multi_reduction <add>, %17, %cst_16 [1] : vector<8x8xf32> to vector<8xf32>
    %19 = vector.shape_cast %18 : vector<8xf32> to vector<8x1xf32>
    %20 = tpu.reciprocal %19 {approx = true} : vector<8x1xf32> -> vector<8x1xf32>
    %21 = vector.broadcast %20 : vector<8x1xf32> to vector<8x8xf32>
    %22 = arith.mulf %17, %21 : vector<8x8xf32>
    %c0_17 = arith.constant 0 : index
    %c0_18 = arith.constant 0 : index
    %c0_19 = arith.constant 0 : index
    %c0_20 = arith.constant 0 : index
    %23 = vector.load %arg7[%c0_17, %c0_18, %c0_19, %c0_20] : memref<1x8x8x8xf32, #tpu.memory_space<vmem>>, vector<1x1x8x8xf32>
    %24 = vector.shape_cast %23 : vector<1x1x8x8xf32> to vector<8x8xf32>
    %25 = vector.shape_cast %22 : vector<8x8xf32> to vector<1x1x8x8xf32>
    tpu.vector_store %arg7[%c0_17, %c0_18, %c0_19, %c0_20], %25 {strides = array<i32>} : memref<1x8x8x8xf32, #tpu.memory_space<vmem>>, vector<1x1x8x8xf32>,
    %26 = arith.truncf %22 : vector<8x8xf32> to vector<8x8xbf16>
    %cst_21 = arith.constant dense<0.000000e+00> : vector<8x64xf32>
    %27 = tpu.matmul %26, %9, %cst_21 {dimension_numbers = #tpu.dot_dimension_numbers<[1], [0], [0], [1], [0, 0, 1, 1], [], []>} : vector<8x8xbf16>, vector<8x64xbf16>, vector<8x64xf32> -> vector<8x64xf32>
    %28 = arith.truncf %27 : vector<8x64xf32> to vector<8x64xbf16>
    %c0_22 = arith.constant 0 : index
    %c0_23 = arith.constant 0 : index
    %c0_24 = arith.constant 0 : index
    %c0_25 = arith.constant 0 : index
    %29 = vector.load %arg6[%c0_22, %c0_23, %c0_24, %c0_25] : memref<1x8x8x64xbf16, #tpu.memory_space<vmem>>, vector<1x1x8x64xbf16>
    %30 = vector.shape_cast %29 : vector<1x1x8x64xbf16> to vector<8x64xbf16>
    %31 = vector.shape_cast %28 : vector<8x64xbf16> to vector<1x1x8x64xbf16>
    tpu.vector_store %arg6[%c0_22, %c0_23, %c0_24, %c0_25], %31 {strides = array<i32>} : memref<1x8x8x64xbf16, #tpu.memory_space<vmem>>, vector<1x1x8x64xbf16>,
    %c0_26 = arith.constant 0 : index
    %c1 = arith.constant 1 : index
    %c0_27 = arith.constant 0 : index
    %c0_28 = arith.constant 0 : index
    %32 = vector.load %arg2[%c0_26, %c1, %c0_27, %c0_28] : memref<1x8x8x64xbf16, #tpu.memory_space<vmem>>, vector<1x1x8x64xbf16>
    %33 = vector.shape_cast %32 : vector<1x1x8x64xbf16> to vector<8x64xbf16>
    %c0_29 = arith.constant 0 : index
    %c1_30 = arith.constant 1 : index
    %c0_31 = arith.constant 0 : index
    %c0_32 = arith.constant 0 : index
    %34 = vector.load %arg3[%c0_29, %c1_30, %c0_31, %c0_32] : memref<1x8x8x64xbf16, #tpu.memory_space<vmem>>, vector<1x1x8x64xbf16>
    %35 = vector.shape_cast %34 : vector<1x1x8x64xbf16> to vector<8x64xbf16>
    %c0_33 = arith.constant 0 : index
    %c1_34 = arith.constant 1 : index
    %c0_35 = arith.constant 0 : index
    %c0_36 = arith.constant 0 : index
    %36 = vector.load %arg4[%c0_33, %c1_34, %c0_35, %c0_36] : memref<1x8x8x64xbf16, #tpu.memory_space<vmem>>, vector<1x1x8x64xbf16>
    %37 = vector.shape_cast %36 : vector<1x1x8x64xbf16> to vector<8x64xbf16>
    %cst_37 = arith.constant dense<0.000000e+00> : vector<8x8xf32>
    %38 = tpu.matmul %33, %35, %cst_37 {dimension_numbers = #tpu.dot_dimension_numbers<[1], [1], [0], [0], [0, 0, 1, 0], [], []>} : vector<8x64xbf16>, vector<8x64xbf16>, vector<8x8xf32> -> vector<8x8xf32>
    %cst_38 = arith.constant -1.000000e+09 : f32
    %39 = vector.broadcast %cst_38 : f32 to vector<8x8xf32>
    %40 = arith.select %3, %39, %38 : vector<8x8xi1>, vector<8x8xf32>
    %cst_39 = arith.constant dense<0xFF800000> : vector<8xf32>
    %41 = vector.multi_reduction <maximumf>, %40, %cst_39 [1] : vector<8x8xf32> to vector<8xf32>
    %42 = vector.shape_cast %41 : vector<8xf32> to vector<8x1xf32>
    %43 = vector.broadcast %42 : vector<8x1xf32> to vector<8x8xf32>
    %44 = arith.subf %40, %43 : vector<8x8xf32>
    %45 = math.exp %44 : vector<8x8xf32>
    %cst_40 = arith.constant dense<0.000000e+00> : vector<8xf32>
    %46 = vector.multi_reduction <add>, %45, %cst_40 [1] : vector<8x8xf32> to vector<8xf32>
    %47 = vector.shape_cast %46 : vector<8xf32> to vector<8x1xf32>
    %48 = tpu.reciprocal %47 {approx = true} : vector<8x1xf32> -> vector<8x1xf32>
    %49 = vector.broadcast %48 : vector<8x1xf32> to vector<8x8xf32>
    %50 = arith.mulf %45, %49 : vector<8x8xf32>
    %c0_41 = arith.constant 0 : index
    %c1_42 = arith.constant 1 : index
    %c0_43 = arith.constant 0 : index
    %c0_44 = arith.constant 0 : index
    %51 = vector.load %arg7[%c0_41, %c1_42, %c0_43, %c0_44] : memref<1x8x8x8xf32, #tpu.memory_space<vmem>>, vector<1x1x8x8xf32>
    %52 = vector.shape_cast %51 : vector<1x1x8x8xf32> to vector<8x8xf32>
    %53 = vector.shape_cast %50 : vector<8x8xf32> to vector<1x1x8x8xf32>
    tpu.vector_store %arg7[%c0_41, %c1_42, %c0_43, %c0_44], %53 {strides = array<i32>} : memref<1x8x8x8xf32, #tpu.memory_space<vmem>>, vector<1x1x8x8xf32>,
    %54 = arith.truncf %50 : vector<8x8xf32> to vector<8x8xbf16>
    %cst_45 = arith.constant dense<0.000000e+00> : vector<8x64xf32>
    %55 = tpu.matmul %54, %37, %cst_45 {dimension_numbers = #tpu.dot_dimension_numbers<[1], [0], [0], [1], [0, 0, 1, 1], [], []>} : vector<8x8xbf16>, vector<8x64xbf16>, vector<8x64xf32> -> vector<8x64xf32>
    %56 = arith.truncf %55 : vector<8x64xf32> to vector<8x64xbf16>
    %c0_46 = arith.constant 0 : index
    %c1_47 = arith.constant 1 : index
    %c0_48 = arith.constant 0 : index
    %c0_49 = arith.constant 0 : index
    %57 = vector.load %arg6[%c0_46, %c1_47, %c0_48, %c0_49] : memref<1x8x8x64xbf16, #tpu.memory_space<vmem>>, vector<1x1x8x64xbf16>
    %58 = vector.shape_cast %57 : vector<1x1x8x64xbf16> to vector<8x64xbf16>
    %59 = vector.shape_cast %56 : vector<8x64xbf16> to vector<1x1x8x64xbf16>
    tpu.vector_store %arg6[%c0_46, %c1_47, %c0_48, %c0_49], %59 {strides = array<i32>} : memref<1x8x8x64xbf16, #tpu.memory_space<vmem>>, vector<1x1x8x64xbf16>,
    %c0_50 = arith.constant 0 : index
    %c2 = arith.constant 2 : index
    %c0_51 = arith.constant 0 : index
    %c0_52 = arith.constant 0 : index
    %60 = vector.load %arg2[%c0_50, %c2, %c0_51, %c0_52] : memref<1x8x8x64xbf16, #tpu.memory_space<vmem>>, vector<1x1x8x64xbf16>
    %61 = vector.shape_cast %60 : vector<1x1x8x64xbf16> to vector<8x64xbf16>
    %c0_53 = arith.constant 0 : index
    %c2_54 = arith.constant 2 : index
    %c0_55 = arith.constant 0 : index
    %c0_56 = arith.constant 0 : index
    %62 = vector.load %arg3[%c0_53, %c2_54, %c0_55, %c0_56] : memref<1x8x8x64xbf16, #tpu.memory_space<vmem>>, vector<1x1x8x64xbf16>
    %63 = vector.shape_cast %62 : vector<1x1x8x64xbf16> to vector<8x64xbf16>
    %c0_57 = arith.constant 0 : index
    %c2_58 = arith.constant 2 : index
    %c0_59 = arith.constant 0 : index
    %c0_60 = arith.constant 0 : index
    %64 = vector.load %arg4[%c0_57, %c2_58, %c0_59, %c0_60] : memref<1x8x8x64xbf16, #tpu.memory_space<vmem>>, vector<1x1x8x64xbf16>
    %65 = vector.shape_cast %64 : vector<1x1x8x64xbf16> to vector<8x64xbf16>
    %cst_61 = arith.constant dense<0.000000e+00> : vector<8x8xf32>
    %66 = tpu.matmul %61, %63, %cst_61 {dimension_numbers = #tpu.dot_dimension_numbers<[1], [1], [0], [0], [0, 0, 1, 0], [], []>} : vector<8x64xbf16>, vector<8x64xbf16>, vector<8x8xf32> -> vector<8x8xf32>
    %cst_62 = arith.constant -1.000000e+09 : f32
    %67 = vector.broadcast %cst_62 : f32 to vector<8x8xf32>
    %68 = arith.select %3, %67, %66 : vector<8x8xi1>, vector<8x8xf32>
    %cst_63 = arith.constant dense<0xFF800000> : vector<8xf32>
    %69 = vector.multi_reduction <maximumf>, %68, %cst_63 [1] : vector<8x8xf32> to vector<8xf32>
    %70 = vector.shape_cast %69 : vector<8xf32> to vector<8x1xf32>
    %71 = vector.broadcast %70 : vector<8x1xf32> to vector<8x8xf32>
    %72 = arith.subf %68, %71 : vector<8x8xf32>
    %73 = math.exp %72 : vector<8x8xf32>
    %cst_64 = arith.constant dense<0.000000e+00> : vector<8xf32>
    %74 = vector.multi_reduction <add>, %73, %cst_64 [1] : vector<8x8xf32> to vector<8xf32>
    %75 = vector.shape_cast %74 : vector<8xf32> to vector<8x1xf32>
    %76 = tpu.reciprocal %75 {approx = true} : vector<8x1xf32> -> vector<8x1xf32>
    %77 = vector.broadcast %76 : vector<8x1xf32> to vector<8x8xf32>
    %78 = arith.mulf %73, %77 : vector<8x8xf32>
    %c0_65 = arith.constant 0 : index
    %c2_66 = arith.constant 2 : index
    %c0_67 = arith.constant 0 : index
    %c0_68 = arith.constant 0 : index
    %79 = vector.load %arg7[%c0_65, %c2_66, %c0_67, %c0_68] : memref<1x8x8x8xf32, #tpu.memory_space<vmem>>, vector<1x1x8x8xf32>
    %80 = vector.shape_cast %79 : vector<1x1x8x8xf32> to vector<8x8xf32>
    %81 = vector.shape_cast %78 : vector<8x8xf32> to vector<1x1x8x8xf32>
    tpu.vector_store %arg7[%c0_65, %c2_66, %c0_67, %c0_68], %81 {strides = array<i32>} : memref<1x8x8x8xf32, #tpu.memory_space<vmem>>, vector<1x1x8x8xf32>,
    %82 = arith.truncf %78 : vector<8x8xf32> to vector<8x8xbf16>
    %cst_69 = arith.constant dense<0.000000e+00> : vector<8x64xf32>
    %83 = tpu.matmul %82, %65, %cst_69 {dimension_numbers = #tpu.dot_dimension_numbers<[1], [0], [0], [1], [0, 0, 1, 1], [], []>} : vector<8x8xbf16>, vector<8x64xbf16>, vector<8x64xf32> -> vector<8x64xf32>
    %84 = arith.truncf %83 : vector<8x64xf32> to vector<8x64xbf16>
    %c0_70 = arith.constant 0 : index
    %c2_71 = arith.constant 2 : index
    %c0_72 = arith.constant 0 : index
    %c0_73 = arith.constant 0 : index
    %85 = vector.load %arg6[%c0_70, %c2_71, %c0_72, %c0_73] : memref<1x8x8x64xbf16, #tpu.memory_space<vmem>>, vector<1x1x8x64xbf16>
    %86 = vector.shape_cast %85 : vector<1x1x8x64xbf16> to vector<8x64xbf16>
    %87 = vector.shape_cast %84 : vector<8x64xbf16> to vector<1x1x8x64xbf16>
    tpu.vector_store %arg6[%c0_70, %c2_71, %c0_72, %c0_73], %87 {strides = array<i32>} : memref<1x8x8x64xbf16, #tpu.memory_space<vmem>>, vector<1x1x8x64xbf16>,
    %c0_74 = arith.constant 0 : index
    %c3 = arith.constant 3 : index
    %c0_75 = arith.constant 0 : index
    %c0_76 = arith.constant 0 : index
    %88 = vector.load %arg2[%c0_74, %c3, %c0_75, %c0_76] : memref<1x8x8x64xbf16, #tpu.memory_space<vmem>>, vector<1x1x8x64xbf16>
    %89 = vector.shape_cast %88 : vector<1x1x8x64xbf16> to vector<8x64xbf16>
    %c0_77 = arith.constant 0 : index
    %c3_78 = arith.constant 3 : index
    %c0_79 = arith.constant 0 : index
    %c0_80 = arith.constant 0 : index
    %90 = vector.load %arg3[%c0_77, %c3_78, %c0_79, %c0_80] : memref<1x8x8x64xbf16, #tpu.memory_space<vmem>>, vector<1x1x8x64xbf16>
    %91 = vector.shape_cast %90 : vector<1x1x8x64xbf16> to vector<8x64xbf16>
    %c0_81 = arith.constant 0 : index
    %c3_82 = arith.constant 3 : index
    %c0_83 = arith.constant 0 : index
    %c0_84 = arith.constant 0 : index
    %92 = vector.load %arg4[%c0_81, %c3_82, %c0_83, %c0_84] : memref<1x8x8x64xbf16, #tpu.memory_space<vmem>>, vector<1x1x8x64xbf16>
    %93 = vector.shape_cast %92 : vector<1x1x8x64xbf16> to vector<8x64xbf16>
    %cst_85 = arith.constant dense<0.000000e+00> : vector<8x8xf32>
    %94 = tpu.matmul %89, %91, %cst_85 {dimension_numbers = #tpu.dot_dimension_numbers<[1], [1], [0], [0], [0, 0, 1, 0], [], []>} : vector<8x64xbf16>, vector<8x64xbf16>, vector<8x8xf32> -> vector<8x8xf32>
    %cst_86 = arith.constant -1.000000e+09 : f32
    %95 = vector.broadcast %cst_86 : f32 to vector<8x8xf32>
    %96 = arith.select %3, %95, %94 : vector<8x8xi1>, vector<8x8xf32>
    %cst_87 = arith.constant dense<0xFF800000> : vector<8xf32>
    %97 = vector.multi_reduction <maximumf>, %96, %cst_87 [1] : vector<8x8xf32> to vector<8xf32>
    %98 = vector.shape_cast %97 : vector<8xf32> to vector<8x1xf32>
    %99 = vector.broadcast %98 : vector<8x1xf32> to vector<8x8xf32>
    %100 = arith.subf %96, %99 : vector<8x8xf32>
    %101 = math.exp %100 : vector<8x8xf32>
    %cst_88 = arith.constant dense<0.000000e+00> : vector<8xf32>
    %102 = vector.multi_reduction <add>, %101, %cst_88 [1] : vector<8x8xf32> to vector<8xf32>
    %103 = vector.shape_cast %102 : vector<8xf32> to vector<8x1xf32>
    %104 = tpu.reciprocal %103 {approx = true} : vector<8x1xf32> -> vector<8x1xf32>
    %105 = vector.broadcast %104 : vector<8x1xf32> to vector<8x8xf32>
    %106 = arith.mulf %101, %105 : vector<8x8xf32>
    %c0_89 = arith.constant 0 : index
    %c3_90 = arith.constant 3 : index
    %c0_91 = arith.constant 0 : index
    %c0_92 = arith.constant 0 : index
    %107 = vector.load %arg7[%c0_89, %c3_90, %c0_91, %c0_92] : memref<1x8x8x8xf32, #tpu.memory_space<vmem>>, vector<1x1x8x8xf32>
    %108 = vector.shape_cast %107 : vector<1x1x8x8xf32> to vector<8x8xf32>
    %109 = vector.shape_cast %106 : vector<8x8xf32> to vector<1x1x8x8xf32>
    tpu.vector_store %arg7[%c0_89, %c3_90, %c0_91, %c0_92], %109 {strides = array<i32>} : memref<1x8x8x8xf32, #tpu.memory_space<vmem>>, vector<1x1x8x8xf32>,
    %110 = arith.truncf %106 : vector<8x8xf32> to vector<8x8xbf16>
    %cst_93 = arith.constant dense<0.000000e+00> : vector<8x64xf32>
    %111 = tpu.matmul %110, %93, %cst_93 {dimension_numbers = #tpu.dot_dimension_numbers<[1], [0], [0], [1], [0, 0, 1, 1], [], []>} : vector<8x8xbf16>, vector<8x64xbf16>, vector<8x64xf32> -> vector<8x64xf32>
    %112 = arith.truncf %111 : vector<8x64xf32> to vector<8x64xbf16>
    %c0_94 = arith.constant 0 : index
    %c3_95 = arith.constant 3 : index
    %c0_96 = arith.constant 0 : index
    %c0_97 = arith.constant 0 : index
    %113 = vector.load %arg6[%c0_94, %c3_95, %c0_96, %c0_97] : memref<1x8x8x64xbf16, #tpu.memory_space<vmem>>, vector<1x1x8x64xbf16>
    %114 = vector.shape_cast %113 : vector<1x1x8x64xbf16> to vector<8x64xbf16>
    %115 = vector.shape_cast %112 : vector<8x64xbf16> to vector<1x1x8x64xbf16>
    tpu.vector_store %arg6[%c0_94, %c3_95, %c0_96, %c0_97], %115 {strides = array<i32>} : memref<1x8x8x64xbf16, #tpu.memory_space<vmem>>, vector<1x1x8x64xbf16>,
    %c0_98 = arith.constant 0 : index
    %c4 = arith.constant 4 : index
    %c0_99 = arith.constant 0 : index
    %c0_100 = arith.constant 0 : index
    %116 = vector.load %arg2[%c0_98, %c4, %c0_99, %c0_100] : memref<1x8x8x64xbf16, #tpu.memory_space<vmem>>, vector<1x1x8x64xbf16>
    %117 = vector.shape_cast %116 : vector<1x1x8x64xbf16> to vector<8x64xbf16>
    %c0_101 = arith.constant 0 : index
    %c4_102 = arith.constant 4 : index
    %c0_103 = arith.constant 0 : index
    %c0_104 = arith.constant 0 : index
    %118 = vector.load %arg3[%c0_101, %c4_102, %c0_103, %c0_104] : memref<1x8x8x64xbf16, #tpu.memory_space<vmem>>, vector<1x1x8x64xbf16>
    %119 = vector.shape_cast %118 : vector<1x1x8x64xbf16> to vector<8x64xbf16>
    %c0_105 = arith.constant 0 : index
    %c4_106 = arith.constant 4 : index
    %c0_107 = arith.constant 0 : index
    %c0_108 = arith.constant 0 : index
    %120 = vector.load %arg4[%c0_105, %c4_106, %c0_107, %c0_108] : memref<1x8x8x64xbf16, #tpu.memory_space<vmem>>, vector<1x1x8x64xbf16>
    %121 = vector.shape_cast %120 : vector<1x1x8x64xbf16> to vector<8x64xbf16>
    %cst_109 = arith.constant dense<0.000000e+00> : vector<8x8xf32>
    %122 = tpu.matmul %117, %119, %cst_109 {dimension_numbers = #tpu.dot_dimension_numbers<[1], [1], [0], [0], [0, 0, 1, 0], [], []>} : vector<8x64xbf16>, vector<8x64xbf16>, vector<8x8xf32> -> vector<8x8xf32>
    %cst_110 = arith.constant -1.000000e+09 : f32
    %123 = vector.broadcast %cst_110 : f32 to vector<8x8xf32>
    %124 = arith.select %3, %123, %122 : vector<8x8xi1>, vector<8x8xf32>
    %cst_111 = arith.constant dense<0xFF800000> : vector<8xf32>
    %125 = vector.multi_reduction <maximumf>, %124, %cst_111 [1] : vector<8x8xf32> to vector<8xf32>
    %126 = vector.shape_cast %125 : vector<8xf32> to vector<8x1xf32>
    %127 = vector.broadcast %126 : vector<8x1xf32> to vector<8x8xf32>
    %128 = arith.subf %124, %127 : vector<8x8xf32>
    %129 = math.exp %128 : vector<8x8xf32>
    %cst_112 = arith.constant dense<0.000000e+00> : vector<8xf32>
    %130 = vector.multi_reduction <add>, %129, %cst_112 [1] : vector<8x8xf32> to vector<8xf32>
    %131 = vector.shape_cast %130 : vector<8xf32> to vector<8x1xf32>
    %132 = tpu.reciprocal %131 {approx = true} : vector<8x1xf32> -> vector<8x1xf32>
    %133 = vector.broadcast %132 : vector<8x1xf32> to vector<8x8xf32>
    %134 = arith.mulf %129, %133 : vector<8x8xf32>
    %c0_113 = arith.constant 0 : index
    %c4_114 = arith.constant 4 : index
    %c0_115 = arith.constant 0 : index
    %c0_116 = arith.constant 0 : index
    %135 = vector.load %arg7[%c0_113, %c4_114, %c0_115, %c0_116] : memref<1x8x8x8xf32, #tpu.memory_space<vmem>>, vector<1x1x8x8xf32>
    %136 = vector.shape_cast %135 : vector<1x1x8x8xf32> to vector<8x8xf32>
    %137 = vector.shape_cast %134 : vector<8x8xf32> to vector<1x1x8x8xf32>
    tpu.vector_store %arg7[%c0_113, %c4_114, %c0_115, %c0_116], %137 {strides = array<i32>} : memref<1x8x8x8xf32, #tpu.memory_space<vmem>>, vector<1x1x8x8xf32>,
    %138 = arith.truncf %134 : vector<8x8xf32> to vector<8x8xbf16>
    %cst_117 = arith.constant dense<0.000000e+00> : vector<8x64xf32>
    %139 = tpu.matmul %138, %121, %cst_117 {dimension_numbers = #tpu.dot_dimension_numbers<[1], [0], [0], [1], [0, 0, 1, 1], [], []>} : vector<8x8xbf16>, vector<8x64xbf16>, vector<8x64xf32> -> vector<8x64xf32>
    %140 = arith.truncf %139 : vector<8x64xf32> to vector<8x64xbf16>
    %c0_118 = arith.constant 0 : index
    %c4_119 = arith.constant 4 : index
    %c0_120 = arith.constant 0 : index
    %c0_121 = arith.constant 0 : index
    %141 = vector.load %arg6[%c0_118, %c4_119, %c0_120, %c0_121] : memref<1x8x8x64xbf16, #tpu.memory_space<vmem>>, vector<1x1x8x64xbf16>
    %142 = vector.shape_cast %141 : vector<1x1x8x64xbf16> to vector<8x64xbf16>
    %143 = vector.shape_cast %140 : vector<8x64xbf16> to vector<1x1x8x64xbf16>
    tpu.vector_store %arg6[%c0_118, %c4_119, %c0_120, %c0_121], %143 {strides = array<i32>} : memref<1x8x8x64xbf16, #tpu.memory_space<vmem>>, vector<1x1x8x64xbf16>,
    %c0_122 = arith.constant 0 : index
    %c5 = arith.constant 5 : index
    %c0_123 = arith.constant 0 : index
    %c0_124 = arith.constant 0 : index
    %144 = vector.load %arg2[%c0_122, %c5, %c0_123, %c0_124] : memref<1x8x8x64xbf16, #tpu.memory_space<vmem>>, vector<1x1x8x64xbf16>
    %145 = vector.shape_cast %144 : vector<1x1x8x64xbf16> to vector<8x64xbf16>
    %c0_125 = arith.constant 0 : index
    %c5_126 = arith.constant 5 : index
    %c0_127 = arith.constant 0 : index
    %c0_128 = arith.constant 0 : index
    %146 = vector.load %arg3[%c0_125, %c5_126, %c0_127, %c0_128] : memref<1x8x8x64xbf16, #tpu.memory_space<vmem>>, vector<1x1x8x64xbf16>
    %147 = vector.shape_cast %146 : vector<1x1x8x64xbf16> to vector<8x64xbf16>
    %c0_129 = arith.constant 0 : index
    %c5_130 = arith.constant 5 : index
    %c0_131 = arith.constant 0 : index
    %c0_132 = arith.constant 0 : index
    %148 = vector.load %arg4[%c0_129, %c5_130, %c0_131, %c0_132] : memref<1x8x8x64xbf16, #tpu.memory_space<vmem>>, vector<1x1x8x64xbf16>
    %149 = vector.shape_cast %148 : vector<1x1x8x64xbf16> to vector<8x64xbf16>
    %cst_133 = arith.constant dense<0.000000e+00> : vector<8x8xf32>
    %150 = tpu.matmul %145, %147, %cst_133 {dimension_numbers = #tpu.dot_dimension_numbers<[1], [1], [0], [0], [0, 0, 1, 0], [], []>} : vector<8x64xbf16>, vector<8x64xbf16>, vector<8x8xf32> -> vector<8x8xf32>
    %cst_134 = arith.constant -1.000000e+09 : f32
    %151 = vector.broadcast %cst_134 : f32 to vector<8x8xf32>
    %152 = arith.select %3, %151, %150 : vector<8x8xi1>, vector<8x8xf32>
    %cst_135 = arith.constant dense<0xFF800000> : vector<8xf32>
    %153 = vector.multi_reduction <maximumf>, %152, %cst_135 [1] : vector<8x8xf32> to vector<8xf32>
    %154 = vector.shape_cast %153 : vector<8xf32> to vector<8x1xf32>
    %155 = vector.broadcast %154 : vector<8x1xf32> to vector<8x8xf32>
    %156 = arith.subf %152, %155 : vector<8x8xf32>
    %157 = math.exp %156 : vector<8x8xf32>
    %cst_136 = arith.constant dense<0.000000e+00> : vector<8xf32>
    %158 = vector.multi_reduction <add>, %157, %cst_136 [1] : vector<8x8xf32> to vector<8xf32>
    %159 = vector.shape_cast %158 : vector<8xf32> to vector<8x1xf32>
    %160 = tpu.reciprocal %159 {approx = true} : vector<8x1xf32> -> vector<8x1xf32>
    %161 = vector.broadcast %160 : vector<8x1xf32> to vector<8x8xf32>
    %162 = arith.mulf %157, %161 : vector<8x8xf32>
    %c0_137 = arith.constant 0 : index
    %c5_138 = arith.constant 5 : index
    %c0_139 = arith.constant 0 : index
    %c0_140 = arith.constant 0 : index
    %163 = vector.load %arg7[%c0_137, %c5_138, %c0_139, %c0_140] : memref<1x8x8x8xf32, #tpu.memory_space<vmem>>, vector<1x1x8x8xf32>
    %164 = vector.shape_cast %163 : vector<1x1x8x8xf32> to vector<8x8xf32>
    %165 = vector.shape_cast %162 : vector<8x8xf32> to vector<1x1x8x8xf32>
    tpu.vector_store %arg7[%c0_137, %c5_138, %c0_139, %c0_140], %165 {strides = array<i32>} : memref<1x8x8x8xf32, #tpu.memory_space<vmem>>, vector<1x1x8x8xf32>,
    %166 = arith.truncf %162 : vector<8x8xf32> to vector<8x8xbf16>
    %cst_141 = arith.constant dense<0.000000e+00> : vector<8x64xf32>
    %167 = tpu.matmul %166, %149, %cst_141 {dimension_numbers = #tpu.dot_dimension_numbers<[1], [0], [0], [1], [0, 0, 1, 1], [], []>} : vector<8x8xbf16>, vector<8x64xbf16>, vector<8x64xf32> -> vector<8x64xf32>
    %168 = arith.truncf %167 : vector<8x64xf32> to vector<8x64xbf16>
    %c0_142 = arith.constant 0 : index
    %c5_143 = arith.constant 5 : index
    %c0_144 = arith.constant 0 : index
    %c0_145 = arith.constant 0 : index
    %169 = vector.load %arg6[%c0_142, %c5_143, %c0_144, %c0_145] : memref<1x8x8x64xbf16, #tpu.memory_space<vmem>>, vector<1x1x8x64xbf16>
    %170 = vector.shape_cast %169 : vector<1x1x8x64xbf16> to vector<8x64xbf16>
    %171 = vector.shape_cast %168 : vector<8x64xbf16> to vector<1x1x8x64xbf16>
    tpu.vector_store %arg6[%c0_142, %c5_143, %c0_144, %c0_145], %171 {strides = array<i32>} : memref<1x8x8x64xbf16, #tpu.memory_space<vmem>>, vector<1x1x8x64xbf16>,
    %c0_146 = arith.constant 0 : index
    %c6 = arith.constant 6 : index
    %c0_147 = arith.constant 0 : index
    %c0_148 = arith.constant 0 : index
    %172 = vector.load %arg2[%c0_146, %c6, %c0_147, %c0_148] : memref<1x8x8x64xbf16, #tpu.memory_space<vmem>>, vector<1x1x8x64xbf16>
    %173 = vector.shape_cast %172 : vector<1x1x8x64xbf16> to vector<8x64xbf16>
    %c0_149 = arith.constant 0 : index
    %c6_150 = arith.constant 6 : index
    %c0_151 = arith.constant 0 : index
    %c0_152 = arith.constant 0 : index
    %174 = vector.load %arg3[%c0_149, %c6_150, %c0_151, %c0_152] : memref<1x8x8x64xbf16, #tpu.memory_space<vmem>>, vector<1x1x8x64xbf16>
    %175 = vector.shape_cast %174 : vector<1x1x8x64xbf16> to vector<8x64xbf16>
    %c0_153 = arith.constant 0 : index
    %c6_154 = arith.constant 6 : index
    %c0_155 = arith.constant 0 : index
    %c0_156 = arith.constant 0 : index
    %176 = vector.load %arg4[%c0_153, %c6_154, %c0_155, %c0_156] : memref<1x8x8x64xbf16, #tpu.memory_space<vmem>>, vector<1x1x8x64xbf16>
    %177 = vector.shape_cast %176 : vector<1x1x8x64xbf16> to vector<8x64xbf16>
    %cst_157 = arith.constant dense<0.000000e+00> : vector<8x8xf32>
    %178 = tpu.matmul %173, %175, %cst_157 {dimension_numbers = #tpu.dot_dimension_numbers<[1], [1], [0], [0], [0, 0, 1, 0], [], []>} : vector<8x64xbf16>, vector<8x64xbf16>, vector<8x8xf32> -> vector<8x8xf32>
    %cst_158 = arith.constant -1.000000e+09 : f32
    %179 = vector.broadcast %cst_158 : f32 to vector<8x8xf32>
    %180 = arith.select %3, %179, %178 : vector<8x8xi1>, vector<8x8xf32>
    %cst_159 = arith.constant dense<0xFF800000> : vector<8xf32>
    %181 = vector.multi_reduction <maximumf>, %180, %cst_159 [1] : vector<8x8xf32> to vector<8xf32>
    %182 = vector.shape_cast %181 : vector<8xf32> to vector<8x1xf32>
    %183 = vector.broadcast %182 : vector<8x1xf32> to vector<8x8xf32>
    %184 = arith.subf %180, %183 : vector<8x8xf32>
    %185 = math.exp %184 : vector<8x8xf32>
    %cst_160 = arith.constant dense<0.000000e+00> : vector<8xf32>
    %186 = vector.multi_reduction <add>, %185, %cst_160 [1] : vector<8x8xf32> to vector<8xf32>
    %187 = vector.shape_cast %186 : vector<8xf32> to vector<8x1xf32>
    %188 = tpu.reciprocal %187 {approx = true} : vector<8x1xf32> -> vector<8x1xf32>
    %189 = vector.broadcast %188 : vector<8x1xf32> to vector<8x8xf32>
    %190 = arith.mulf %185, %189 : vector<8x8xf32>
    %c0_161 = arith.constant 0 : index
    %c6_162 = arith.constant 6 : index
    %c0_163 = arith.constant 0 : index
    %c0_164 = arith.constant 0 : index
    %191 = vector.load %arg7[%c0_161, %c6_162, %c0_163, %c0_164] : memref<1x8x8x8xf32, #tpu.memory_space<vmem>>, vector<1x1x8x8xf32>
    %192 = vector.shape_cast %191 : vector<1x1x8x8xf32> to vector<8x8xf32>
    %193 = vector.shape_cast %190 : vector<8x8xf32> to vector<1x1x8x8xf32>
    tpu.vector_store %arg7[%c0_161, %c6_162, %c0_163, %c0_164], %193 {strides = array<i32>} : memref<1x8x8x8xf32, #tpu.memory_space<vmem>>, vector<1x1x8x8xf32>,
    %194 = arith.truncf %190 : vector<8x8xf32> to vector<8x8xbf16>
    %cst_165 = arith.constant dense<0.000000e+00> : vector<8x64xf32>
    %195 = tpu.matmul %194, %177, %cst_165 {dimension_numbers = #tpu.dot_dimension_numbers<[1], [0], [0], [1], [0, 0, 1, 1], [], []>} : vector<8x8xbf16>, vector<8x64xbf16>, vector<8x64xf32> -> vector<8x64xf32>
    %196 = arith.truncf %195 : vector<8x64xf32> to vector<8x64xbf16>
    %c0_166 = arith.constant 0 : index
    %c6_167 = arith.constant 6 : index
    %c0_168 = arith.constant 0 : index
    %c0_169 = arith.constant 0 : index
    %197 = vector.load %arg6[%c0_166, %c6_167, %c0_168, %c0_169] : memref<1x8x8x64xbf16, #tpu.memory_space<vmem>>, vector<1x1x8x64xbf16>
    %198 = vector.shape_cast %197 : vector<1x1x8x64xbf16> to vector<8x64xbf16>
    %199 = vector.shape_cast %196 : vector<8x64xbf16> to vector<1x1x8x64xbf16>
    tpu.vector_store %arg6[%c0_166, %c6_167, %c0_168, %c0_169], %199 {strides = array<i32>} : memref<1x8x8x64xbf16, #tpu.memory_space<vmem>>, vector<1x1x8x64xbf16>,
    %c0_170 = arith.constant 0 : index
    %c7 = arith.constant 7 : index
    %c0_171 = arith.constant 0 : index
    %c0_172 = arith.constant 0 : index
    %200 = vector.load %arg2[%c0_170, %c7, %c0_171, %c0_172] : memref<1x8x8x64xbf16, #tpu.memory_space<vmem>>, vector<1x1x8x64xbf16>
    %201 = vector.shape_cast %200 : vector<1x1x8x64xbf16> to vector<8x64xbf16>
    %c0_173 = arith.constant 0 : index
    %c7_174 = arith.constant 7 : index
    %c0_175 = arith.constant 0 : index
    %c0_176 = arith.constant 0 : index
    %202 = vector.load %arg3[%c0_173, %c7_174, %c0_175, %c0_176] : memref<1x8x8x64xbf16, #tpu.memory_space<vmem>>, vector<1x1x8x64xbf16>
    %203 = vector.shape_cast %202 : vector<1x1x8x64xbf16> to vector<8x64xbf16>
    %c0_177 = arith.constant 0 : index
    %c7_178 = arith.constant 7 : index
    %c0_179 = arith.constant 0 : index
    %c0_180 = arith.constant 0 : index
    %204 = vector.load %arg4[%c0_177, %c7_178, %c0_179, %c0_180] : memref<1x8x8x64xbf16, #tpu.memory_space<vmem>>, vector<1x1x8x64xbf16>
    %205 = vector.shape_cast %204 : vector<1x1x8x64xbf16> to vector<8x64xbf16>
    %cst_181 = arith.constant dense<0.000000e+00> : vector<8x8xf32>
    %206 = tpu.matmul %201, %203, %cst_181 {dimension_numbers = #tpu.dot_dimension_numbers<[1], [1], [0], [0], [0, 0, 1, 0], [], []>} : vector<8x64xbf16>, vector<8x64xbf16>, vector<8x8xf32> -> vector<8x8xf32>
    %cst_182 = arith.constant -1.000000e+09 : f32
    %207 = vector.broadcast %cst_182 : f32 to vector<8x8xf32>
    %208 = arith.select %3, %207, %206 : vector<8x8xi1>, vector<8x8xf32>
    %cst_183 = arith.constant dense<0xFF800000> : vector<8xf32>
    %209 = vector.multi_reduction <maximumf>, %208, %cst_183 [1] : vector<8x8xf32> to vector<8xf32>
    %210 = vector.shape_cast %209 : vector<8xf32> to vector<8x1xf32>
    %211 = vector.broadcast %210 : vector<8x1xf32> to vector<8x8xf32>
    %212 = arith.subf %208, %211 : vector<8x8xf32>
    %213 = math.exp %212 : vector<8x8xf32>
    %cst_184 = arith.constant dense<0.000000e+00> : vector<8xf32>
    %214 = vector.multi_reduction <add>, %213, %cst_184 [1] : vector<8x8xf32> to vector<8xf32>
    %215 = vector.shape_cast %214 : vector<8xf32> to vector<8x1xf32>
    %216 = tpu.reciprocal %215 {approx = true} : vector<8x1xf32> -> vector<8x1xf32>
    %217 = vector.broadcast %216 : vector<8x1xf32> to vector<8x8xf32>
    %218 = arith.mulf %213, %217 : vector<8x8xf32>
    %c0_185 = arith.constant 0 : index
    %c7_186 = arith.constant 7 : index
    %c0_187 = arith.constant 0 : index
    %c0_188 = arith.constant 0 : index
    %219 = vector.load %arg7[%c0_185, %c7_186, %c0_187, %c0_188] : memref<1x8x8x8xf32, #tpu.memory_space<vmem>>, vector<1x1x8x8xf32>
    %220 = vector.shape_cast %219 : vector<1x1x8x8xf32> to vector<8x8xf32>
    %221 = vector.shape_cast %218 : vector<8x8xf32> to vector<1x1x8x8xf32>
    tpu.vector_store %arg7[%c0_185, %c7_186, %c0_187, %c0_188], %221 {strides = array<i32>} : memref<1x8x8x8xf32, #tpu.memory_space<vmem>>, vector<1x1x8x8xf32>,
    %222 = arith.truncf %218 : vector<8x8xf32> to vector<8x8xbf16>
    %cst_189 = arith.constant dense<0.000000e+00> : vector<8x64xf32>
    %223 = tpu.matmul %222, %205, %cst_189 {dimension_numbers = #tpu.dot_dimension_numbers<[1], [0], [0], [1], [0, 0, 1, 1], [], []>} : vector<8x8xbf16>, vector<8x64xbf16>, vector<8x64xf32> -> vector<8x64xf32>
    %224 = arith.truncf %223 : vector<8x64xf32> to vector<8x64xbf16>
    %c0_190 = arith.constant 0 : index
    %c7_191 = arith.constant 7 : index
    %c0_192 = arith.constant 0 : index
    %c0_193 = arith.constant 0 : index
    %225 = vector.load %arg6[%c0_190, %c7_191, %c0_192, %c0_193] : memref<1x8x8x64xbf16, #tpu.memory_space<vmem>>, vector<1x1x8x64xbf16>
    %226 = vector.shape_cast %225 : vector<1x1x8x64xbf16> to vector<8x64xbf16>
    %227 = vector.shape_cast %224 : vector<8x64xbf16> to vector<1x1x8x64xbf16>
    tpu.vector_store %arg6[%c0_190, %c7_191, %c0_192, %c0_193], %227 {strides = array<i32>} : memref<1x8x8x64xbf16, #tpu.memory_space<vmem>>, vector<1x1x8x64xbf16>,
    return
  }
  func.func @transform_0(%arg0: i32, %arg1: i32) -> (i32, i32, i32, i32) {
    %c0_i32 = arith.constant 0 : i32
    %c0_i32_0 = arith.constant 0 : i32
    %c0_i32_1 = arith.constant 0 : i32
    return %arg0, %arg1, %c0_i32, %c0_i32_0 : i32, i32, i32, i32
  }
  func.func @transform_1(%arg0: i32, %arg1: i32) -> (i32, i32, i32, i32) {
    %c0_i32 = arith.constant 0 : i32
    %c0_i32_0 = arith.constant 0 : i32
    %c0_i32_1 = arith.constant 0 : i32
    return %arg0, %arg1, %c0_i32, %c0_i32_0 : i32, i32, i32, i32
  }
  func.func @transform_2(%arg0: i32, %arg1: i32) -> (i32, i32, i32, i32) {
    %c0_i32 = arith.constant 0 : i32
    %c0_i32_0 = arith.constant 0 : i32
    %c0_i32_1 = arith.constant 0 : i32
    return %arg0, %arg1, %c0_i32, %c0_i32_0 : i32, i32, i32, i32
  }
  func.func @transform_3(%arg0: i32, %arg1: i32) -> (i32, i32, i32) {
    %c0_i32 = arith.constant 0 : i32
    %c0_i32_0 = arith.constant 0 : i32
    %c0_i32_1 = arith.constant 0 : i32
    return %arg0, %c0_i32, %c0_i32_0 : i32, i32, i32
  }
  func.func @transform_4(%arg0: i32, %arg1: i32) -> (i32, i32, i32, i32) {
    %c0_i32 = arith.constant 0 : i32
    %c0_i32_0 = arith.constant 0 : i32
    %c0_i32_1 = arith.constant 0 : i32
    return %arg0, %arg1, %c0_i32, %c0_i32_0 : i32, i32, i32, i32
  }
  func.func @transform_5(%arg0: i32, %arg1: i32) -> (i32, i32, i32, i32) {
    %c0_i32 = arith.constant 0 : i32
    %c0_i32_0 = arith.constant 0 : i32
    %c0_i32_1 = arith.constant 0 : i32
    return %arg0, %arg1, %c0_i32, %c0_i32_0 : i32, i32, i32, i32
  }
}

module attributes {stable_mosaic.version = 11 : i64} {
  func.func @_fc_ln_kernel(%arg0: i32, %arg1: i32, %arg2: memref<1x8x8x64xbf16, #tpu.memory_space<vmem>>, %arg3: memref<8x64x512xbf16, #tpu.memory_space<vmem>>, %arg4: memref<1x8x512xf32, #tpu.memory_space<vmem>>, %arg5: memref<1x8x512xf32, #tpu.memory_space<vmem>>) attributes {dimension_semantics = [#tpu.dimension_semantics<parallel>, #tpu.dimension_semantics<parallel>], iteration_bounds = array<i64: 2, 1>, scalar_prefetch = 0 : i64, scratch_operands = 0 : i64, tpu.core_type = #tpu.core_type<tc>, window_params = [{transform_indices = @transform_0, window_bounds = array<i64: 1, 8, 8, 64>}, {pipeline_mode = #tpu.pipeline_mode<synchronous>, transform_indices = @transform_1, window_bounds = array<i64: 8, 64, 512>}, {transform_indices = @transform_2, window_bounds = array<i64: 1, 8, 512>}, {transform_indices = @transform_3, window_bounds = array<i64: 1, 8, 512>}]} {
    %c0 = arith.constant 0 : index
    %c0_0 = arith.constant 0 : index
    %c0_1 = arith.constant 0 : index
    %0 = vector.load %arg4[%c0, %c0_0, %c0_1] : memref<1x8x512xf32, #tpu.memory_space<vmem>>, vector<1x8x512xf32>
    %1 = vector.shape_cast %0 : vector<1x8x512xf32> to vector<8x512xf32>
    %c0_2 = arith.constant 0 : index
    %c0_3 = arith.constant 0 : index
    %c0_4 = arith.constant 0 : index
    %c0_5 = arith.constant 0 : index
    %2 = vector.load %arg2[%c0_2, %c0_3, %c0_4, %c0_5] : memref<1x8x8x64xbf16, #tpu.memory_space<vmem>>, vector<1x1x8x64xbf16>
    %3 = vector.shape_cast %2 : vector<1x1x8x64xbf16> to vector<8x64xbf16>
    %c0_6 = arith.constant 0 : index
    %c0_7 = arith.constant 0 : index
    %c0_8 = arith.constant 0 : index
    %4 = vector.load %arg3[%c0_6, %c0_7, %c0_8] : memref<8x64x512xbf16, #tpu.memory_space<vmem>>, vector<1x64x512xbf16>
    %5 = vector.shape_cast %4 : vector<1x64x512xbf16> to vector<64x512xbf16>
    %cst = arith.constant dense<0.000000e+00> : vector<8x512xf32>
    %6 = tpu.matmul %3, %5, %cst {dimension_numbers = #tpu.dot_dimension_numbers<[1], [0], [0], [1], [0, 0, 1, 1], [], []>} : vector<8x64xbf16>, vector<64x512xbf16>, vector<8x512xf32> -> vector<8x512xf32>
    %7 = arith.addf %1, %6 : vector<8x512xf32>
    %c0_9 = arith.constant 0 : index
    %c1 = arith.constant 1 : index
    %c0_10 = arith.constant 0 : index
    %c0_11 = arith.constant 0 : index
    %8 = vector.load %arg2[%c0_9, %c1, %c0_10, %c0_11] : memref<1x8x8x64xbf16, #tpu.memory_space<vmem>>, vector<1x1x8x64xbf16>
    %9 = vector.shape_cast %8 : vector<1x1x8x64xbf16> to vector<8x64xbf16>
    %c1_12 = arith.constant 1 : index
    %c0_13 = arith.constant 0 : index
    %c0_14 = arith.constant 0 : index
    %10 = vector.load %arg3[%c1_12, %c0_13, %c0_14] : memref<8x64x512xbf16, #tpu.memory_space<vmem>>, vector<1x64x512xbf16>
    %11 = vector.shape_cast %10 : vector<1x64x512xbf16> to vector<64x512xbf16>
    %cst_15 = arith.constant dense<0.000000e+00> : vector<8x512xf32>
    %12 = tpu.matmul %9, %11, %cst_15 {dimension_numbers = #tpu.dot_dimension_numbers<[1], [0], [0], [1], [0, 0, 1, 1], [], []>} : vector<8x64xbf16>, vector<64x512xbf16>, vector<8x512xf32> -> vector<8x512xf32>
    %13 = arith.addf %7, %12 : vector<8x512xf32>
    %c0_16 = arith.constant 0 : index
    %c2 = arith.constant 2 : index
    %c0_17 = arith.constant 0 : index
    %c0_18 = arith.constant 0 : index
    %14 = vector.load %arg2[%c0_16, %c2, %c0_17, %c0_18] : memref<1x8x8x64xbf16, #tpu.memory_space<vmem>>, vector<1x1x8x64xbf16>
    %15 = vector.shape_cast %14 : vector<1x1x8x64xbf16> to vector<8x64xbf16>
    %c2_19 = arith.constant 2 : index
    %c0_20 = arith.constant 0 : index
    %c0_21 = arith.constant 0 : index
    %16 = vector.load %arg3[%c2_19, %c0_20, %c0_21] : memref<8x64x512xbf16, #tpu.memory_space<vmem>>, vector<1x64x512xbf16>
    %17 = vector.shape_cast %16 : vector<1x64x512xbf16> to vector<64x512xbf16>
    %cst_22 = arith.constant dense<0.000000e+00> : vector<8x512xf32>
    %18 = tpu.matmul %15, %17, %cst_22 {dimension_numbers = #tpu.dot_dimension_numbers<[1], [0], [0], [1], [0, 0, 1, 1], [], []>} : vector<8x64xbf16>, vector<64x512xbf16>, vector<8x512xf32> -> vector<8x512xf32>
    %19 = arith.addf %13, %18 : vector<8x512xf32>
    %c0_23 = arith.constant 0 : index
    %c3 = arith.constant 3 : index
    %c0_24 = arith.constant 0 : index
    %c0_25 = arith.constant 0 : index
    %20 = vector.load %arg2[%c0_23, %c3, %c0_24, %c0_25] : memref<1x8x8x64xbf16, #tpu.memory_space<vmem>>, vector<1x1x8x64xbf16>
    %21 = vector.shape_cast %20 : vector<1x1x8x64xbf16> to vector<8x64xbf16>
    %c3_26 = arith.constant 3 : index
    %c0_27 = arith.constant 0 : index
    %c0_28 = arith.constant 0 : index
    %22 = vector.load %arg3[%c3_26, %c0_27, %c0_28] : memref<8x64x512xbf16, #tpu.memory_space<vmem>>, vector<1x64x512xbf16>
    %23 = vector.shape_cast %22 : vector<1x64x512xbf16> to vector<64x512xbf16>
    %cst_29 = arith.constant dense<0.000000e+00> : vector<8x512xf32>
    %24 = tpu.matmul %21, %23, %cst_29 {dimension_numbers = #tpu.dot_dimension_numbers<[1], [0], [0], [1], [0, 0, 1, 1], [], []>} : vector<8x64xbf16>, vector<64x512xbf16>, vector<8x512xf32> -> vector<8x512xf32>
    %25 = arith.addf %19, %24 : vector<8x512xf32>
    %c0_30 = arith.constant 0 : index
    %c4 = arith.constant 4 : index
    %c0_31 = arith.constant 0 : index
    %c0_32 = arith.constant 0 : index
    %26 = vector.load %arg2[%c0_30, %c4, %c0_31, %c0_32] : memref<1x8x8x64xbf16, #tpu.memory_space<vmem>>, vector<1x1x8x64xbf16>
    %27 = vector.shape_cast %26 : vector<1x1x8x64xbf16> to vector<8x64xbf16>
    %c4_33 = arith.constant 4 : index
    %c0_34 = arith.constant 0 : index
    %c0_35 = arith.constant 0 : index
    %28 = vector.load %arg3[%c4_33, %c0_34, %c0_35] : memref<8x64x512xbf16, #tpu.memory_space<vmem>>, vector<1x64x512xbf16>
    %29 = vector.shape_cast %28 : vector<1x64x512xbf16> to vector<64x512xbf16>
    %cst_36 = arith.constant dense<0.000000e+00> : vector<8x512xf32>
    %30 = tpu.matmul %27, %29, %cst_36 {dimension_numbers = #tpu.dot_dimension_numbers<[1], [0], [0], [1], [0, 0, 1, 1], [], []>} : vector<8x64xbf16>, vector<64x512xbf16>, vector<8x512xf32> -> vector<8x512xf32>
    %31 = arith.addf %25, %30 : vector<8x512xf32>
    %c0_37 = arith.constant 0 : index
    %c5 = arith.constant 5 : index
    %c0_38 = arith.constant 0 : index
    %c0_39 = arith.constant 0 : index
    %32 = vector.load %arg2[%c0_37, %c5, %c0_38, %c0_39] : memref<1x8x8x64xbf16, #tpu.memory_space<vmem>>, vector<1x1x8x64xbf16>
    %33 = vector.shape_cast %32 : vector<1x1x8x64xbf16> to vector<8x64xbf16>
    %c5_40 = arith.constant 5 : index
    %c0_41 = arith.constant 0 : index
    %c0_42 = arith.constant 0 : index
    %34 = vector.load %arg3[%c5_40, %c0_41, %c0_42] : memref<8x64x512xbf16, #tpu.memory_space<vmem>>, vector<1x64x512xbf16>
    %35 = vector.shape_cast %34 : vector<1x64x512xbf16> to vector<64x512xbf16>
    %cst_43 = arith.constant dense<0.000000e+00> : vector<8x512xf32>
    %36 = tpu.matmul %33, %35, %cst_43 {dimension_numbers = #tpu.dot_dimension_numbers<[1], [0], [0], [1], [0, 0, 1, 1], [], []>} : vector<8x64xbf16>, vector<64x512xbf16>, vector<8x512xf32> -> vector<8x512xf32>
    %37 = arith.addf %31, %36 : vector<8x512xf32>
    %c0_44 = arith.constant 0 : index
    %c6 = arith.constant 6 : index
    %c0_45 = arith.constant 0 : index
    %c0_46 = arith.constant 0 : index
    %38 = vector.load %arg2[%c0_44, %c6, %c0_45, %c0_46] : memref<1x8x8x64xbf16, #tpu.memory_space<vmem>>, vector<1x1x8x64xbf16>
    %39 = vector.shape_cast %38 : vector<1x1x8x64xbf16> to vector<8x64xbf16>
    %c6_47 = arith.constant 6 : index
    %c0_48 = arith.constant 0 : index
    %c0_49 = arith.constant 0 : index
    %40 = vector.load %arg3[%c6_47, %c0_48, %c0_49] : memref<8x64x512xbf16, #tpu.memory_space<vmem>>, vector<1x64x512xbf16>
    %41 = vector.shape_cast %40 : vector<1x64x512xbf16> to vector<64x512xbf16>
    %cst_50 = arith.constant dense<0.000000e+00> : vector<8x512xf32>
    %42 = tpu.matmul %39, %41, %cst_50 {dimension_numbers = #tpu.dot_dimension_numbers<[1], [0], [0], [1], [0, 0, 1, 1], [], []>} : vector<8x64xbf16>, vector<64x512xbf16>, vector<8x512xf32> -> vector<8x512xf32>
    %43 = arith.addf %37, %42 : vector<8x512xf32>
    %c0_51 = arith.constant 0 : index
    %c7 = arith.constant 7 : index
    %c0_52 = arith.constant 0 : index
    %c0_53 = arith.constant 0 : index
    %44 = vector.load %arg2[%c0_51, %c7, %c0_52, %c0_53] : memref<1x8x8x64xbf16, #tpu.memory_space<vmem>>, vector<1x1x8x64xbf16>
    %45 = vector.shape_cast %44 : vector<1x1x8x64xbf16> to vector<8x64xbf16>
    %c7_54 = arith.constant 7 : index
    %c0_55 = arith.constant 0 : index
    %c0_56 = arith.constant 0 : index
    %46 = vector.load %arg3[%c7_54, %c0_55, %c0_56] : memref<8x64x512xbf16, #tpu.memory_space<vmem>>, vector<1x64x512xbf16>
    %47 = vector.shape_cast %46 : vector<1x64x512xbf16> to vector<64x512xbf16>
    %cst_57 = arith.constant dense<0.000000e+00> : vector<8x512xf32>
    %48 = tpu.matmul %45, %47, %cst_57 {dimension_numbers = #tpu.dot_dimension_numbers<[1], [0], [0], [1], [0, 0, 1, 1], [], []>} : vector<8x64xbf16>, vector<64x512xbf16>, vector<8x512xf32> -> vector<8x512xf32>
    %49 = arith.addf %43, %48 : vector<8x512xf32>
    %cst_58 = arith.constant dense<0.000000e+00> : vector<8xf32>
    %50 = vector.multi_reduction <add>, %49, %cst_58 [1] : vector<8x512xf32> to vector<8xf32>
    %51 = vector.shape_cast %50 : vector<8xf32> to vector<8x1xf32>
    %cst_59 = arith.constant 5.120000e+02 : f32
    %52 = vector.broadcast %cst_59 : f32 to vector<8x1xf32>
    %53 = arith.divf %51, %52 : vector<8x1xf32>
    %54 = vector.broadcast %53 : vector<8x1xf32> to vector<8x512xf32>
    %55 = arith.subf %49, %54 : vector<8x512xf32>
    %56 = arith.mulf %55, %55 : vector<8x512xf32>
    %cst_60 = arith.constant dense<0.000000e+00> : vector<8xf32>
    %57 = vector.multi_reduction <add>, %56, %cst_60 [1] : vector<8x512xf32> to vector<8xf32>
    %58 = vector.shape_cast %57 : vector<8xf32> to vector<8x1xf32>
    %cst_61 = arith.constant 5.120000e+02 : f32
    %59 = vector.broadcast %cst_61 : f32 to vector<8x1xf32>
    %60 = arith.divf %58, %59 : vector<8x1xf32>
    %61 = vector.broadcast %53 : vector<8x1xf32> to vector<8x512xf32>
    %62 = arith.subf %49, %61 : vector<8x512xf32>
    %cst_62 = arith.constant 9.99999974E-6 : f32
    %63 = vector.broadcast %cst_62 : f32 to vector<8x1xf32>
    %64 = arith.addf %60, %63 : vector<8x1xf32>
    %65 = math.rsqrt %64 : vector<8x1xf32>
    %66 = vector.broadcast %65 : vector<8x1xf32> to vector<8x512xf32>
    %67 = arith.mulf %62, %66 : vector<8x512xf32>
    %c0_63 = arith.constant 0 : index
    %c0_64 = arith.constant 0 : index
    %c0_65 = arith.constant 0 : index
    %68 = vector.load %arg5[%c0_63, %c0_64, %c0_65] : memref<1x8x512xf32, #tpu.memory_space<vmem>>, vector<1x8x512xf32>
    %69 = vector.shape_cast %68 : vector<1x8x512xf32> to vector<8x512xf32>
    %70 = vector.shape_cast %67 : vector<8x512xf32> to vector<1x8x512xf32>
    tpu.vector_store %arg5[%c0_63, %c0_64, %c0_65], %70 {strides = array<i32>} : memref<1x8x512xf32, #tpu.memory_space<vmem>>, vector<1x8x512xf32>,
    return
  }
  func.func @transform_0(%arg0: i32, %arg1: i32) -> (i32, i32, i32, i32) {
    %c0_i32 = arith.constant 0 : i32
    %c0_i32_0 = arith.constant 0 : i32
    %c0_i32_1 = arith.constant 0 : i32
    return %arg0, %c0_i32, %arg1, %c0_i32_0 : i32, i32, i32, i32
  }
  func.func @transform_1(%arg0: i32, %arg1: i32) -> (i32, i32, i32) {
    %c0_i32 = arith.constant 0 : i32
    %c0_i32_0 = arith.constant 0 : i32
    %c0_i32_1 = arith.constant 0 : i32
    %c0_i32_2 = arith.constant 0 : i32
    return %c0_i32, %c0_i32_0, %c0_i32_1 : i32, i32, i32
  }
  func.func @transform_2(%arg0: i32, %arg1: i32) -> (i32, i32, i32) {
    %c0_i32 = arith.constant 0 : i32
    %c0_i32_0 = arith.constant 0 : i32
    return %arg0, %arg1, %c0_i32 : i32, i32, i32
  }
  func.func @transform_3(%arg0: i32, %arg1: i32) -> (i32, i32, i32) {
    %c0_i32 = arith.constant 0 : i32
    %c0_i32_0 = arith.constant 0 : i32
    return %arg0, %arg1, %c0_i32 : i32, i32, i32
  }
}

</mosaic_0001>

<bundles_post_ra>
// kernel: multi_head_attention.4
= control target key start
LH: loop header
LB: loop body
LE: loop exit
PB: predicated region body
PF: predicated region fallthrough
CT: control target
= control target key end

     0   :  { %11 = vsyncpa [#allocation3], 0  ;;  %s1602_s0 = inlined_call_operand.vmem [shape: bf16[2,8,8,64], index: 0, kind: input, shape index: {}]   ;;  %s1603_s1 = inlined_call_operand.vmem [shape: bf16[2,8,8,64], index: 1, kind: input, shape index: {}]   ;;  %s1604_s2 = inlined_call_operand.vmem [shape: bf16[2,8,8,64], index: 2, kind: input, shape index: {}]   ;;  %s1605_s3 = inlined_call_operand.vmem [shape: s8[2,8,8], index: 3, kind: input, shape index: {}]   ;;  %s1606_s4 = inlined_call_operand.vmem [shape: bf16[2,8,8,64], index: 4, kind: output, shape index: {0}]   ;;  %s1607_s5 = inlined_call_operand.hbm [shape: f32[2,8,8,8], index: 5, kind: output, shape index: {1}]  }
   0x1   :  { %13 = vsyncpa [#allocation3 + $0x1], 0  ;;  %s1344_s18 = smov 0   ;;  %s1346_s19 = smov 0  }
   0x2   :  { %s1348_s20 = smov 0   ;;  %s1350_s21 = smov 0  }
   0x3   :  { %s1352_s22 = smov 0   ;;  %s1354_s23 = smov 0  }
   0x4 LB: > { %s1065_s24 = sadd.s32 4294967295, %s1309_s23   ;;  %s1066_s25 = sadd.s32 4294967294, %s1309_s23   ;;  %s1309_s23 = sphi %s1354_s23, %s19_s23   ;;  %s1305_s22 = sphi %s1352_s22, %s1616_s22   ;;  %s1301_s21 = sphi %s1350_s21, %s1615_s21   ;;  %s1297_s20 = sphi %s1348_s20, %s1614_s20   ;;  %s1293_s19 = sphi %s1346_s19, %s1613_s19   ;;  %s1289_s18 = sphi %s1344_s18, %s1612_s18  }
   0x5   : > { %s31_s26 = sadd.s32 1, %s1305_s22  ;;  %s178_s27 = sadd.s32 1, %s1297_s20 }
   0x6   : > { %p33_p0 = scmp.ge.s32.totalorder %s31_s26, 2  ;;  %p188_p1 = scmp.ne.s32.totalorder %s1297_s20, %s1293_s19 }
   0x7   : > { %p189_p2 = scmp.eq.s32.totalorder %s1065_s24, 1  ;;  %p194_p3 = scmp.ne.s32.totalorder %s1293_s19, %s1289_s18 }
   0x8   : > { %s1618_s26 = smov (%p33_p0, %s31_s26), 0  ;;  %p195_p5 = scmp.eq.s32.totalorder %s1066_s25, 1 }
   0x9   : > { %p1384_p4 = por %p189_p2, %p188_p1  ;;  %s173_s29 = ssub.s32 %s1305_s22, %s1618_s26 }
   0xa   : > { %p1069_p6 = scmp.ge.s32.totalorder %s1309_s23, 1  ;;  %p176_p7 = scmp.eq.s32.totalorder %s173_s29, 0 }
   0xb   : > { %p1391_p8 = por %p195_p5, %p194_p3  ;;  %p259_p9 = scmp.lt.s32.totalorder %s1309_s23, 3 }
   0xc   : > { %s1397_s6 = scalar_select %p176_p7, %s1297_s20, %s178_s27  }
   0xd   : > { %p260_p10 = pnand %p1069_p6, %p259_p9 }
   0xe   : > { %p323_p11 = scmp.lt.s32.totalorder (!%p260_p10), %s1301_s21, 1 }
   0xf   : > { %263 = sbr.rel (%p260_p10) target bundleno = 987 (0x3db), region = 36 }
  0x14   : > { %s324_s7 = scalar_select %p323_p11, %s1301_s21, 1  ;;  %vm375_vm0 = vcmask 523264   ;;  %v1311_v10 = vmov 0   ;;  %vm399_vm3 = vcmask 64512   ;;  %vm416_vm4 = vcmask 1043456  }
  0x15   : > { %vm434_vm5 = vcmask 519168  }
  0x16   : > { %s1401_s8 = sshll.u32 %s324_s7, 5  ;;  %s1077_s15 = sshll.u32 %s324_s7, 1 }
  0x17   : > { %s1407_s11 = scalar_lea.vmem %s1603_s1, %s1401_s8  ;;  %s1417_s14 = scalar_lea.vmem %s1602_s0, %s1401_s8 }
  0x18   : > { %v373_v0 = vld [vmem:[%s1407_s11] sm:$0xf]  ;;  %v1083_v1 = vld [vmem:[%s1407_s11 + $0x4] sm:$0xf]  ;;  %v1097_v6 = vld [vmem:[%s1407_s11 + $0xc] sm:$0xf]  ;;  %s355_s24 = scalar_lea.vmem %s1605_s3, %s1077_s15  ;;  %s1449_s29 = scalar_lea.vmem %s1604_s2, %s1401_s8 }
  0x19   : > { %v380_v2 = vsel %vm375_vm0, %v373_v0, 0  ;;  %v446_v3 = vsel %vm375_vm0, %v1083_v1, 0  ;;  %v372_v4 = vld [vmem:[%s1417_s14] sm:$0xf]  ;;  %v1082_v5 = vld [vmem:[%s1417_s14 + $0x4] sm:$0xf]  ;;  %s1496_s13 = scalar_lea.vmem %s1606_s4, %s1401_s8 }
  0x1a   : > { %389 = vmatpush.bf16.xpose.msra.mxu0 %v380_v2  ;;  %455 = vmatpush.bf16.xpose.msra.mxu2 %v446_v3  ;;  %v570_v7 = vsel %vm375_vm0, %v1097_v6, 0  ;;  %v1096_v8 = vld [vmem:[%s1417_s14 + $0xc] sm:$0xf]  ;;  %v370_v9 = vld [vmem:[%s355_s24] sm:$0x3]  ;;  %s319_s7 = sand.u32 1, %s1293_s19  }
  0x1b   : > { %vm371_vm1 = vnez %v370_v9  ;;  %v1111_v18 = vld [vmem:[%s1407_s11 + $0x14] sm:$0xf]  ;;  %v374_v32 = vld [vmem:[%s1449_s29] sm:$0xf]  ;;  %v1090_v40 = vld [vmem:[%s1407_s11 + $0x8] sm:$0xf] }
  0x1c   : > { %v395_v11 = vsel %vm371_vm1, 16843009, %v1311_v10  ;;  %v694_v19 = vsel %vm375_vm0, %v1111_v18, 0  ;;  %v1110_v20 = vld [vmem:[%s1417_s14 + $0x14] sm:$0xf]  ;;  %v418_v33 = vsel %vm416_vm4, %v374_v32, 0 }
  0x1d   : > { %v396_v12 = vunpack.c.0.s8 %v395_v11  ;;  %427 = vmatpush.bf16.msra.mxu1 %v418_v33  ;;  %v508_v41 = vsel %vm375_vm0, %v1090_v40, 0  ;;  %s1070_s9 = sshll.u32 %s319_s7, 6  ;;  %v1104_v49 = vld [vmem:[%s1407_s11 + $0x10] sm:$0xf]  ;;  %v1125_v53 = vld [vmem:[%s1407_s11 + $0x1c] sm:$0xf] }
  0x1e   : > { %s1469_s10 = scalar_lea.vmem [#allocation2], %s1070_s9  ;;  %v632_v52 = vsel %vm375_vm0, %v1104_v49, 0  ;;  %v818_v54 = vsel %vm375_vm0, %v1125_v53, 0  ;;  %v1124_v55 = vld [vmem:[%s1417_s14 + $0x1c] sm:$0xf]  ;;  %s1140_s8 = sshll.u32 %s1301_s21, 6 }
  0x1f   : > { %vm1430_vm2 = vcmp.ne.s32.totalorder %v396_v12, 0  ;;  %v1118_v56 = vld [vmem:[%s1407_s11 + $0x18] sm:$0xf]  ;;  %v1089_v57 = vld [vmem:[%s1417_s14 + $0x8] sm:$0xf]  ;;  %s897_s16 = scalar_lea.hbm %s1607_s5, %s1140_s8  ;;  %s898_s17 = sshll.u32 %s1469_s10, 4  ;;  %s899_s17 = int_to_ptr.vmem [resolvable:$true] %s898_s17 }
  0x20   : > { %v756_v58 = vsel %vm375_vm0, %v1118_v56, 0  ;;  %v1103_v59 = vld [vmem:[%s1417_s14 + $0x10] sm:$0xf]  ;;  %v1117_v60 = vld [vmem:[%s1417_s14 + $0x18] sm:$0xf]  ;;  %s900_s24 = sshll.u32 %s897_s16, 4  ;;  %s901_s24 = int_to_ptr.hbm [resolvable:$true] %s900_s24 }
  0x21   : > { %1080 = vmatmul.msk.bf16.vlgmr.msra.gmra.mxu0 %vm375_vm0, %v372_v4  ;;  %1085 = vmatmul.msk.bf16.vlgmr.msra.gmra.mxu2 %vm375_vm0, %v1082_v5  ;;  %v1084_v63 = vld [vmem:[%s1449_s29 + $0x4] sm:$0xf]  ;;  %s880_s25 = scalar_lea.sflag [#allocation3], %s319_s7  ;;  %s1245_s27 = sshra.s32 %s901_s24, 4  ;;  %s1246_s27 = int_to_ptr.hbm [resolvable:$true] %s1245_s27 }
  0x22   : > { %579 = vmatpush.bf16.xpose.msrb.mxu0 %v570_v7  ;;  %517 = vmatpush.bf16.xpose.msrb.mxu1 %v508_v41  ;;  %v480_v1 = vsel %vm416_vm4, %v1084_v63, 0  ;;  %v1091_v41 = vld [vmem:[%s1449_s29 + $0x8] sm:$0xf]  ;;  %v1112_v63 = vld [vmem:[%s1449_s29 + $0x14] sm:$0xf]  ;;  %s1251_s11 = scalar_lea.hbm %s1607_s5, 128  ;;  %p1252_p1 = scmp.lt.s32.totalorder %s1246_s27, %s1607_s5 }
  0x23   : > { %489 = vmatpush.bf16.msra.mxu3 %v480_v1  ;;  %v1105_v1 = vld [vmem:[%s1449_s29 + $0x10] sm:$0xf] }
  0x2a   : > { %703 = vmatpush.bf16.xpose.msra.mxu0 %v694_v19 }
  0x31   : > { %1099 = vmatmul.msk.bf16.vlgmr.msrb.gmra.mxu0 %vm375_vm0, %v1096_v8 }
  0x32   : > { %827 = vmatpush.bf16.xpose.msrb.mxu0 %v818_v54 }
  0x41   : > { %1113 = vmatmul.msk.bf16.vlgmr.msra.gmra.mxu0 %vm375_vm0, %v1110_v20 }
  0x51   : > { %1127 = vmatmul.msk.bf16.vlgmr.msrb.gmra.mxu0 %vm375_vm0, %v1124_v55 }
  0x9e   : > { %v391_v14 = vpop.f32.mrf.mxu0 }
  0x9f   : > { %v398_v15 = vsel %vm1430_vm2, -1e+09, %v391_v14 }
  0xa0   : > { %v400_v16 = vsel %vm399_vm3, %v398_v15, -inf }
  0xa1   : > { %401 = vmax.xlane.f32.xlu0 %v400_v16 }
  0xa4   : > { %v457_v21 = vpop.f32.mrf.mxu2 }
  0xa5   : > { %v461_v22 = vsel %vm1430_vm2, -1e+09, %v457_v21 }
  0xa6   : > { %v393_v17 = vpop.f32.mrf.mxu0  ;;  %v462_v23 = vsel %vm399_vm3, %v461_v22, -inf }
  0xa7   : > { %463 = vmax.xlane.f32.xlu1 %v462_v23 }
  0xac   : > { %v459_v24 = vpop.f32.mrf.mxu2 }
  0xae   : > { %v581_v25 = vpop.f32.mrf.mxu0 }
  0xaf   : > { %v585_v45 = vsel %vm1430_vm2, -1e+09, %v581_v25 }
  0xb0   : > { %v586_v46 = vsel %vm399_vm3, %v585_v45, -inf }
  0xb1   : > { %587 = vmax.xlane.f32.xlu2 %v586_v46 }
  0xb6   : > { %v583_v27 = vpop.f32.mrf.mxu0 }
  0xbe   : > { %v705_v37 = vpop.f32.mrf.mxu0 }
  0xbf   : > { %v1455_v38 = vsel %vm1430_vm2, -1e+09, %v705_v37 }
  0xc0   : > { %v710_v39 = vsel %vm399_vm3, %v1455_v38, -inf }
  0xc6   : > { %v707_v43 = vpop.f32.mrf.mxu0 }
  0xce   : > { %v829_v7 = vpop.f32.mrf.mxu0 }
  0xcf   : > { %v833_v20 = vsel %vm1430_vm2, -1e+09, %v829_v7  ;;  %v1119_v7 = vld [vmem:[%s1449_s29 + $0x18] sm:$0xf] }
  0xd6   : > { %v831_v9 = vpop.f32.mrf.mxu0 }
 0x114   : > { %v402_v26 = vpop.xlane.xlu0 %401 }
 0x115   : > { %v403_v28 = vsub.f32 %v398_v15, %v402_v26 }
 0x117   : > { %v404_v29 = vmul.f32 1.442695, %v403_v28 }
 0x119   : > { %1199 = vpow2.f32 %v404_v29 }
 0x11a   : > { %v464_v34 = vpop.xlane.xlu1 %463 }
 0x11b   : > { %v465_v35 = vsub.f32 %v461_v22, %v464_v34  ;;  %v834_v22 = vsel %vm399_vm3, %v833_v20, -inf }
 0x11d   : > { %v466_v36 = vmul.f32 1.442695, %v465_v35 }
 0x11f   : > { %v1200_v30 = vpop.eup %1199  ;;  %1201 = vpow2.f32 %v466_v36  ;;  %v1098_v36 = vld [vmem:[%s1449_s29 + $0xc] sm:$0xf] }
 0x120   : > { %v406_v31 = vsel %vm399_vm3, %v1200_v30, 0.0  ;;  %v604_v37 = vsel %vm416_vm4, %v1098_v36, 0 }
 0x121   : > { %407 = vadd.xlane.f32.xlu0 %v406_v31  ;;  %613 = vmatpush.bf16.msrb.mxu2 %v604_v37 }
 0x124   : > { %v588_v14 = vpop.xlane.xlu2 %587 }
 0x125   : > { %v1202_v42 = vpop.eup %1201  ;;  %v589_v16 = vsub.f32 %v585_v45, %v588_v14 }
 0x126   : > { %v468_v44 = vsel %vm399_vm3, %v1202_v42, 0.0 }
 0x127   : > { %v590_v19 = vmul.f32 1.442695, %v589_v16 }
 0x129   : > { %711 = vmax.xlane.f32.xlu0 %v710_v39 }
 0x131   : > { %469 = vadd.xlane.f32.xlu0 %v468_v44 }
 0x194   : > { %v408_v47 = vpop.xlane.xlu0 %407 }
 0x195   : > { %1203 = vrcp.f32 %v408_v47 }
 0x19b   : > { %v1204_v48 = vpop.eup %1203 }
 0x19c   : > { %v410_v50 = vmul.f32 %v1204_v48, %v1200_v30  ;;  %v712_v61 = vpop.xlane.xlu0 %711 }
 0x19d   : > { %v713_v34 = vsub.f32 %v1455_v38, %v712_v61 }
 0x19e   : > { %411 = vst.msk [vmem:[%s1469_s10] sm:$0xff] %vm399_vm3, %v410_v50  ;;  %v412_v51 = vpack.c.bf16 %v410_v50, %v410_v50 }
 0x19f   : > { %v714_v35 = vmul.f32 1.442695, %v713_v34 }
 0x1a0   : > { %1081 = vmatmul.msk.bf16.vlgmr.msra.gmra.mxu1 %vm399_vm3, %v412_v51 }
 0x1a1   : > { %641 = vmatpush.bf16.xpose.msra.mxu1 %v632_v52 }
 0x1a4   : > { %v470_v62 = vpop.xlane.xlu0 %469 }
 0x1a5   : > { %1205 = vrcp.f32 %v470_v62 }
 0x1a6   : > { %1207 = vpow2.f32 %v590_v19 }
 0x1ab   : > { %v1206_v0 = vpop.eup %1205 }
 0x1ac   : > { %v472_v2 = vmul.f32 %v1206_v0, %v1202_v42  ;;  %v1208_v23 = vpop.eup %1207  ;;  %v542_v42 = vsel %vm416_vm4, %v1091_v41, 0  ;;  %v728_v0 = vsel %vm416_vm4, %v1112_v63, 0 }
 0x1ad   : > { %v592_v27 = vsel %vm399_vm3, %v1208_v23, 0.0  ;;  %551 = vmatpush.bf16.msrb.mxu3 %v542_v42  ;;  %737 = vmatpush.bf16.msra.mxu2 %v728_v0 }
 0x1ae   : > { %1086 = vst.msk [vmem:[%s1469_s10 + $0x8] sm:$0xff] %vm399_vm3, %v472_v2  ;;  %v475_v3 = vpack.c.bf16 %v472_v2, %v472_v2  ;;  %v666_v2 = vsel %vm416_vm4, %v1105_v1, 0 }
 0x1b0   : > { %1092 = vmatmul.msk.bf16.vlgmr.msrb.gmra.mxu1 %vm375_vm0, %v1089_v57  ;;  %1087 = vmatmul.msk.bf16.vlgmr.msra.gmra.mxu3 %vm399_vm3, %v475_v3  ;;  %v1126_v3 = vld [vmem:[%s1449_s29 + $0x1c] sm:$0xf]  ;;  %s1247_s29 = scalar_lea.hbm %s1246_s27, 64 }
 0x1b1   : > { %765 = vmatpush.bf16.xpose.msrb.mxu1 %v756_v58  ;;  %675 = vmatpush.bf16.msra.mxu3 %v666_v2  ;;  %p1248_p12 = scmp.ne.s32.totalorder %s1246_s27, %s1247_s29  ;;  %p1253_p2 = scmp.lt.s32.totalorder %s1251_s11, %s1247_s29 }
 0x1b3   : > { %p1249_p13 = pnand %p1248_p12, %p1384_p4  ;;  %p1254_p3 = por %p1253_p2, %p1252_p1 }
 0x1b5   : > { %p1250_p0 = pneg %p1249_p13 }
 0x1b7   : > { %p1255_p5 = pnand %p1254_p3, %p1250_p0 }
 0x1c0   : > { %1106 = vmatmul.msk.bf16.vlgmr.msra.gmra.mxu1 %vm375_vm0, %v1103_v59 }
 0x1d0   : > { %1120 = vmatmul.msk.bf16.vlgmr.msrb.gmra.mxu1 %vm375_vm0, %v1117_v60 }
 0x21d   : > { %v429_v4 = vpop.f32.mrf.mxu1 }
 0x21e   : > { %v433_v5 = vpack.c.bf16 %v429_v4, %v429_v4 }
 0x220   : > { %435 = vst.msk [vmem:[%s1496_s13] sm:$0xf] %vm434_vm5, %v433_v5  ;;  %v852_v5 = vsel %vm416_vm4, %v1126_v3, 0 }
 0x225   : > { %v431_v6 = vpop.f32.mrf.mxu1 }
 0x22d   : > { %v519_v8 = vpop.f32.mrf.mxu1 }
 0x22e   : > { %v523_v10 = vsel %vm1430_vm2, -1e+09, %v519_v8 }
 0x22f   : > { %v524_v11 = vsel %vm399_vm3, %v523_v10, -inf }
 0x230   : > { %525 = vmax.xlane.f32.xlu1 %v524_v11  ;;  %v790_v11 = vsel %vm416_vm4, %v1119_v7, 0 }
 0x233   : > { %v491_v29 = vpop.f32.mrf.mxu3 }
 0x234   : > { %v495_v30 = vpack.c.bf16 %v491_v29, %v491_v29 }
 0x235   : > { %v521_v12 = vpop.f32.mrf.mxu1 }
 0x236   : > { %1088 = vst.msk [vmem:[%s1496_s13 + $0x4] sm:$0xf] %vm434_vm5, %v495_v30 }
 0x23b   : > { %v493_v31 = vpop.f32.mrf.mxu3 }
 0x23d   : > { %v643_v15 = vpop.f32.mrf.mxu1 }
 0x23e   : > { %v647_v17 = vsel %vm1430_vm2, -1e+09, %v643_v15 }
 0x23f   : > { %v648_v18 = vsel %vm399_vm3, %v647_v17, -inf }
 0x240   : > { %649 = vmax.xlane.f32.xlu2 %v648_v18 }
 0x245   : > { %v645_v21 = vpop.f32.mrf.mxu1 }
 0x248   : > { %835 = vmax.xlane.f32.xlu2 %v834_v22 }
 0x24d   : > { %v767_v24 = vpop.f32.mrf.mxu1 }
 0x24e   : > { %v771_v25 = vsel %vm1430_vm2, -1e+09, %v767_v24 }
 0x24f   : > { %v772_v26 = vsel %vm399_vm3, %v771_v25, -inf }
 0x250   : > { %773 = vmax.xlane.f32.xlu1 %v772_v26  ;;  %593 = vadd.xlane.f32.xlu2 %v592_v27 }
 0x255   : > { %v769_v28 = vpop.f32.mrf.mxu1 }
 0x2a3   : > { %v526_v32 = vpop.xlane.xlu1 %525 }
 0x2a4   : > { %v527_v33 = vsub.f32 %v523_v10, %v526_v32 }
 0x2a6   : > { %v528_v13 = vmul.f32 1.442695, %v527_v33 }
 0x2a8   : > { %1209 = vpow2.f32 %v528_v13 }
 0x2a9   : > { %1211 = vpow2.f32 %v714_v35 }
 0x2ae   : > { %v1210_v39 = vpop.eup %1209 }
 0x2af   : > { %v530_v40 = vsel %vm399_vm3, %v1210_v39, 0.0  ;;  %v1212_v44 = vpop.eup %1211 }
 0x2b0   : > { %531 = vadd.xlane.f32.xlu1 %v530_v40  ;;  %v716_v46 = vsel %vm399_vm3, %v1212_v44, 0.0 }
 0x2b3   : > { %v650_v43 = vpop.xlane.xlu2 %649 }
 0x2b4   : > { %v651_v45 = vsub.f32 %v647_v17, %v650_v43 }
 0x2b6   : > { %v652_v38 = vmul.f32 1.442695, %v651_v45 }
 0x2b8   : > { %1213 = vpow2.f32 %v652_v38  ;;  %717 = vadd.xlane.f32.xlu1 %v716_v46 }
 0x2bb   : > { %v836_v47 = vpop.xlane.xlu2 %835 }
 0x2bc   : > { %v837_v48 = vsub.f32 %v833_v20, %v836_v47 }
 0x2be   : > { %v1214_v49 = vpop.eup %1213  ;;  %v838_v50 = vmul.f32 1.442695, %v837_v48 }
 0x2bf   : > { %v654_v51 = vsel %vm399_vm3, %v1214_v49, 0.0 }
 0x2c0   : > { %1215 = vpow2.f32 %v838_v50  ;;  %655 = vadd.xlane.f32.xlu0 %v654_v51 }
 0x2c3   : > { %v774_v52 = vpop.xlane.xlu1 %773  ;;  %v594_v53 = vpop.xlane.xlu2 %593 }
 0x2c4   : > { %v775_v54 = vsub.f32 %v771_v25, %v774_v52  ;;  %1217 = vrcp.f32 %v594_v53 }
 0x2c6   : > { %v1216_v55 = vpop.eup %1215  ;;  %v776_v56 = vmul.f32 1.442695, %v775_v54 }
 0x2c7   : > { %v840_v57 = vsel %vm399_vm3, %v1216_v55, 0.0 }
 0x2c8   : > { %1219 = vpow2.f32 %v776_v56  ;;  %841 = vadd.xlane.f32.xlu0 %v840_v57 }
 0x2ca   : > { %v1218_v58 = vpop.eup %1217 }
 0x2cb   : > { %v596_v59 = vmul.f32 %v1218_v58, %v1208_v23 }
 0x2cd   : > { %1100 = vst.msk [vmem:[%s1469_s10 + $0x18] sm:$0xff] %vm399_vm3, %v596_v59  ;;  %v599_v60 = vpack.c.bf16 %v596_v59, %v596_v59 }
 0x2ce   : > { %v1220_v61 = vpop.eup %1219 }
 0x2cf   : > { %1101 = vmatmul.msk.bf16.vlgmr.msrb.gmra.mxu2 %vm399_vm3, %v599_v60  ;;  %v778_v62 = vsel %vm399_vm3, %v1220_v61, 0.0 }
 0x2d0   : > { %779 = vadd.xlane.f32.xlu2 %v778_v62  ;;  %861 = vmatpush.bf16.msrb.mxu2 %v852_v5 }
 0x323   : > { %v532_v4 = vpop.xlane.xlu1 %531 }
 0x324   : > { %1221 = vrcp.f32 %v532_v4 }
 0x32a   : > { %v1222_v6 = vpop.eup %1221 }
 0x32b   : > { %v534_v8 = vmul.f32 %v1222_v6, %v1210_v39  ;;  %v718_v9 = vpop.xlane.xlu1 %717 }
 0x32c   : > { %1223 = vrcp.f32 %v718_v9 }
 0x32d   : > { %1093 = vst.msk [vmem:[%s1469_s10 + $0x10] sm:$0xff] %vm399_vm3, %v534_v8  ;;  %v537_v10 = vpack.c.bf16 %v534_v8, %v534_v8 }
 0x32f   : > { %1094 = vmatmul.msk.bf16.vlgmr.msrb.gmra.mxu3 %vm399_vm3, %v537_v10 }
 0x330   : > { %799 = vmatpush.bf16.msrb.mxu3 %v790_v11 }
 0x332   : > { %v1224_v12 = vpop.eup %1223 }
 0x333   : > { %v720_v14 = vmul.f32 %v1224_v12, %v1212_v44  ;;  %v656_v15 = vpop.xlane.xlu0 %655 }
 0x334   : > { %1225 = vrcp.f32 %v656_v15 }
 0x335   : > { %1114 = vst.msk [vmem:[%s1469_s10 + $0x28] sm:$0xff] %vm399_vm3, %v720_v14  ;;  %v723_v16 = vpack.c.bf16 %v720_v14, %v720_v14 }
 0x337   : > { %1115 = vmatmul.msk.bf16.vlgmr.msra.gmra.mxu2 %vm399_vm3, %v723_v16 }
 0x33a   : > { %v1226_v17 = vpop.eup %1225 }
 0x33b   : > { %v658_v18 = vmul.f32 %v1226_v17, %v1214_v49  ;;  %v842_v19 = vpop.xlane.xlu0 %841 }
 0x33c   : > { %1227 = vrcp.f32 %v842_v19 }
 0x33d   : > { %1107 = vst.msk [vmem:[%s1469_s10 + $0x20] sm:$0xff] %vm399_vm3, %v658_v18  ;;  %v661_v20 = vpack.c.bf16 %v658_v18, %v658_v18 }
 0x33f   : > { %1108 = vmatmul.msk.bf16.vlgmr.msra.gmra.mxu3 %vm399_vm3, %v661_v20 }
 0x342   : > { %v1228_v21 = vpop.eup %1227 }
 0x343   : > { %v844_v22 = vmul.f32 %v1228_v21, %v1216_v55  ;;  %v780_v23 = vpop.xlane.xlu2 %779 }
 0x344   : > { %1229 = vrcp.f32 %v780_v23 }
 0x345   : > { %1128 = vst.msk [vmem:[%s1469_s10 + $0x38] sm:$0xff] %vm399_vm3, %v844_v22  ;;  %v847_v24 = vpack.c.bf16 %v844_v22, %v844_v22 }
 0x347   : > { %1129 = vmatmul.msk.bf16.vlgmr.msrb.gmra.mxu2 %vm399_vm3, %v847_v24 }
 0x34a   : > { %v1230_v25 = vpop.eup %1229 }
 0x34b   : > { %v782_v26 = vmul.f32 %v1230_v25, %v1220_v61 }
 0x34d   : > { %1121 = vst.msk [vmem:[%s1469_s10 + $0x30] sm:$0xff] %vm399_vm3, %v782_v26  ;;  %v785_v27 = vpack.c.bf16 %v782_v26, %v782_v26 }
 0x34f   : > { %1122 = vmatmul.msk.bf16.vlgmr.msrb.gmra.mxu3 %vm399_vm3, %v785_v27 }
 0x352   : > { %v615_v28 = vpop.f32.mrf.mxu2 }
 0x353   : > { %v619_v29 = vpack.c.bf16 %v615_v28, %v615_v28 }
 0x355   : > { %1102 = vst.msk [vmem:[%s1496_s13 + $0xc] sm:$0xf] %vm434_vm5, %v619_v29 }
 0x35a   : > { %v617_v30 = vpop.f32.mrf.mxu2 }
 0x35b   : > { %1258 = shalt.err (!%p1255_p5)
}
 0x35c   : > { %s1312_s7 = smov 128   ;;  %s1313_s10 = smov 8  }
 0x35d   : > { %1141 = dma.vmem_to_hbm [thread:$0]  (%p1384_p4), %s899_s17, 1024, %s901_s24, %s880_s25, %s1312_s7, %s1312_s7, %s1313_s10  }
 0x3b2   : > { %v553_v31 = vpop.f32.mrf.mxu3 }
 0x3b3   : > { %v557_v32 = vpack.c.bf16 %v553_v31, %v553_v31 }
 0x3b5   : > { %1095 = vst.msk [vmem:[%s1496_s13 + $0x8] sm:$0xf] %vm434_vm5, %v557_v32 }
 0x3ba   : > { %v555_v33 = vpop.f32.mrf.mxu3  ;;  %v739_v34 = vpop.f32.mrf.mxu2 }
 0x3bb   : > { %v743_v13 = vpack.c.bf16 %v739_v34, %v739_v34 }
 0x3bd   : > { %1116 = vst.msk [vmem:[%s1496_s13 + $0x14] sm:$0xf] %vm434_vm5, %v743_v13 }
 0x3c2   : > { %v677_v35 = vpop.f32.mrf.mxu3  ;;  %v741_v36 = vpop.f32.mrf.mxu2 }
 0x3c3   : > { %v681_v37 = vpack.c.bf16 %v677_v35, %v677_v35 }
 0x3c5   : > { %1109 = vst.msk [vmem:[%s1496_s13 + $0x10] sm:$0xf] %vm434_vm5, %v681_v37 }
 0x3ca   : > { %v679_v39 = vpop.f32.mrf.mxu3  ;;  %v863_v40 = vpop.f32.mrf.mxu2 }
 0x3cb   : > { %v867_v41 = vpack.c.bf16 %v863_v40, %v863_v40 }
 0x3cd   : > { %1130 = vst.msk [vmem:[%s1496_s13 + $0x1c] sm:$0xf] %vm434_vm5, %v867_v41 }
 0x3d2   : > { %v801_v42 = vpop.f32.mrf.mxu3  ;;  %v865_v43 = vpop.f32.mrf.mxu2 }
 0x3d3   : > { %v805_v44 = vpack.c.bf16 %v801_v42, %v801_v42 }
 0x3d5   : > { %1123 = vst.msk [vmem:[%s1496_s13 + $0x18] sm:$0xf] %vm434_vm5, %v805_v44 }
 0x3da   : > { %v803_v45 = vpop.f32.mrf.mxu3 }
 0x3db PF: > { %p1147_p4 = scmp.ge.s32.totalorder %s1309_s23, 2  ;;  %s927_s28 = sand.u32 1, %s1289_s18  }
 0x3dc   : > { %s928_s14 = scalar_lea.sflag [#allocation3], %s927_s28 }
 0x3dd   : > { %p1144_p6 = pnand %p1147_p4, %p1391_p8 }
 0x3df   : > { %p1145_p7 = pneg %p1144_p6 }
 0x3e1   : > { %1284 = dma.done.wait (%p1145_p7), %s928_s14, 1024  }
 0x3e2   : > { %1286 = vsyncadd (%p1145_p7), %s928_s14, 4294966272  ;;  %s19_s23 = sadd.s32 1, %s1309_s23   ;;  %s1612_s18 = smov %s1293_s19 }
 0x3e3   : > { %p16_p9 = scmp.ge.s32.totalorder %s19_s23, 4   ;;  %s1613_s19 = smov %s1297_s20 }
 0x3e4   : > { %s1614_s20 = smov %s1397_s6  ;;  %s1615_s21 = smov %s1305_s22 }
 0x3e5   : > { %s1616_s22 = smov %s1618_s26  ;;  %18 = sbr.rel (!%p16_p9) target bundleno = 4 (0x4), region = 127 }
 0x3ea   :  { %934 = vsyncpa [#allocation3], 1 }
 0x3eb   :  { %936 = vsyncpa [#allocation3 + $0x1], 1 }

// kernel: multi_head_attention.3
= control target key start
LH: loop header
LB: loop body
LE: loop exit
PB: predicated region body
PF: predicated region fallthrough
CT: control target
= control target key end

     0   :  { %s2425_s27 = smov 0   ;;  %s2427_s28 = smov 0   ;;  %s2632_s0 = inlined_call_operand.vmem [shape: f32[2,8,512], index: 0, kind: input, shape index: {}]   ;;  %s2633_s1 = inlined_call_operand.vmem [shape: f32[2,8,512], index: 1, kind: input, shape index: {}]   ;;  %s2634_s2 = inlined_call_operand.vmem [shape: f32[2,8,512], index: 2, kind: input, shape index: {}]   ;;  %s2635_s3 = inlined_call_operand.vmem [shape: bf16[8,512,64], index: 3, kind: input, shape index: {}]   ;;  %s2636_s4 = inlined_call_operand.vmem [shape: bf16[8,512,64], index: 4, kind: input, shape index: {}]   ;;  %s2637_s5 = inlined_call_operand.vmem [shape: bf16[8,512,64], index: 5, kind: input, shape index: {}]   ;;  %s2638_s6 = inlined_call_operand.vmem [shape: bf16[2,8,8,64], index: 6, kind: output, shape index: {0}]   ;;  %s2639_s7 = inlined_call_operand.vmem [shape: bf16[2,8,8,64], index: 7, kind: output, shape index: {1}]   ;;  %s2640_s8 = inlined_call_operand.vmem [shape: bf16[2,8,8,64], index: 8, kind: output, shape index: {2}]  }
   0x1   :  { %s2429_s29 = smov 0   ;;  %s2431_s30 = smov 0  }
   0x2   :  { %s2433_s9 = smov 0  }
   0x3 LB: > { %s31_s10 = sadd.s32 1, %s2370_s29  ;;  %s38_s11 = sadd.s32 1, %s2374_s30  ;;  %s2378_s9 = sphi %s2433_s9, %s19_s9   ;;  %s2374_s30 = sphi %s2431_s30, %s2644_s30   ;;  %s2370_s29 = sphi %s2429_s29, %s2643_s29   ;;  %s2366_s28 = sphi %s2427_s28, %s2642_s28   ;;  %s2362_s27 = sphi %s2425_s27, %s2641_s27  }
   0x4   : > { %p32_p0 = scmp.ge.s32.totalorder %s31_s10, 8  ;;  %p1793_p1 = scmp.ge.s32.totalorder %s2378_s9, 1 }
   0x5   : > { %p366_p2 = scmp.lt.s32.totalorder %s2378_s9, 17 }
   0x6   : > { %s2646_s10 = smov (%p32_p0, %s31_s10), 0  ;;  %s2648_s11 = smov (!%p32_p0, %s38_s11), %s2374_s30 }
   0x7   : > { %p367_p3 = pnand %p1793_p1, %p366_p2  ;;  %p40_p4 = scmp.ge.s32.totalorder %s2648_s11, 2 }
   0x8   : > { %p492_p5 = scmp.lt.s32.totalorder (!%p367_p3), %s2362_s27, 7  ;;  %p465_p6 = scmp.lt.s32.totalorder (!%p367_p3), %s2366_s28, 1 }
   0x9   : > { %s2650_s11 = smov (%p40_p4, %s2648_s11), 0  ;;  %370 = sbr.rel (%p367_p3) target bundleno = 256 (0x100), region = 44 }
   0xe   : > { %s2652_s27 = smov (!%p492_p5, %s2362_s27), 7  ;;  %s2654_s28 = smov (!%p465_p6, %s2366_s28), 1  ;;  %vm1489_vm0 = vcmask 519168  }
   0xf   : > { %s2460_s12 = sshll.u32 %s2652_s27, 8  ;;  %s2497_s16 = sshll.u32 %s2654_s28, 5 }
  0x10   : > { %s2466_s15 = scalar_lea.vmem %s2635_s3, %s2460_s12  ;;  %s2507_s19 = scalar_lea.vmem %s2636_s4, %s2460_s12 }
  0x11   : > { %v2211_v0 = vld [vmem:[%s2466_s15 + $0x38] sm:$0xff]  ;;  %v2210_v4 = vld [vmem:[%s2466_s15 + $0x30] sm:$0xff]  ;;  %v2209_v8 = vld [vmem:[%s2466_s15 + $0x28] sm:$0xff]  ;;  %s473_s22 = scalar_lea.vmem %s2632_s0, %s2497_s16  ;;  %s1806_s23 = sshll.u32 %s2654_s28, 3 }
  0x12   : > { %v2219_v1 = vld [vmem:[%s2466_s15 + $0x78] sm:$0xff]  ;;  %820 = vmatpush.bf16.msra.mxu0 %v2211_v0  ;;  %v2218_v5 = vld [vmem:[%s2466_s15 + $0x70] sm:$0xff]  ;;  %v2217_v9 = vld [vmem:[%s2466_s15 + $0x68] sm:$0xff]  ;;  %s2531_s24 = sadd.s32 %s1806_s23, %s2652_s27  ;;  %s2553_s27 = scalar_lea.vmem %s2637_s5, %s2460_s12 }
  0x13   : > { %v2227_v2 = vld [vmem:[%s2466_s15 + $0xb8] sm:$0xff]  ;;  %833 = vmatpush.bf16.msra.mxu1 %v2219_v1  ;;  %v2226_v6 = vld [vmem:[%s2466_s15 + $0xb0] sm:$0xff]  ;;  %v2225_v10 = vld [vmem:[%s2466_s15 + $0xa8] sm:$0xff]  ;;  %s482_s14 = scalar_lea.vmem %s2633_s1, %s2497_s16  ;;  %s491_s17 = scalar_lea.vmem %s2634_s2, %s2497_s16 }
  0x14   : > { %v2235_v3 = vld [vmem:[%s2466_s15 + $0xf8] sm:$0xff]  ;;  %846 = vmatpush.bf16.msra.mxu2 %v2227_v2  ;;  %v2234_v7 = vld [vmem:[%s2466_s15 + $0xf0] sm:$0xff]  ;;  %v2233_v11 = vld [vmem:[%s2466_s15 + $0xe8] sm:$0xff]  ;;  %s2600_s16 = sshll.u32 %s2531_s24, 2 }
  0x15   : > { %859 = vmatpush.bf16.msra.mxu3 %v2235_v3  ;;  %v2208_v12 = vld [vmem:[%s2466_s15 + $0x20] sm:$0xff]  ;;  %v2207_v16 = vld [vmem:[%s2466_s15 + $0x18] sm:$0xff]  ;;  %v2206_v20 = vld [vmem:[%s2466_s15 + $0x10] sm:$0xff]  ;;  %s517_s20 = scalar_lea.vmem %s2638_s6, %s2600_s16  ;;  %s528_s23 = scalar_lea.vmem %s2639_s7, %s2600_s16 }
  0x16   : > { %821 = vmatpush.bf16.msra.mxu0 %v2210_v4  ;;  %v2216_v13 = vld [vmem:[%s2466_s15 + $0x60] sm:$0xff]  ;;  %v2215_v17 = vld [vmem:[%s2466_s15 + $0x58] sm:$0xff]  ;;  %v2214_v21 = vld [vmem:[%s2466_s15 + $0x50] sm:$0xff]  ;;  %s539_s26 = scalar_lea.vmem %s2640_s8, %s2600_s16 }
  0x17   : > { %834 = vmatpush.bf16.msra.mxu1 %v2218_v5  ;;  %v2224_v14 = vld [vmem:[%s2466_s15 + $0xa0] sm:$0xff]  ;;  %v2223_v18 = vld [vmem:[%s2466_s15 + $0x98] sm:$0xff]  ;;  %v2222_v22 = vld [vmem:[%s2466_s15 + $0x90] sm:$0xff] }
  0x18   : > { %847 = vmatpush.bf16.msra.mxu2 %v2226_v6  ;;  %v2232_v15 = vld [vmem:[%s2466_s15 + $0xe0] sm:$0xff]  ;;  %v2231_v19 = vld [vmem:[%s2466_s15 + $0xd8] sm:$0xff]  ;;  %v2230_v23 = vld [vmem:[%s2466_s15 + $0xd0] sm:$0xff] }
  0x19   : > { %860 = vmatpush.bf16.msra.mxu3 %v2234_v7  ;;  %v2205_v24 = vld [vmem:[%s2466_s15 + $0x8] sm:$0xff]  ;;  %v2204_v28 = vld [vmem:[%s2466_s15] sm:$0xff]  ;;  %v2243_v32 = vld [vmem:[%s2507_s19 + $0x38] sm:$0xff] }
  0x1a   : > { %822 = vmatpush.bf16.msra.mxu0 %v2209_v8  ;;  %v2213_v25 = vld [vmem:[%s2466_s15 + $0x48] sm:$0xff]  ;;  %v2212_v29 = vld [vmem:[%s2466_s15 + $0x40] sm:$0xff]  ;;  %v542_v33 = vld [vmem:[%s473_s22 + $0x10] sm:$0xff] }
  0x1b   : > { %835 = vmatpush.bf16.msra.mxu1 %v2217_v9  ;;  %v2221_v26 = vld [vmem:[%s2466_s15 + $0x88] sm:$0xff]  ;;  %v2220_v30 = vld [vmem:[%s2466_s15 + $0x80] sm:$0xff]  ;;  %v543_v34 = vld [vmem:[%s473_s22 + $0x18] sm:$0xff]  ;;  %v546_v40 = vpack.c.bf16 %v542_v33, %v542_v33 }
  0x1c   : > { %848 = vmatpush.bf16.msra.mxu2 %v2225_v10  ;;  %v2229_v27 = vld [vmem:[%s2466_s15 + $0xc8] sm:$0xff]  ;;  %v2228_v31 = vld [vmem:[%s2466_s15 + $0xc0] sm:$0xff]  ;;  %v2251_v35 = vld [vmem:[%s2507_s19 + $0x78] sm:$0xff]  ;;  %v547_v41 = vpack.c.bf16 %v543_v34, %v543_v34 }
  0x1d   : > { %861 = vmatpush.bf16.msra.mxu3 %v2233_v11  ;;  %v540_v36 = vld [vmem:[%s473_s22] sm:$0xff]  ;;  %v541_v37 = vld [vmem:[%s473_s22 + $0x8] sm:$0xff]  ;;  %v2259_v38 = vld [vmem:[%s2507_s19 + $0xb8] sm:$0xff] }
  0x1e   : > { %823 = vmatpush.bf16.msra.mxu0 %v2208_v12  ;;  %v2267_v39 = vld [vmem:[%s2507_s19 + $0xf8] sm:$0xff]  ;;  %v544_v42 = vpack.c.bf16 %v540_v36, %v540_v36  ;;  %v545_v43 = vpack.c.bf16 %v541_v37, %v541_v37  ;;  %v2242_v44 = vld [vmem:[%s2507_s19 + $0x30] sm:$0xff]  ;;  %v2241_v48 = vld [vmem:[%s2507_s19 + $0x28] sm:$0xff] }
  0x1f   : > { %836 = vmatpush.bf16.msra.mxu1 %v2216_v13  ;;  %v2250_v45 = vld [vmem:[%s2507_s19 + $0x70] sm:$0xff]  ;;  %v2249_v49 = vld [vmem:[%s2507_s19 + $0x68] sm:$0xff]  ;;  %v2240_v52 = vld [vmem:[%s2507_s19 + $0x20] sm:$0xff] }
  0x20   : > { %849 = vmatpush.bf16.msra.mxu2 %v2224_v14  ;;  %v2258_v46 = vld [vmem:[%s2507_s19 + $0xb0] sm:$0xff]  ;;  %v2257_v50 = vld [vmem:[%s2507_s19 + $0xa8] sm:$0xff]  ;;  %v2248_v53 = vld [vmem:[%s2507_s19 + $0x60] sm:$0xff] }
  0x21   : > { %862 = vmatpush.bf16.msra.mxu3 %v2232_v15  ;;  %v2266_v47 = vld [vmem:[%s2507_s19 + $0xf0] sm:$0xff]  ;;  %v2265_v51 = vld [vmem:[%s2507_s19 + $0xe8] sm:$0xff]  ;;  %v2256_v54 = vld [vmem:[%s2507_s19 + $0xa0] sm:$0xff] }
  0x22   : > { %824 = vmatpush.bf16.msra.mxu0 %v2207_v16  ;;  %v2264_v55 = vld [vmem:[%s2507_s19 + $0xe0] sm:$0xff]  ;;  %v2239_v56 = vld [vmem:[%s2507_s19 + $0x18] sm:$0xff]  ;;  %v2238_v60 = vld [vmem:[%s2507_s19 + $0x10] sm:$0xff] }
  0x23   : > { %837 = vmatpush.bf16.msra.mxu1 %v2215_v17  ;;  %v2247_v57 = vld [vmem:[%s2507_s19 + $0x58] sm:$0xff]  ;;  %v2246_v61 = vld [vmem:[%s2507_s19 + $0x50] sm:$0xff]  ;;  %v2237_v0 = vld [vmem:[%s2507_s19 + $0x8] sm:$0xff] }
  0x24   : > { %850 = vmatpush.bf16.msra.mxu2 %v2223_v18  ;;  %v2255_v58 = vld [vmem:[%s2507_s19 + $0x98] sm:$0xff]  ;;  %v2254_v62 = vld [vmem:[%s2507_s19 + $0x90] sm:$0xff]  ;;  %v2245_v1 = vld [vmem:[%s2507_s19 + $0x48] sm:$0xff] }
  0x25   : > { %863 = vmatpush.bf16.msra.mxu3 %v2231_v19  ;;  %v2263_v59 = vld [vmem:[%s2507_s19 + $0xd8] sm:$0xff]  ;;  %v2262_v63 = vld [vmem:[%s2507_s19 + $0xd0] sm:$0xff]  ;;  %v2253_v2 = vld [vmem:[%s2507_s19 + $0x88] sm:$0xff] }
  0x26   : > { %825 = vmatpush.bf16.msra.mxu0 %v2206_v20  ;;  %v2261_v3 = vld [vmem:[%s2507_s19 + $0xc8] sm:$0xff]  ;;  %v2236_v4 = vld [vmem:[%s2507_s19] sm:$0xff]  ;;  %v2275_v8 = vld [vmem:[%s2553_s27 + $0x38] sm:$0xff] }
  0x27   : > { %838 = vmatpush.bf16.msra.mxu1 %v2214_v21  ;;  %v2244_v5 = vld [vmem:[%s2507_s19 + $0x40] sm:$0xff]  ;;  %v550_v9 = vld [vmem:[%s482_s14 + $0x10] sm:$0xff]  ;;  %v551_v10 = vld [vmem:[%s482_s14 + $0x18] sm:$0xff] }
  0x28   : > { %851 = vmatpush.bf16.msra.mxu2 %v2222_v22  ;;  %v2252_v6 = vld [vmem:[%s2507_s19 + $0x80] sm:$0xff]  ;;  %v2283_v11 = vld [vmem:[%s2553_s27 + $0x78] sm:$0xff]  ;;  %v549_v13 = vld [vmem:[%s482_s14 + $0x8] sm:$0xff]  ;;  %v554_v16 = vpack.c.bf16 %v550_v9, %v550_v9  ;;  %v555_v17 = vpack.c.bf16 %v551_v10, %v551_v10 }
  0x29   : > { %864 = vmatpush.bf16.msra.mxu3 %v2230_v23  ;;  %v2260_v7 = vld [vmem:[%s2507_s19 + $0xc0] sm:$0xff]  ;;  %v2291_v14 = vld [vmem:[%s2553_s27 + $0xb8] sm:$0xff]  ;;  %v553_v19 = vpack.c.bf16 %v549_v13, %v549_v13  ;;  %v2274_v20 = vld [vmem:[%s2553_s27 + $0x30] sm:$0xff] }
  0x2a   : > { %826 = vmatpush.bf16.msra.mxu0 %v2205_v24  ;;  %v548_v12 = vld [vmem:[%s482_s14] sm:$0xff]  ;;  %v2299_v15 = vld [vmem:[%s2553_s27 + $0xf8] sm:$0xff]  ;;  %v2282_v21 = vld [vmem:[%s2553_s27 + $0x70] sm:$0xff] }
  0x2b   : > { %839 = vmatpush.bf16.msra.mxu1 %v2213_v25  ;;  %v552_v18 = vpack.c.bf16 %v548_v12, %v548_v12  ;;  %v2290_v22 = vld [vmem:[%s2553_s27 + $0xb0] sm:$0xff]  ;;  %v2273_v24 = vld [vmem:[%s2553_s27 + $0x28] sm:$0xff]  ;;  %v2279_v33 = vld [vmem:[%s2553_s27 + $0x58] sm:$0xff] }
  0x2c   : > { %852 = vmatpush.bf16.msra.mxu2 %v2221_v26  ;;  %v2298_v23 = vld [vmem:[%s2553_s27 + $0xf0] sm:$0xff]  ;;  %v2281_v25 = vld [vmem:[%s2553_s27 + $0x68] sm:$0xff]  ;;  %v2287_v34 = vld [vmem:[%s2553_s27 + $0x98] sm:$0xff] }
  0x2d   : > { %865 = vmatpush.bf16.msra.mxu3 %v2229_v27  ;;  %v2289_v26 = vld [vmem:[%s2553_s27 + $0xa8] sm:$0xff]  ;;  %v2270_v36 = vld [vmem:[%s2553_s27 + $0x10] sm:$0xff] }
  0x2e   : > { %827 = vmatpush.bf16.msra.mxu0 %v2204_v28  ;;  %v2297_v27 = vld [vmem:[%s2553_s27 + $0xe8] sm:$0xff]  ;;  %v2272_v28 = vld [vmem:[%s2553_s27 + $0x20] sm:$0xff]  ;;  %v2278_v37 = vld [vmem:[%s2553_s27 + $0x50] sm:$0xff] }
  0x2f   : > { %840 = vmatpush.bf16.msra.mxu1 %v2212_v29  ;;  %v2280_v29 = vld [vmem:[%s2553_s27 + $0x60] sm:$0xff] }
  0x30   : > { %853 = vmatpush.bf16.msra.mxu2 %v2220_v30  ;;  %v2288_v30 = vld [vmem:[%s2553_s27 + $0xa0] sm:$0xff] }
  0x31   : > { %866 = vmatpush.bf16.msra.mxu3 %v2228_v31  ;;  %828 = vmatmul.bf16.vlgmr.msra.gmra.mxu0 %v544_v42  ;;  %v2296_v31 = vld [vmem:[%s2553_s27 + $0xe0] sm:$0xff]  ;;  %v2285_v42 = vld [vmem:[%s2553_s27 + $0x88] sm:$0xff] }
  0x32   : > { %1128 = vmatpush.bf16.msrb.mxu0 %v2243_v32  ;;  %841 = vmatmul.bf16.vlgmr.msra.gmra.mxu1 %v545_v43  ;;  %v2271_v32 = vld [vmem:[%s2553_s27 + $0x18] sm:$0xff]  ;;  %v2293_v43 = vld [vmem:[%s2553_s27 + $0xc8] sm:$0xff] }
  0x33   : > { %1141 = vmatpush.bf16.msrb.mxu1 %v2251_v35  ;;  %854 = vmatmul.bf16.vlgmr.msra.gmra.mxu2 %v546_v40  ;;  %v2295_v35 = vld [vmem:[%s2553_s27 + $0xd8] sm:$0xff]  ;;  %v2269_v40 = vld [vmem:[%s2553_s27 + $0x8] sm:$0xff] }
  0x34   : > { %1154 = vmatpush.bf16.msrb.mxu2 %v2259_v38  ;;  %867 = vmatmul.bf16.vlgmr.msra.gmra.mxu3 %v547_v41  ;;  %v2286_v38 = vld [vmem:[%s2553_s27 + $0x90] sm:$0xff]  ;;  %v2277_v41 = vld [vmem:[%s2553_s27 + $0x48] sm:$0xff] }
  0x35   : > { %1167 = vmatpush.bf16.msrb.mxu3 %v2267_v39  ;;  %v2294_v39 = vld [vmem:[%s2553_s27 + $0xd0] sm:$0xff] }
  0x36   : > { %1129 = vmatpush.bf16.msrb.mxu0 %v2242_v44  ;;  %v2268_v44 = vld [vmem:[%s2553_s27] sm:$0xff] }
  0x37   : > { %1142 = vmatpush.bf16.msrb.mxu1 %v2250_v45  ;;  %v2276_v45 = vld [vmem:[%s2553_s27 + $0x40] sm:$0xff] }
  0x38   : > { %1155 = vmatpush.bf16.msrb.mxu2 %v2258_v46  ;;  %v2284_v46 = vld [vmem:[%s2553_s27 + $0x80] sm:$0xff] }
  0x39   : > { %1168 = vmatpush.bf16.msrb.mxu3 %v2266_v47  ;;  %v556_v47 = vld [vmem:[%s491_s17] sm:$0xff] }
  0x3a   : > { %1130 = vmatpush.bf16.msrb.mxu0 %v2241_v48  ;;  %v557_v48 = vld [vmem:[%s491_s17 + $0x8] sm:$0xff] }
  0x3b   : > { %1143 = vmatpush.bf16.msrb.mxu1 %v2249_v49  ;;  %v2292_v49 = vld [vmem:[%s2553_s27 + $0xc0] sm:$0xff] }
  0x3c   : > { %1156 = vmatpush.bf16.msrb.mxu2 %v2257_v50  ;;  %v558_v50 = vld [vmem:[%s491_s17 + $0x10] sm:$0xff] }
  0x3d   : > { %1169 = vmatpush.bf16.msrb.mxu3 %v2265_v51  ;;  %v559_v51 = vld [vmem:[%s491_s17 + $0x18] sm:$0xff] }
  0x3e   : > { %1131 = vmatpush.bf16.msrb.mxu0 %v2240_v52  ;;  %v560_v52 = vpack.c.bf16 %v556_v47, %v556_v47 }
  0x3f   : > { %1144 = vmatpush.bf16.msrb.mxu1 %v2248_v53  ;;  %v561_v53 = vpack.c.bf16 %v557_v48, %v557_v48 }
  0x40   : > { %1157 = vmatpush.bf16.msrb.mxu2 %v2256_v54  ;;  %v562_v54 = vpack.c.bf16 %v558_v50, %v558_v50 }
  0x41   : > { %1170 = vmatpush.bf16.msrb.mxu3 %v2264_v55  ;;  %v563_v55 = vpack.c.bf16 %v559_v51, %v559_v51 }
  0x42   : > { %1132 = vmatpush.bf16.msrb.mxu0 %v2239_v56 }
  0x43   : > { %1145 = vmatpush.bf16.msrb.mxu1 %v2247_v57 }
  0x44   : > { %1158 = vmatpush.bf16.msrb.mxu2 %v2255_v58 }
  0x45   : > { %1171 = vmatpush.bf16.msrb.mxu3 %v2263_v59 }
  0x46   : > { %1133 = vmatpush.bf16.msrb.mxu0 %v2238_v60 }
  0x47   : > { %1146 = vmatpush.bf16.msrb.mxu1 %v2246_v61 }
  0x48   : > { %1159 = vmatpush.bf16.msrb.mxu2 %v2254_v62 }
  0x49   : > { %1172 = vmatpush.bf16.msrb.mxu3 %v2262_v63 }
  0x4a   : > { %1134 = vmatpush.bf16.msrb.mxu0 %v2237_v0 }
  0x4b   : > { %1147 = vmatpush.bf16.msrb.mxu1 %v2245_v1 }
  0x4c   : > { %1160 = vmatpush.bf16.msrb.mxu2 %v2253_v2 }
  0x4d   : > { %1173 = vmatpush.bf16.msrb.mxu3 %v2261_v3 }
  0x4e   : > { %1135 = vmatpush.bf16.msrb.mxu0 %v2236_v4 }
  0x4f   : > { %1148 = vmatpush.bf16.msrb.mxu1 %v2244_v5 }
  0x50   : > { %1161 = vmatpush.bf16.msrb.mxu2 %v2252_v6 }
  0x51   : > { %1174 = vmatpush.bf16.msrb.mxu3 %v2260_v7  ;;  %1136 = vmatmul.bf16.vlgmr.msrb.gmra.mxu0 %v552_v18 }
  0x52   : > { %1436 = vmatpush.bf16.msra.mxu0 %v2275_v8  ;;  %1149 = vmatmul.bf16.vlgmr.msrb.gmra.mxu1 %v553_v19 }
  0x53   : > { %1449 = vmatpush.bf16.msra.mxu1 %v2283_v11  ;;  %1162 = vmatmul.bf16.vlgmr.msrb.gmra.mxu2 %v554_v16 }
  0x54   : > { %1462 = vmatpush.bf16.msra.mxu2 %v2291_v14  ;;  %1175 = vmatmul.bf16.vlgmr.msrb.gmra.mxu3 %v555_v17 }
  0x55   : > { %1475 = vmatpush.bf16.msra.mxu3 %v2299_v15 }
  0x56   : > { %1437 = vmatpush.bf16.msra.mxu0 %v2274_v20 }
  0x57   : > { %1450 = vmatpush.bf16.msra.mxu1 %v2282_v21 }
  0x58   : > { %1463 = vmatpush.bf16.msra.mxu2 %v2290_v22 }
  0x59   : > { %1476 = vmatpush.bf16.msra.mxu3 %v2298_v23 }
  0x5a   : > { %1438 = vmatpush.bf16.msra.mxu0 %v2273_v24 }
  0x5b   : > { %1451 = vmatpush.bf16.msra.mxu1 %v2281_v25 }
  0x5c   : > { %1464 = vmatpush.bf16.msra.mxu2 %v2289_v26 }
  0x5d   : > { %1477 = vmatpush.bf16.msra.mxu3 %v2297_v27 }
  0x5e   : > { %1439 = vmatpush.bf16.msra.mxu0 %v2272_v28 }
  0x5f   : > { %1452 = vmatpush.bf16.msra.mxu1 %v2280_v29 }
  0x60   : > { %1465 = vmatpush.bf16.msra.mxu2 %v2288_v30 }
  0x61   : > { %1478 = vmatpush.bf16.msra.mxu3 %v2296_v31 }
  0x62   : > { %1440 = vmatpush.bf16.msra.mxu0 %v2271_v32 }
  0x63   : > { %1453 = vmatpush.bf16.msra.mxu1 %v2279_v33 }
  0x64   : > { %1466 = vmatpush.bf16.msra.mxu2 %v2287_v34 }
  0x65   : > { %1479 = vmatpush.bf16.msra.mxu3 %v2295_v35 }
  0x66   : > { %1441 = vmatpush.bf16.msra.mxu0 %v2270_v36 }
  0x67   : > { %1454 = vmatpush.bf16.msra.mxu1 %v2278_v37 }
  0x68   : > { %1467 = vmatpush.bf16.msra.mxu2 %v2286_v38 }
  0x69   : > { %1480 = vmatpush.bf16.msra.mxu3 %v2294_v39 }
  0x6a   : > { %1442 = vmatpush.bf16.msra.mxu0 %v2269_v40 }
  0x6b   : > { %1455 = vmatpush.bf16.msra.mxu1 %v2277_v41 }
  0x6c   : > { %1468 = vmatpush.bf16.msra.mxu2 %v2285_v42 }
  0x6d   : > { %1481 = vmatpush.bf16.msra.mxu3 %v2293_v43 }
  0x6e   : > { %1443 = vmatpush.bf16.msra.mxu0 %v2268_v44 }
  0x6f   : > { %1456 = vmatpush.bf16.msra.mxu1 %v2276_v45 }
  0x70   : > { %1469 = vmatpush.bf16.msra.mxu2 %v2284_v46 }
  0x71   : > { %1482 = vmatpush.bf16.msra.mxu3 %v2292_v49  ;;  %1444 = vmatmul.bf16.vlgmr.msra.gmra.mxu0 %v560_v52 }
  0x72   : > { %1457 = vmatmul.bf16.vlgmr.msra.gmra.mxu1 %v561_v53 }
  0x73   : > { %1470 = vmatmul.bf16.vlgmr.msra.gmra.mxu2 %v562_v54 }
  0x74   : > { %1483 = vmatmul.bf16.vlgmr.msra.gmra.mxu3 %v563_v55 }
  0xae   : > { %v829_v56 = vpop.f32.mrf.mxu0 }
  0xaf   : > { %v842_v57 = vpop.f32.mrf.mxu1 }
  0xb0   : > { %v843_v58 = vadd.f32 %v842_v57, %v829_v56 }
  0xb6   : > { %v855_v59 = vpop.f32.mrf.mxu2  ;;  %v831_v63 = vpop.f32.mrf.mxu0 }
  0xb7   : > { %v868_v60 = vpop.f32.mrf.mxu3  ;;  %v856_v61 = vadd.f32 %v855_v59, %v843_v58  ;;  %v844_v0 = vpop.f32.mrf.mxu1 }
  0xb9   : > { %v869_v62 = vadd.f32 %v868_v60, %v856_v61 }
  0xbb   : > { %v1488_v1 = vpack.c.bf16 %v869_v62, %v869_v62 }
  0xbd   : > { %1490 = vst.msk [vmem:[%s517_s20] sm:$0xf] %vm1489_vm0, %v1488_v1 }
  0xbe   : > { %v857_v2 = vpop.f32.mrf.mxu2 }
  0xbf   : > { %v870_v3 = vpop.f32.mrf.mxu3 }
  0xce   : > { %v1137_v4 = vpop.f32.mrf.mxu0 }
  0xcf   : > { %v1150_v5 = vpop.f32.mrf.mxu1 }
  0xd0   : > { %v1151_v6 = vadd.f32 %v1150_v5, %v1137_v4 }
  0xd6   : > { %v1163_v7 = vpop.f32.mrf.mxu2  ;;  %v1139_v11 = vpop.f32.mrf.mxu0 }
  0xd7   : > { %v1176_v8 = vpop.f32.mrf.mxu3  ;;  %v1164_v9 = vadd.f32 %v1163_v7, %v1151_v6  ;;  %v1152_v12 = vpop.f32.mrf.mxu1 }
  0xd9   : > { %v1177_v10 = vadd.f32 %v1176_v8, %v1164_v9 }
  0xdb   : > { %v1491_v13 = vpack.c.bf16 %v1177_v10, %v1177_v10 }
  0xdd   : > { %1492 = vst.msk [vmem:[%s528_s23] sm:$0xf] %vm1489_vm0, %v1491_v13 }
  0xde   : > { %v1165_v14 = vpop.f32.mrf.mxu2 }
  0xdf   : > { %v1178_v15 = vpop.f32.mrf.mxu3 }
  0xee   : > { %v1445_v16 = vpop.f32.mrf.mxu0 }
  0xef   : > { %v1458_v17 = vpop.f32.mrf.mxu1 }
  0xf0   : > { %v1459_v18 = vadd.f32 %v1458_v17, %v1445_v16 }
  0xf6   : > { %v1471_v19 = vpop.f32.mrf.mxu2  ;;  %v1447_v22 = vpop.f32.mrf.mxu0 }
  0xf7   : > { %v1484_v20 = vpop.f32.mrf.mxu3  ;;  %v1472_v21 = vadd.f32 %v1471_v19, %v1459_v18  ;;  %v1460_v23 = vpop.f32.mrf.mxu1 }
  0xf9   : > { %v1485_v24 = vadd.f32 %v1484_v20, %v1472_v21 }
  0xfb   : > { %v1493_v25 = vpack.c.bf16 %v1485_v24, %v1485_v24 }
  0xfd   : > { %1494 = vst.msk [vmem:[%s539_s26] sm:$0xf] %vm1489_vm0, %v1493_v25 }
  0xfe   : > { %v1473_v26 = vpop.f32.mrf.mxu2 }
  0xff   : > { %v1486_v27 = vpop.f32.mrf.mxu3 }
 0x100 PF: > { %s19_s9 = sadd.s32 1, %s2378_s9   ;;  %s2641_s27 = smov %s2370_s29 }
 0x101   : > { %p16_p7 = scmp.ge.s32.totalorder %s19_s9, 18   ;;  %s2642_s28 = smov %s2374_s30 }
 0x102   : > { %s2643_s29 = smov %s2646_s10  ;;  %s2644_s30 = smov %s2650_s11 }
 0x103   :  { %18 = sbr.rel (!%p16_p7) target bundleno = 3 (0x3), region = 113 }

// kernel: multi_head_attention.5
= control target key start
LH: loop header
LB: loop body
LE: loop exit
PB: predicated region body
PF: predicated region fallthrough
CT: control target
= control target key end

     0   :  { %8 = vsyncpa [#allocation3], 0  ;;  %s3545_s0 = inlined_call_operand.vmem [shape: bf16[2,8,8,64], index: 0, kind: input, shape index: {}]   ;;  %s3546_s1 = inlined_call_operand.vmem [shape: bf16[8,64,512], index: 1, kind: input, shape index: {}]   ;;  %s3547_s2 = inlined_call_operand.vmem [shape: f32[2,8,512], index: 2, kind: input, shape index: {}]   ;;  %s3548_s3 = inlined_call_operand.hbm [shape: f32[2,8,512], index: 3, kind: output, shape index: {}]  }
   0x1   :  { %10 = vsyncpa [#allocation3 + $0x1], 0  ;;  %s2628_s12 = smov 0   ;;  %s2630_s13 = smov 0  }
   0x2   :  { %s2632_s14 = smov 0   ;;  %s2634_s15 = smov 0  }
   0x3   :  { %s2636_s16 = smov 0   ;;  %s2638_s17 = smov 0  }
   0x4 LB: > { %s1658_s18 = sadd.s32 4294967295, %s2605_s17   ;;  %s1659_s19 = sadd.s32 4294967294, %s2605_s17   ;;  %s2605_s17 = sphi %s2638_s17, %s16_s17   ;;  %s2601_s16 = sphi %s2636_s16, %s3555_s16   ;;  %s2597_s15 = sphi %s2634_s15, %s3554_s15   ;;  %s2593_s14 = sphi %s2632_s14, %s3553_s14   ;;  %s2589_s13 = sphi %s2630_s13, %s3552_s13   ;;  %s2585_s12 = sphi %s2628_s12, %s3551_s12  }
   0x5   : > { %s28_s20 = sadd.s32 1, %s2601_s16  ;;  %s114_s21 = sadd.s32 1, %s2593_s14 }
   0x6   : > { %p30_p0 = scmp.ge.s32.totalorder %s28_s20, 2  ;;  %p124_p1 = scmp.ne.s32.totalorder %s2593_s14, %s2589_s13 }
   0x7   : > { %p125_p2 = scmp.eq.s32.totalorder %s1658_s18, 1  ;;  %p130_p3 = scmp.ne.s32.totalorder %s2589_s13, %s2585_s12 }
   0x8   : > { %s3557_s20 = smov (%p30_p0, %s28_s20), 0  ;;  %p131_p5 = scmp.eq.s32.totalorder %s1659_s19, 1 }
   0x9   : > { %p2668_p4 = por %p125_p2, %p124_p1  ;;  %s109_s23 = ssub.s32 %s2601_s16, %s3557_s20 }
   0xa   : > { %p1662_p6 = scmp.ge.s32.totalorder %s2605_s17, 1  ;;  %p112_p7 = scmp.eq.s32.totalorder %s109_s23, 0 }
   0xb   : > { %p2675_p8 = por %p131_p5, %p130_p3  ;;  %p175_p9 = scmp.lt.s32.totalorder %s2605_s17, 3 }
   0xc   : > { %s2681_s25 = scalar_select %p112_p7, %s2593_s14, %s114_s21  }
   0xd   : > { %p176_p10 = pnand %p1662_p6, %p175_p9 }
   0xe   : > { %p211_p11 = scmp.lt.s32.totalorder (!%p176_p10), %s2597_s15, 1  ;;  %s2547_s11 = scalar_lea.hbm (!%p176_p10), %s3548_s3, 64 }
   0xf   : > { %179 = sbr.rel (%p176_p10) target bundleno = 563 (0x233), region = 32 }
  0x14   : > { %v1718_v0 = vld [vmem:[%s3546_s1 + $0x60] sm:$0xf]  ;;  %v2352_v1 = vld [vmem:[%s3546_s1 + $0x6c] sm:$0xf0]  ;;  %v2350_v2 = vld [vmem:[%s3546_s1 + $0x64] sm:$0xf] }
  0x15   : > { %v1719_v3 = vor.u32 %v2352_v1, %v1718_v0  ;;  %v1720_v4 = vld [vmem:[%s3546_s1 + $0x70] sm:$0xf0]  ;;  %v1726_v5 = vld [vmem:[%s3546_s1 + $0x68] sm:$0xf]  ;;  %v2353_v6 = vld [vmem:[%s3546_s1 + $0x74] sm:$0xf0] }
  0x16   : > { %v1723_v7 = vor.u32 %v2350_v2, %v1720_v4  ;;  %v1727_v8 = vor.u32 %v2353_v6, %v1726_v5  ;;  %v2351_v9 = vld [vmem:[%s3546_s1 + $0x6c] sm:$0xf]  ;;  %v1728_v10 = vld [vmem:[%s3546_s1 + $0x78] sm:$0xf0]  ;;  %v1702_v11 = vld [vmem:[%s3546_s1 + $0x40] sm:$0xf] }
  0x17   : > { %338 = vmatpush.bf16.msra.mxu0 %v1719_v3  ;;  %v1731_v12 = vor.u32 %v2351_v9, %v1728_v10  ;;  %v2348_v13 = vld [vmem:[%s3546_s1 + $0x4c] sm:$0xf0]  ;;  %v2346_v14 = vld [vmem:[%s3546_s1 + $0x44] sm:$0xf]  ;;  %v1704_v15 = vld [vmem:[%s3546_s1 + $0x50] sm:$0xf0] }
  0x18   : > { %351 = vmatpush.bf16.msra.mxu1 %v1723_v7  ;;  %364 = vmatpush.bf16.msra.mxu2 %v1727_v8  ;;  %v1703_v16 = vor.u32 %v2348_v13, %v1702_v11  ;;  %v1707_v17 = vor.u32 %v2346_v14, %v1704_v15  ;;  %v1710_v18 = vld [vmem:[%s3546_s1 + $0x48] sm:$0xf]  ;;  %v2349_v19 = vld [vmem:[%s3546_s1 + $0x54] sm:$0xf0]  ;;  %v2347_v20 = vld [vmem:[%s3546_s1 + $0x4c] sm:$0xf] }
  0x19   : > { %377 = vmatpush.bf16.msra.mxu3 %v1731_v12  ;;  %v1711_v21 = vor.u32 %v2349_v19, %v1710_v18  ;;  %v1712_v22 = vld [vmem:[%s3546_s1 + $0x58] sm:$0xf0]  ;;  %v1686_v23 = vld [vmem:[%s3546_s1 + $0x20] sm:$0xf]  ;;  %v2344_v24 = vld [vmem:[%s3546_s1 + $0x2c] sm:$0xf0] }
  0x1a   : > { %v1715_v25 = vor.u32 %v2347_v20, %v1712_v22  ;;  %v2342_v26 = vld [vmem:[%s3546_s1 + $0x24] sm:$0xf]  ;;  %v1688_v27 = vld [vmem:[%s3546_s1 + $0x30] sm:$0xf0]  ;;  %v1694_v28 = vld [vmem:[%s3546_s1 + $0x28] sm:$0xf]  ;;  %v1687_v29 = vor.u32 %v2344_v24, %v1686_v23 }
  0x1b   : > { %339 = vmatpush.bf16.msra.mxu0 %v1703_v16  ;;  %v2345_v30 = vld [vmem:[%s3546_s1 + $0x34] sm:$0xf0]  ;;  %v2343_v31 = vld [vmem:[%s3546_s1 + $0x2c] sm:$0xf]  ;;  %v1696_v32 = vld [vmem:[%s3546_s1 + $0x38] sm:$0xf0]  ;;  %v1691_v33 = vor.u32 %v2342_v26, %v1688_v27 }
  0x1c   : > { %352 = vmatpush.bf16.msra.mxu1 %v1707_v17  ;;  %365 = vmatpush.bf16.msra.mxu2 %v1711_v21  ;;  %v1695_v34 = vor.u32 %v2345_v30, %v1694_v28  ;;  %v1670_v35 = vld [vmem:[%s3546_s1] sm:$0xf]  ;;  %v2340_v36 = vld [vmem:[%s3546_s1 + $0xc] sm:$0xf0]  ;;  %v2338_v37 = vld [vmem:[%s3546_s1 + $0x4] sm:$0xf]  ;;  %v1699_v38 = vor.u32 %v2343_v31, %v1696_v32 }
  0x1d   : > { %378 = vmatpush.bf16.msra.mxu3 %v1715_v25  ;;  %v1672_v39 = vld [vmem:[%s3546_s1 + $0x10] sm:$0xf0]  ;;  %v1678_v40 = vld [vmem:[%s3546_s1 + $0x8] sm:$0xf]  ;;  %v2341_v41 = vld [vmem:[%s3546_s1 + $0x14] sm:$0xf0]  ;;  %v1671_v44 = vor.u32 %v2340_v36, %v1670_v35 }
  0x1e   : > { %v2339_v42 = vld [vmem:[%s3546_s1 + $0xc] sm:$0xf]  ;;  %v1680_v43 = vld [vmem:[%s3546_s1 + $0x18] sm:$0xf0]  ;;  %v1811_v45 = vld [vmem:[%s3546_s1 + $0xe8] sm:$0xf]  ;;  %v1675_v48 = vor.u32 %v2338_v37, %v1672_v39  ;;  %v1679_v49 = vor.u32 %v2341_v41, %v1678_v40 }
  0x1f   : > { %340 = vmatpush.bf16.msra.mxu0 %v1687_v29  ;;  %v2369_v46 = vld [vmem:[%s3546_s1 + $0xf4] sm:$0xf0]  ;;  %v1803_v47 = vld [vmem:[%s3546_s1 + $0xe0] sm:$0xf]  ;;  %s2790_s28 = scalar_select %p211_p11, %s2597_s15, 1  ;;  %v1683_v52 = vor.u32 %v2339_v42, %v1680_v43  ;;  %vm330_vm0 = vcmask 523264  }
  0x20   : > { %353 = vmatpush.bf16.msra.mxu1 %v1691_v33  ;;  %366 = vmatpush.bf16.msra.mxu2 %v1695_v34  ;;  %v2368_v50 = vld [vmem:[%s3546_s1 + $0xec] sm:$0xf0]  ;;  %v2366_v51 = vld [vmem:[%s3546_s1 + $0xe4] sm:$0xf]  ;;  %v1812_v53 = vor.u32 %v2369_v46, %v1811_v45  ;;  %v1805_v54 = vld [vmem:[%s3546_s1 + $0xf0] sm:$0xf0] }
  0x21   : > { %379 = vmatpush.bf16.msra.mxu3 %v1699_v38  ;;  %v2367_v55 = vld [vmem:[%s3546_s1 + $0xec] sm:$0xf]  ;;  %v1813_v56 = vld [vmem:[%s3546_s1 + $0xf8] sm:$0xf0]  ;;  %s2336_s18 = sshll.u32 %s2790_s28, 5  ;;  %v1808_v57 = vor.u32 %v2366_v51, %v1805_v54  ;;  %v1804_v62 = vor.u32 %v2368_v50, %v1803_v47  ;;  %s208_s28 = sand.u32 1, %s2589_s13  }
  0x22   : > { %v1795_v58 = vld [vmem:[%s3546_s1 + $0xc8] sm:$0xf]  ;;  %v2365_v59 = vld [vmem:[%s3546_s1 + $0xd4] sm:$0xf0]  ;;  %s2819_s30 = scalar_lea.vmem %s3545_s0, %s2336_s18  ;;  %v2362_v60 = vld [vmem:[%s3546_s1 + $0xc4] sm:$0xf]  ;;  %v1816_v0 = vor.u32 %v2367_v55, %v1813_v56  ;;  %s227_s23 = scalar_lea.vmem %s3547_s2, %s2336_s18 }
  0x23   : > { %341 = vmatpush.bf16.msra.mxu0 %v1671_v44  ;;  %v233_v61 = vld [vmem:[%s2819_s30] sm:$0xf]  ;;  %v1789_v63 = vld [vmem:[%s3546_s1 + $0xd0] sm:$0xf0]  ;;  %v1796_v1 = vor.u32 %v2365_v59, %v1795_v58  ;;  %v2364_v3 = vld [vmem:[%s3546_s1 + $0xcc] sm:$0xf0] }
  0x24   : > { %354 = vmatpush.bf16.msra.mxu1 %v1675_v48  ;;  %367 = vmatpush.bf16.msra.mxu2 %v1679_v49  ;;  %v1787_v2 = vld [vmem:[%s3546_s1 + $0xc0] sm:$0xf]  ;;  %v2363_v4 = vld [vmem:[%s3546_s1 + $0xcc] sm:$0xf]  ;;  %v1792_v5 = vor.u32 %v2362_v60, %v1789_v63  ;;  %v1797_v6 = vld [vmem:[%s3546_s1 + $0xd8] sm:$0xf0] }
  0x25   : > { %380 = vmatpush.bf16.msra.mxu3 %v1683_v52  ;;  %v1779_v7 = vld [vmem:[%s3546_s1 + $0xa8] sm:$0xf]  ;;  %v2361_v8 = vld [vmem:[%s3546_s1 + $0xb4] sm:$0xf0]  ;;  %v2358_v9 = vld [vmem:[%s3546_s1 + $0xa4] sm:$0xf]  ;;  %v1788_v11 = vor.u32 %v2364_v3, %v1787_v2  ;;  %v1800_v13 = vor.u32 %v2363_v4, %v1797_v6 }
  0x26   : > { %1732 = vmatmul.msk.bf16.vlgmr.msra.gmra.mxu0 %vm330_vm0, %v233_v61  ;;  %v1773_v10 = vld [vmem:[%s3546_s1 + $0xb0] sm:$0xf0]  ;;  %v1771_v12 = vld [vmem:[%s3546_s1 + $0xa0] sm:$0xf]  ;;  %v1780_v14 = vor.u32 %v2361_v8, %v1779_v7  ;;  %v2360_v15 = vld [vmem:[%s3546_s1 + $0xac] sm:$0xf0] }
  0x27   : > { %1733 = vmatmul.msk.bf16.vlgmr.msra.gmra.mxu1 %vm330_vm0, %v233_v61  ;;  %1734 = vmatmul.msk.bf16.vlgmr.msra.gmra.mxu2 %vm330_vm0, %v233_v61  ;;  %v2359_v16 = vld [vmem:[%s3546_s1 + $0xac] sm:$0xf]  ;;  %v1781_v17 = vld [vmem:[%s3546_s1 + $0xb8] sm:$0xf0]  ;;  %v1776_v18 = vor.u32 %v2358_v9, %v1773_v10  ;;  %v1763_v19 = vld [vmem:[%s3546_s1 + $0x88] sm:$0xf]  ;;  %v1772_v25 = vor.u32 %v2360_v15, %v1771_v12 }
  0x28   : > { %522 = vmatpush.bf16.msrb.mxu2 %v1812_v53  ;;  %509 = vmatpush.bf16.msrb.mxu1 %v1808_v57  ;;  %v2357_v20 = vld [vmem:[%s3546_s1 + $0x94] sm:$0xf0]  ;;  %v2354_v21 = vld [vmem:[%s3546_s1 + $0x84] sm:$0xf]  ;;  %v1757_v22 = vld [vmem:[%s3546_s1 + $0x90] sm:$0xf0]  ;;  %v1784_v29 = vor.u32 %v2359_v16, %v1781_v17 }
  0x29   : > { %1735 = vmatmul.msk.bf16.vlgmr.msra.gmra.mxu3 %vm330_vm0, %v233_v61  ;;  %496 = vmatpush.bf16.msrb.mxu0 %v1804_v62  ;;  %v1896_v23 = vld [vmem:[%s3546_s1 + $0x168] sm:$0xf]  ;;  %v2385_v24 = vld [vmem:[%s3546_s1 + $0x174] sm:$0xf0]  ;;  %v1755_v26 = vld [vmem:[%s3546_s1 + $0x80] sm:$0xf]  ;;  %v1764_v30 = vor.u32 %v2357_v20, %v1763_v19  ;;  %v1760_v34 = vor.u32 %v2354_v21, %v1757_v22 }
  0x2a   : > { %535 = vmatpush.bf16.msrb.mxu3 %v1816_v0  ;;  %v2382_v27 = vld [vmem:[%s3546_s1 + $0x164] sm:$0xf]  ;;  %v1890_v28 = vld [vmem:[%s3546_s1 + $0x170] sm:$0xf0]  ;;  %v2356_v31 = vld [vmem:[%s3546_s1 + $0x8c] sm:$0xf0]  ;;  %v1897_v35 = vor.u32 %v2385_v24, %v1896_v23 }
  0x2b   : > { %v2355_v32 = vld [vmem:[%s3546_s1 + $0x8c] sm:$0xf]  ;;  %v1765_v33 = vld [vmem:[%s3546_s1 + $0x98] sm:$0xf0]  ;;  %v1888_v36 = vld [vmem:[%s3546_s1 + $0x160] sm:$0xf]  ;;  %v1893_v39 = vor.u32 %v2382_v27, %v1890_v28  ;;  %v1756_v43 = vor.u32 %v2356_v31, %v1755_v26 }
  0x2c   : > { %523 = vmatpush.bf16.msrb.mxu2 %v1796_v1  ;;  %510 = vmatpush.bf16.msrb.mxu1 %v1792_v5  ;;  %v2384_v37 = vld [vmem:[%s3546_s1 + $0x16c] sm:$0xf0]  ;;  %v2383_v38 = vld [vmem:[%s3546_s1 + $0x16c] sm:$0xf]  ;;  %v1898_v40 = vld [vmem:[%s3546_s1 + $0x178] sm:$0xf0]  ;;  %v1768_v44 = vor.u32 %v2355_v32, %v1765_v33 }
  0x2d   : > { %497 = vmatpush.bf16.msrb.mxu0 %v1788_v11  ;;  %v1880_v41 = vld [vmem:[%s3546_s1 + $0x148] sm:$0xf]  ;;  %v2381_v42 = vld [vmem:[%s3546_s1 + $0x154] sm:$0xf0]  ;;  %v1889_v45 = vor.u32 %v2384_v37, %v1888_v36  ;;  %v1872_v46 = vld [vmem:[%s3546_s1 + $0x140] sm:$0xf]  ;;  %v1901_v48 = vor.u32 %v2383_v38, %v1898_v40 }
  0x2e   : > { %536 = vmatpush.bf16.msrb.mxu3 %v1800_v13  ;;  %v2380_v47 = vld [vmem:[%s3546_s1 + $0x14c] sm:$0xf0]  ;;  %v1881_v49 = vor.u32 %v2381_v42, %v1880_v41  ;;  %v2378_v50 = vld [vmem:[%s3546_s1 + $0x144] sm:$0xf]  ;;  %v1874_v51 = vld [vmem:[%s3546_s1 + $0x150] sm:$0xf0] }
  0x2f   : > { %v2379_v52 = vld [vmem:[%s3546_s1 + $0x14c] sm:$0xf]  ;;  %v1882_v53 = vld [vmem:[%s3546_s1 + $0x158] sm:$0xf0]  ;;  %v1864_v54 = vld [vmem:[%s3546_s1 + $0x128] sm:$0xf]  ;;  %v1873_v57 = vor.u32 %v2380_v47, %v1872_v46  ;;  %v1877_v58 = vor.u32 %v2378_v50, %v1874_v51 }
  0x30   : > { %524 = vmatpush.bf16.msrb.mxu2 %v1780_v14  ;;  %511 = vmatpush.bf16.msrb.mxu1 %v1776_v18  ;;  %v2377_v55 = vld [vmem:[%s3546_s1 + $0x134] sm:$0xf0]  ;;  %v1736_v56 = vld [vmem:[%s2819_s30 + $0x4] sm:$0xf]  ;;  %v1856_v59 = vld [vmem:[%s3546_s1 + $0x120] sm:$0xf]  ;;  %v1885_v61 = vor.u32 %v2379_v52, %v1882_v53 }
  0x31   : > { %498 = vmatpush.bf16.msrb.mxu0 %v1772_v25  ;;  %v2376_v60 = vld [vmem:[%s3546_s1 + $0x12c] sm:$0xf0]  ;;  %v1865_v62 = vor.u32 %v2377_v55, %v1864_v54  ;;  %v2374_v63 = vld [vmem:[%s3546_s1 + $0x124] sm:$0xf]  ;;  %v1858_v0 = vld [vmem:[%s3546_s1 + $0x130] sm:$0xf0] }
  0x32   : > { %537 = vmatpush.bf16.msrb.mxu3 %v1784_v29  ;;  %v2375_v1 = vld [vmem:[%s3546_s1 + $0x12c] sm:$0xf]  ;;  %v1866_v2 = vld [vmem:[%s3546_s1 + $0x138] sm:$0xf0]  ;;  %v1848_v3 = vld [vmem:[%s3546_s1 + $0x108] sm:$0xf]  ;;  %v1857_v7 = vor.u32 %v2376_v60, %v1856_v59  ;;  %v1861_v8 = vor.u32 %v2374_v63, %v1858_v0 }
  0x33   : > { %v2373_v4 = vld [vmem:[%s3546_s1 + $0x114] sm:$0xf0]  ;;  %v1981_v5 = vld [vmem:[%s3546_s1 + $0x1e8] sm:$0xf]  ;;  %v1840_v9 = vld [vmem:[%s3546_s1 + $0x100] sm:$0xf]  ;;  %v1869_v12 = vor.u32 %v2375_v1, %v1866_v2 }
  0x34   : > { %525 = vmatpush.bf16.msrb.mxu2 %v1764_v30  ;;  %512 = vmatpush.bf16.msrb.mxu1 %v1760_v34  ;;  %v2401_v6 = vld [vmem:[%s3546_s1 + $0x1f4] sm:$0xf0]  ;;  %v2372_v10 = vld [vmem:[%s3546_s1 + $0x10c] sm:$0xf0]  ;;  %v2370_v11 = vld [vmem:[%s3546_s1 + $0x104] sm:$0xf]  ;;  %v1849_v13 = vor.u32 %v2373_v4, %v1848_v3 }
  0x35   : > { %499 = vmatpush.bf16.msrb.mxu0 %v1756_v43  ;;  %v1842_v14 = vld [vmem:[%s3546_s1 + $0x110] sm:$0xf0]  ;;  %v2371_v15 = vld [vmem:[%s3546_s1 + $0x10c] sm:$0xf]  ;;  %v1850_v16 = vld [vmem:[%s3546_s1 + $0x118] sm:$0xf0]  ;;  %v1982_v17 = vor.u32 %v2401_v6, %v1981_v5  ;;  %v1841_v24 = vor.u32 %v2372_v10, %v1840_v9 }
  0x36   : > { %538 = vmatpush.bf16.msrb.mxu3 %v1768_v44  ;;  %v1973_v18 = vld [vmem:[%s3546_s1 + $0x1e0] sm:$0xf]  ;;  %v2400_v19 = vld [vmem:[%s3546_s1 + $0x1ec] sm:$0xf0]  ;;  %v2398_v20 = vld [vmem:[%s3546_s1 + $0x1e4] sm:$0xf]  ;;  %v1845_v25 = vor.u32 %v2370_v11, %v1842_v14  ;;  %v1853_v28 = vor.u32 %v2371_v15, %v1850_v16 }
  0x37   : > { %1818 = vmatmul.msk.bf16.vlgmr.msrb.gmra.mxu1 %vm330_vm0, %v1736_v56  ;;  %1819 = vmatmul.msk.bf16.vlgmr.msrb.gmra.mxu2 %vm330_vm0, %v1736_v56  ;;  %v1975_v21 = vld [vmem:[%s3546_s1 + $0x1f0] sm:$0xf0]  ;;  %v2399_v22 = vld [vmem:[%s3546_s1 + $0x1ec] sm:$0xf]  ;;  %v1983_v23 = vld [vmem:[%s3546_s1 + $0x1f8] sm:$0xf0]  ;;  %v1974_v29 = vor.u32 %v2400_v19, %v1973_v18 }
  0x38   : > { %680 = vmatpush.bf16.msra.mxu2 %v1897_v35  ;;  %667 = vmatpush.bf16.msra.mxu1 %v1893_v39  ;;  %v1965_v26 = vld [vmem:[%s3546_s1 + $0x1c8] sm:$0xf]  ;;  %v2397_v27 = vld [vmem:[%s3546_s1 + $0x1d4] sm:$0xf0]  ;;  %v1978_v30 = vor.u32 %v2398_v20, %v1975_v21  ;;  %v1986_v31 = vor.u32 %v2399_v22, %v1983_v23  ;;  %v1957_v32 = vld [vmem:[%s3546_s1 + $0x1c0] sm:$0xf] }
  0x39   : > { %654 = vmatpush.bf16.msra.mxu0 %v1889_v45  ;;  %1820 = vmatmul.msk.bf16.vlgmr.msrb.gmra.mxu3 %vm330_vm0, %v1736_v56  ;;  %v2396_v33 = vld [vmem:[%s3546_s1 + $0x1cc] sm:$0xf0]  ;;  %v1966_v34 = vor.u32 %v2397_v27, %v1965_v26  ;;  %v2394_v35 = vld [vmem:[%s3546_s1 + $0x1c4] sm:$0xf]  ;;  %v1959_v36 = vld [vmem:[%s3546_s1 + $0x1d0] sm:$0xf0] }
  0x3a   : > { %693 = vmatpush.bf16.msra.mxu3 %v1901_v48  ;;  %1817 = vmatmul.msk.bf16.vlgmr.msrb.gmra.mxu0 %vm330_vm0, %v1736_v56  ;;  %v1958_v37 = vor.u32 %v2396_v33, %v1957_v32  ;;  %v2395_v38 = vld [vmem:[%s3546_s1 + $0x1cc] sm:$0xf]  ;;  %v1967_v39 = vld [vmem:[%s3546_s1 + $0x1d8] sm:$0xf0]  ;;  %v1949_v40 = vld [vmem:[%s3546_s1 + $0x1a8] sm:$0xf]  ;;  %v1962_v45 = vor.u32 %v2394_v35, %v1959_v36 }
  0x3b   : > { %v2393_v41 = vld [vmem:[%s3546_s1 + $0x1b4] sm:$0xf0]  ;;  %v1941_v42 = vld [vmem:[%s3546_s1 + $0x1a0] sm:$0xf]  ;;  %v2392_v43 = vld [vmem:[%s3546_s1 + $0x1ac] sm:$0xf0]  ;;  %v1970_v46 = vor.u32 %v2395_v38, %v1967_v39 }
  0x3c   : > { %681 = vmatpush.bf16.msra.mxu2 %v1881_v49  ;;  %668 = vmatpush.bf16.msra.mxu1 %v1877_v58  ;;  %v1821_v44 = vld [vmem:[%s2819_s30 + $0x8] sm:$0xf]  ;;  %v2390_v47 = vld [vmem:[%s3546_s1 + $0x1a4] sm:$0xf]  ;;  %v1943_v48 = vld [vmem:[%s3546_s1 + $0x1b0] sm:$0xf0]  ;;  %v1950_v50 = vor.u32 %v2393_v41, %v1949_v40  ;;  %v1942_v51 = vor.u32 %v2392_v43, %v1941_v42 }
  0x3d   : > { %655 = vmatpush.bf16.msra.mxu0 %v1873_v57  ;;  %v2391_v49 = vld [vmem:[%s3546_s1 + $0x1ac] sm:$0xf]  ;;  %v1951_v52 = vld [vmem:[%s3546_s1 + $0x1b8] sm:$0xf0]  ;;  %v1933_v53 = vld [vmem:[%s3546_s1 + $0x188] sm:$0xf] }
  0x3e   : > { %694 = vmatpush.bf16.msra.mxu3 %v1885_v61  ;;  %v2389_v54 = vld [vmem:[%s3546_s1 + $0x194] sm:$0xf0]  ;;  %v1925_v55 = vld [vmem:[%s3546_s1 + $0x180] sm:$0xf]  ;;  %v2388_v56 = vld [vmem:[%s3546_s1 + $0x18c] sm:$0xf0]  ;;  %v1946_v61 = vor.u32 %v2390_v47, %v1943_v48 }
  0x3f   : > { %v2066_v57 = vld [vmem:[%s3546_s1 + $0x268] sm:$0xf]  ;;  %v2417_v58 = vld [vmem:[%s3546_s1 + $0x274] sm:$0xf0]  ;;  %v2058_v59 = vld [vmem:[%s3546_s1 + $0x260] sm:$0xf]  ;;  %v1934_v2 = vor.u32 %v2389_v54, %v1933_v53  ;;  %v1926_v3 = vor.u32 %v2388_v56, %v1925_v55 }
  0x40   : > { %682 = vmatpush.bf16.msra.mxu2 %v1865_v62  ;;  %669 = vmatpush.bf16.msra.mxu1 %v1861_v8  ;;  %v2416_v60 = vld [vmem:[%s3546_s1 + $0x26c] sm:$0xf0]  ;;  %v1954_v62 = vor.u32 %v2391_v49, %v1951_v52  ;;  %v2386_v63 = vld [vmem:[%s3546_s1 + $0x184] sm:$0xf]  ;;  %v1927_v0 = vld [vmem:[%s3546_s1 + $0x190] sm:$0xf0] }
  0x41   : > { %656 = vmatpush.bf16.msra.mxu0 %v1857_v7  ;;  %v2387_v1 = vld [vmem:[%s3546_s1 + $0x18c] sm:$0xf]  ;;  %v1935_v4 = vld [vmem:[%s3546_s1 + $0x198] sm:$0xf0]  ;;  %v2414_v5 = vld [vmem:[%s3546_s1 + $0x264] sm:$0xf]  ;;  %v2067_v7 = vor.u32 %v2417_v58, %v2066_v57  ;;  %v2059_v8 = vor.u32 %v2416_v60, %v2058_v59  ;;  %v1930_v15 = vor.u32 %v2386_v63, %v1927_v0 }
  0x42   : > { %695 = vmatpush.bf16.msra.mxu3 %v1869_v12  ;;  %v2060_v6 = vld [vmem:[%s3546_s1 + $0x270] sm:$0xf0]  ;;  %v2415_v9 = vld [vmem:[%s3546_s1 + $0x26c] sm:$0xf]  ;;  %v2068_v10 = vld [vmem:[%s3546_s1 + $0x278] sm:$0xf0]  ;;  %v1938_v16 = vor.u32 %v2387_v1, %v1935_v4 }
  0x43   : > { %v2050_v11 = vld [vmem:[%s3546_s1 + $0x248] sm:$0xf]  ;;  %v2413_v12 = vld [vmem:[%s3546_s1 + $0x254] sm:$0xf0]  ;;  %v2412_v14 = vld [vmem:[%s3546_s1 + $0x24c] sm:$0xf0]  ;;  %v2071_v18 = vor.u32 %v2415_v9, %v2068_v10 }
  0x44   : > { %683 = vmatpush.bf16.msra.mxu2 %v1849_v13  ;;  %670 = vmatpush.bf16.msra.mxu1 %v1845_v25  ;;  %v2042_v13 = vld [vmem:[%s3546_s1 + $0x240] sm:$0xf]  ;;  %v2410_v19 = vld [vmem:[%s3546_s1 + $0x244] sm:$0xf]  ;;  %v2051_v20 = vor.u32 %v2413_v12, %v2050_v11  ;;  %v2044_v22 = vld [vmem:[%s3546_s1 + $0x250] sm:$0xf0] }
  0x45   : > { %657 = vmatpush.bf16.msra.mxu0 %v1841_v24  ;;  %v2043_v21 = vor.u32 %v2412_v14, %v2042_v13  ;;  %v2411_v23 = vld [vmem:[%s3546_s1 + $0x24c] sm:$0xf]  ;;  %v2052_v24 = vld [vmem:[%s3546_s1 + $0x258] sm:$0xf0]  ;;  %v2034_v25 = vld [vmem:[%s3546_s1 + $0x228] sm:$0xf]  ;;  %v2047_v27 = vor.u32 %v2410_v19, %v2044_v22 }
  0x46   : > { %696 = vmatpush.bf16.msra.mxu3 %v1853_v28  ;;  %v2409_v26 = vld [vmem:[%s3546_s1 + $0x234] sm:$0xf0]  ;;  %v2055_v28 = vor.u32 %v2411_v23, %v2052_v24  ;;  %v2028_v32 = vld [vmem:[%s3546_s1 + $0x230] sm:$0xf0]  ;;  %v2407_v33 = vld [vmem:[%s3546_s1 + $0x22c] sm:$0xf] }
  0x47   : > { %1903 = vmatmul.msk.bf16.vlgmr.msra.gmra.mxu1 %vm330_vm0, %v1821_v44  ;;  %1904 = vmatmul.msk.bf16.vlgmr.msra.gmra.mxu2 %vm330_vm0, %v1821_v44  ;;  %v1906_v35 = vld [vmem:[%s2819_s30 + $0xc] sm:$0xf]  ;;  %v2018_v36 = vld [vmem:[%s3546_s1 + $0x208] sm:$0xf]  ;;  %v2405_v39 = vld [vmem:[%s3546_s1 + $0x214] sm:$0xf0] }
  0x48   : > { %838 = vmatpush.bf16.msrb.mxu2 %v1982_v17  ;;  %825 = vmatpush.bf16.msrb.mxu1 %v1978_v30  ;;  %v2063_v17 = vor.u32 %v2414_v5, %v2060_v6  ;;  %v2408_v30 = vld [vmem:[%s3546_s1 + $0x22c] sm:$0xf0]  ;;  %v2010_v40 = vld [vmem:[%s3546_s1 + $0x200] sm:$0xf]  ;;  %v2020_v47 = vld [vmem:[%s3546_s1 + $0x218] sm:$0xf0]  ;;  %v2019_v53 = vor.u32 %v2405_v39, %v2018_v36 }
  0x49   : > { %812 = vmatpush.bf16.msrb.mxu0 %v1974_v29  ;;  %1905 = vmatmul.msk.bf16.vlgmr.msra.gmra.mxu3 %vm330_vm0, %v1821_v44  ;;  %v2026_v29 = vld [vmem:[%s3546_s1 + $0x220] sm:$0xf]  ;;  %v2404_v41 = vld [vmem:[%s3546_s1 + $0x20c] sm:$0xf0]  ;;  %v2151_v48 = vld [vmem:[%s3546_s1 + $0x2e8] sm:$0xf] }
  0x4a   : > { %851 = vmatpush.bf16.msrb.mxu3 %v1986_v31  ;;  %1902 = vmatmul.msk.bf16.vlgmr.msra.gmra.mxu0 %vm330_vm0, %v1821_v44  ;;  %v2406_v31 = vld [vmem:[%s3546_s1 + $0x224] sm:$0xf]  ;;  %v2027_v38 = vor.u32 %v2408_v30, %v2026_v29  ;;  %v2433_v49 = vld [vmem:[%s3546_s1 + $0x2f4] sm:$0xf0]  ;;  %v2011_v54 = vor.u32 %v2404_v41, %v2010_v40  ;;  %v2145_v55 = vld [vmem:[%s3546_s1 + $0x2f0] sm:$0xf0] }
  0x4b   : > { %v2031_v42 = vor.u32 %v2406_v31, %v2028_v32  ;;  %v2402_v44 = vld [vmem:[%s3546_s1 + $0x204] sm:$0xf]  ;;  %v2431_v56 = vld [vmem:[%s3546_s1 + $0x2ec] sm:$0xf]  ;;  %v2153_v57 = vld [vmem:[%s3546_s1 + $0x2f8] sm:$0xf0]  ;;  %v2152_v60 = vor.u32 %v2433_v49, %v2151_v48 }
  0x4c   : > { %839 = vmatpush.bf16.msrb.mxu2 %v1966_v34  ;;  %826 = vmatpush.bf16.msrb.mxu1 %v1962_v45  ;;  %v2036_v34 = vld [vmem:[%s3546_s1 + $0x238] sm:$0xf0]  ;;  %v2012_v45 = vld [vmem:[%s3546_s1 + $0x210] sm:$0xf0]  ;;  %v2430_v52 = vld [vmem:[%s3546_s1 + $0x2e4] sm:$0xf]  ;;  %v2156_v1 = vor.u32 %v2431_v56, %v2153_v57 }
  0x4d   : > { %813 = vmatpush.bf16.msrb.mxu0 %v1958_v37  ;;  %v2035_v37 = vor.u32 %v2409_v26, %v2034_v25  ;;  %v2039_v43 = vor.u32 %v2407_v33, %v2036_v34  ;;  %v2015_v58 = vor.u32 %v2402_v44, %v2012_v45  ;;  %v2429_v63 = vld [vmem:[%s3546_s1 + $0x2d4] sm:$0xf0]  ;;  %v2148_v0 = vor.u32 %v2430_v52, %v2145_v55  ;;  %v2426_v4 = vld [vmem:[%s3546_s1 + $0x2c4] sm:$0xf]  ;;  %v2129_v5 = vld [vmem:[%s3546_s1 + $0x2d0] sm:$0xf0] }
  0x4e   : > { %852 = vmatpush.bf16.msrb.mxu3 %v1970_v46  ;;  %v2403_v46 = vld [vmem:[%s3546_s1 + $0x20c] sm:$0xf]  ;;  %v2132_v10 = vor.u32 %v2426_v4, %v2129_v5  ;;  %v2119_v12 = vld [vmem:[%s3546_s1 + $0x2a8] sm:$0xf]  ;;  %v2425_v13 = vld [vmem:[%s3546_s1 + $0x2b4] sm:$0xf0] }
  0x4f   : > { %v2023_v59 = vor.u32 %v2403_v46, %v2020_v47  ;;  %v2427_v6 = vld [vmem:[%s3546_s1 + $0x2cc] sm:$0xf]  ;;  %v2111_v14 = vld [vmem:[%s3546_s1 + $0x2a0] sm:$0xf]  ;;  %v2121_v19 = vld [vmem:[%s3546_s1 + $0x2b8] sm:$0xf0]  ;;  %v2120_v22 = vor.u32 %v2425_v13, %v2119_v12 }
  0x50   : > { %840 = vmatpush.bf16.msrb.mxu2 %v1950_v50  ;;  %827 = vmatpush.bf16.msrb.mxu1 %v1946_v61  ;;  %v2143_v50 = vld [vmem:[%s3546_s1 + $0x2e0] sm:$0xf]  ;;  %v2421_v24 = vld [vmem:[%s3546_s1 + $0x294] sm:$0xf0]  ;;  %v2420_v26 = vld [vmem:[%s3546_s1 + $0x28c] sm:$0xf0] }
  0x51   : > { %814 = vmatpush.bf16.msrb.mxu0 %v1942_v51  ;;  %v2432_v51 = vld [vmem:[%s3546_s1 + $0x2ec] sm:$0xf0]  ;;  %v2095_v25 = vld [vmem:[%s3546_s1 + $0x280] sm:$0xf]  ;;  %v2418_v29 = vld [vmem:[%s3546_s1 + $0x284] sm:$0xf] }
  0x52   : > { %853 = vmatpush.bf16.msrb.mxu3 %v1954_v62  ;;  %v2144_v61 = vor.u32 %v2432_v51, %v2143_v50  ;;  %v2135_v62 = vld [vmem:[%s3546_s1 + $0x2c8] sm:$0xf]  ;;  %v2097_v30 = vld [vmem:[%s3546_s1 + $0x290] sm:$0xf0]  ;;  %v2419_v31 = vld [vmem:[%s3546_s1 + $0x28c] sm:$0xf]  ;;  %v2096_v39 = vor.u32 %v2420_v26, %v2095_v25 }
  0x53   : > { %v2105_v32 = vld [vmem:[%s3546_s1 + $0x298] sm:$0xf0]  ;;  %v2236_v33 = vld [vmem:[%s3546_s1 + $0x368] sm:$0xf]  ;;  %v2449_v34 = vld [vmem:[%s3546_s1 + $0x374] sm:$0xf0] }
  0x54   : > { %841 = vmatpush.bf16.msrb.mxu2 %v1934_v2  ;;  %828 = vmatpush.bf16.msrb.mxu1 %v1930_v15  ;;  %v2127_v2 = vld [vmem:[%s3546_s1 + $0x2c0] sm:$0xf]  ;;  %v2424_v15 = vld [vmem:[%s3546_s1 + $0x2ac] sm:$0xf0]  ;;  %v2230_v40 = vld [vmem:[%s3546_s1 + $0x370] sm:$0xf0]  ;;  %v2108_v44 = vor.u32 %v2419_v31, %v2105_v32  ;;  %v2237_v45 = vor.u32 %v2449_v34, %v2236_v33 }
  0x55   : > { %815 = vmatpush.bf16.msrb.mxu0 %v1926_v3  ;;  %v2428_v3 = vld [vmem:[%s3546_s1 + $0x2cc] sm:$0xf0]  ;;  %v2112_v23 = vor.u32 %v2424_v15, %v2111_v14  ;;  %v2447_v41 = vld [vmem:[%s3546_s1 + $0x36c] sm:$0xf]  ;;  %v2220_v47 = vld [vmem:[%s3546_s1 + $0x348] sm:$0xf] }
  0x56   : > { %854 = vmatpush.bf16.msrb.mxu3 %v1938_v16  ;;  %v2128_v9 = vor.u32 %v2428_v3, %v2127_v2  ;;  %v2422_v16 = vld [vmem:[%s3546_s1 + $0x2a4] sm:$0xf]  ;;  %v2448_v36 = vld [vmem:[%s3546_s1 + $0x36c] sm:$0xf0]  ;;  %v2445_v48 = vld [vmem:[%s3546_s1 + $0x354] sm:$0xf0] }
  0x57   : > { %1988 = vmatmul.msk.bf16.vlgmr.msrb.gmra.mxu1 %vm330_vm0, %v1906_v35  ;;  %1989 = vmatmul.msk.bf16.vlgmr.msrb.gmra.mxu2 %vm330_vm0, %v1906_v35  ;;  %v2212_v51 = vld [vmem:[%s3546_s1 + $0x340] sm:$0xf]  ;;  %v2444_v52 = vld [vmem:[%s3546_s1 + $0x34c] sm:$0xf0]  ;;  %v2443_v55 = vld [vmem:[%s3546_s1 + $0x34c] sm:$0xf]  ;;  %v2221_v57 = vor.u32 %v2445_v48, %v2220_v47 }
  0x58   : > { %996 = vmatpush.bf16.msra.mxu2 %v2067_v7  ;;  %983 = vmatpush.bf16.msra.mxu1 %v2063_v17  ;;  %v2137_v7 = vld [vmem:[%s3546_s1 + $0x2d8] sm:$0xf0]  ;;  %v2113_v17 = vld [vmem:[%s3546_s1 + $0x2b0] sm:$0xf0]  ;;  %v2439_v3 = vld [vmem:[%s3546_s1 + $0x32c] sm:$0xf] }
  0x59   : > { %970 = vmatpush.bf16.msra.mxu0 %v2059_v8  ;;  %1990 = vmatmul.msk.bf16.vlgmr.msrb.gmra.mxu3 %vm330_vm0, %v1906_v35  ;;  %v2136_v8 = vor.u32 %v2429_v63, %v2135_v62  ;;  %v2140_v11 = vor.u32 %v2427_v6, %v2137_v7  ;;  %v2222_v56 = vld [vmem:[%s3546_s1 + $0x358] sm:$0xf0]  ;;  %v2441_v62 = vld [vmem:[%s3546_s1 + $0x334] sm:$0xf0]  ;;  %v2196_v63 = vld [vmem:[%s3546_s1 + $0x320] sm:$0xf] }
  0x5a   : > { %1009 = vmatpush.bf16.msra.mxu3 %v2071_v18  ;;  %1987 = vmatmul.msk.bf16.vlgmr.msrb.gmra.mxu0 %vm330_vm0, %v1906_v35  ;;  %v2423_v18 = vld [vmem:[%s3546_s1 + $0x2ac] sm:$0xf]  ;;  %v2228_v35 = vld [vmem:[%s3546_s1 + $0x360] sm:$0xf]  ;;  %v2198_v2 = vld [vmem:[%s3546_s1 + $0x330] sm:$0xf0] }
  0x5b   : > { %v2229_v46 = vor.u32 %v2448_v36, %v2228_v35  ;;  %v2206_v4 = vld [vmem:[%s3546_s1 + $0x338] sm:$0xf0]  ;;  %v2076_v5 = vld [vmem:[%s2819_s30 + $0x14] sm:$0xf]  ;;  %v2188_v6 = vld [vmem:[%s3546_s1 + $0x308] sm:$0xf] }
  0x5c   : > { %997 = vmatpush.bf16.msra.mxu2 %v2051_v20  ;;  %984 = vmatpush.bf16.msra.mxu1 %v2047_v27  ;;  %v1991_v20 = vld [vmem:[%s2819_s30 + $0x10] sm:$0xf]  ;;  %v2116_v27 = vor.u32 %v2422_v16, %v2113_v17  ;;  %v2209_v13 = vor.u32 %v2439_v3, %v2206_v4  ;;  %v2434_v14 = vld [vmem:[%s3546_s1 + $0x304] sm:$0xf]  ;;  %v2182_v15 = vld [vmem:[%s3546_s1 + $0x310] sm:$0xf0] }
  0x5d   : > { %971 = vmatpush.bf16.msra.mxu0 %v2043_v21  ;;  %v2103_v21 = vld [vmem:[%s3546_s1 + $0x288] sm:$0xf]  ;;  %v2435_v16 = vld [vmem:[%s3546_s1 + $0x30c] sm:$0xf]  ;;  %v2190_v17 = vld [vmem:[%s3546_s1 + $0x318] sm:$0xf0] }
  0x5e   : > { %1010 = vmatpush.bf16.msra.mxu3 %v2055_v28  ;;  %v2124_v28 = vor.u32 %v2423_v18, %v2121_v19  ;;  %v2321_v18 = vld [vmem:[%s3546_s1 + $0x3e8] sm:$0xf]  ;;  %v2465_v19 = vld [vmem:[%s3546_s1 + $0x3f4] sm:$0xf0]  ;;  %v2315_v25 = vld [vmem:[%s3546_s1 + $0x3f0] sm:$0xf0] }
  0x5f   : > { %v2463_v26 = vld [vmem:[%s3546_s1 + $0x3ec] sm:$0xf]  ;;  %v2305_v32 = vld [vmem:[%s3546_s1 + $0x3c8] sm:$0xf]  ;;  %v2461_v33 = vld [vmem:[%s3546_s1 + $0x3d4] sm:$0xf0] }
  0x60   : > { %998 = vmatpush.bf16.msra.mxu2 %v2035_v37  ;;  %985 = vmatpush.bf16.msra.mxu1 %v2031_v42  ;;  %v2446_v37 = vld [vmem:[%s3546_s1 + $0x364] sm:$0xf]  ;;  %v2238_v42 = vld [vmem:[%s3546_s1 + $0x378] sm:$0xf0]  ;;  %v2297_v36 = vld [vmem:[%s3546_s1 + $0x3c0] sm:$0xf] }
  0x61   : > { %972 = vmatpush.bf16.msra.mxu0 %v2027_v38  ;;  %v2104_v38 = vor.u32 %v2421_v24, %v2103_v21  ;;  %v2233_v49 = vor.u32 %v2446_v37, %v2230_v40  ;;  %v2241_v50 = vor.u32 %v2447_v41, %v2238_v42  ;;  %v2464_v21 = vld [vmem:[%s3546_s1 + $0x3ec] sm:$0xf0]  ;;  %v2459_v40 = vld [vmem:[%s3546_s1 + $0x3cc] sm:$0xf]  ;;  %v2307_v41 = vld [vmem:[%s3546_s1 + $0x3d8] sm:$0xf0]  ;;  %v2306_v42 = vor.u32 %v2461_v33, %v2305_v32 }
  0x62   : > { %1011 = vmatpush.bf16.msra.mxu3 %v2039_v43  ;;  %v2100_v43 = vor.u32 %v2418_v29, %v2097_v30  ;;  %v2193_v29 = vor.u32 %v2435_v16, %v2190_v17  ;;  %v2322_v30 = vor.u32 %v2465_v19, %v2321_v18  ;;  %v2460_v37 = vld [vmem:[%s3546_s1 + $0x3cc] sm:$0xf0]  ;;  %v2457_v47 = vld [vmem:[%s3546_s1 + $0x3b4] sm:$0xf0]  ;;  %v2281_v48 = vld [vmem:[%s3546_s1 + $0x3a0] sm:$0xf] }
  0x63   : > { %s1663_s18 = sshll.u32 %s208_s28, 5 }
  0x64   : > { %999 = vmatpush.bf16.msra.mxu2 %v2019_v53  ;;  %986 = vmatpush.bf16.msra.mxu1 %v2015_v58  ;;  %v2442_v53 = vld [vmem:[%s3546_s1 + $0x344] sm:$0xf]  ;;  %v2213_v58 = vor.u32 %v2444_v52, %v2212_v51  ;;  %v2283_v51 = vld [vmem:[%s3546_s1 + $0x3b0] sm:$0xf0]  ;;  %v2455_v52 = vld [vmem:[%s3546_s1 + $0x3ac] sm:$0xf] }
  0x65   : > { %973 = vmatpush.bf16.msra.mxu0 %v2011_v54  ;;  %v2214_v54 = vld [vmem:[%s3546_s1 + $0x350] sm:$0xf0]  ;;  %s210_s4 = scalar_lea.vmem [#allocation2], %s1663_s18 }
  0x66   : > { %1012 = vmatpush.bf16.msra.mxu3 %v2023_v59  ;;  %v2217_v59 = vor.u32 %v2442_v53, %v2214_v54  ;;  %v2291_v53 = vld [vmem:[%s3546_s1 + $0x3b8] sm:$0xf0]  ;;  %v2161_v54 = vld [vmem:[%s2819_s30 + $0x18] sm:$0xf]  ;;  %s1558_s5 = sshll.u32 %s210_s4, 4  ;;  %s1559_s5 = int_to_ptr.vmem [resolvable:$true] %s1558_s5 }
  0x67   : > { %2073 = vmatmul.msk.bf16.vlgmr.msra.gmra.mxu1 %vm330_vm0, %v1991_v20  ;;  %2074 = vmatmul.msk.bf16.vlgmr.msra.gmra.mxu2 %vm330_vm0, %v1991_v20 }
  0x68   : > { %1154 = vmatpush.bf16.msrb.mxu2 %v2152_v60  ;;  %1141 = vmatpush.bf16.msrb.mxu1 %v2148_v0  ;;  %v2225_v60 = vor.u32 %v2443_v55, %v2222_v56  ;;  %v2440_v0 = vld [vmem:[%s3546_s1 + $0x32c] sm:$0xf0] }
  0x69   : > { %1128 = vmatpush.bf16.msrb.mxu0 %v2144_v61  ;;  %2075 = vmatmul.msk.bf16.vlgmr.msra.gmra.mxu3 %vm330_vm0, %v1991_v20  ;;  %v2204_v61 = vld [vmem:[%s3546_s1 + $0x328] sm:$0xf] }
  0x6a   : > { %1167 = vmatpush.bf16.msrb.mxu3 %v2156_v1  ;;  %2072 = vmatmul.msk.bf16.vlgmr.msra.gmra.mxu0 %vm330_vm0, %v1991_v20  ;;  %v2438_v1 = vld [vmem:[%s3546_s1 + $0x324] sm:$0xf]  ;;  %v2205_v7 = vor.u32 %v2441_v62, %v2204_v61  ;;  %v2313_v20 = vld [vmem:[%s3546_s1 + $0x3e0] sm:$0xf]  ;;  %v2452_v62 = vld [vmem:[%s3546_s1 + $0x38c] sm:$0xf0] }
  0x6b   : > { %v2201_v12 = vor.u32 %v2438_v1, %v2198_v2  ;;  %v2314_v31 = vor.u32 %v2464_v21, %v2313_v20  ;;  %v2265_v61 = vld [vmem:[%s3546_s1 + $0x380] sm:$0xf]  ;;  %v2451_v1 = vld [vmem:[%s3546_s1 + $0x38c] sm:$0xf]  ;;  %v2275_v2 = vld [vmem:[%s3546_s1 + $0x398] sm:$0xf0] }
  0x6c   : > { %1155 = vmatpush.bf16.msrb.mxu2 %v2136_v8  ;;  %1142 = vmatpush.bf16.msrb.mxu1 %v2132_v10  ;;  %v2197_v8 = vor.u32 %v2440_v0, %v2196_v63  ;;  %v2180_v10 = vld [vmem:[%s3546_s1 + $0x300] sm:$0xf]  ;;  %v2450_v63 = vld [vmem:[%s3546_s1 + $0x384] sm:$0xf]  ;;  %v2267_v0 = vld [vmem:[%s3546_s1 + $0x390] sm:$0xf0]  ;;  %v2266_v4 = vor.u32 %v2452_v62, %v2265_v61 }
  0x6d   : > { %1129 = vmatpush.bf16.msrb.mxu0 %v2128_v9  ;;  %v2437_v9 = vld [vmem:[%s3546_s1 + $0x314] sm:$0xf0] }
  0x6e   : > { %1168 = vmatpush.bf16.msrb.mxu3 %v2140_v11  ;;  %v2436_v11 = vld [vmem:[%s3546_s1 + $0x30c] sm:$0xf0] }
  0x6f   : > { %v2181_v24 = vor.u32 %v2436_v11, %v2180_v10 }
  0x70   : > { %1156 = vmatpush.bf16.msrb.mxu2 %v2120_v22  ;;  %1143 = vmatpush.bf16.msrb.mxu1 %v2116_v27  ;;  %v2462_v22 = vld [vmem:[%s3546_s1 + $0x3e4] sm:$0xf]  ;;  %v2323_v27 = vld [vmem:[%s3546_s1 + $0x3f8] sm:$0xf0] }
  0x71   : > { %1130 = vmatpush.bf16.msrb.mxu0 %v2112_v23  ;;  %v2189_v23 = vor.u32 %v2437_v9, %v2188_v6  ;;  %v2318_v34 = vor.u32 %v2462_v22, %v2315_v25  ;;  %v2326_v35 = vor.u32 %v2463_v26, %v2323_v27  ;;  %v2278_v6 = vor.u32 %v2451_v1, %v2275_v2  ;;  %v230_v9 = vld [vmem:[%s227_s23 + $0x8] sm:$0xff] }
  0x72   : > { %1169 = vmatpush.bf16.msrb.mxu3 %v2124_v28  ;;  %v2185_v28 = vor.u32 %v2434_v14, %v2182_v15  ;;  %v231_v14 = vld [vmem:[%s227_s23 + $0x10] sm:$0xff]  ;;  %v232_v15 = vld [vmem:[%s227_s23 + $0x18] sm:$0xff] }
  0x74   : > { %1157 = vmatpush.bf16.msrb.mxu2 %v2104_v38  ;;  %1144 = vmatpush.bf16.msrb.mxu1 %v2100_v43  ;;  %v2458_v38 = vld [vmem:[%s3546_s1 + $0x3c4] sm:$0xf]  ;;  %v2298_v43 = vor.u32 %v2460_v37, %v2297_v36 }
  0x75   : > { %1131 = vmatpush.bf16.msrb.mxu0 %v2096_v39  ;;  %v2299_v39 = vld [vmem:[%s3546_s1 + $0x3d0] sm:$0xf0] }
  0x76   : > { %1170 = vmatpush.bf16.msrb.mxu3 %v2108_v44  ;;  %v2302_v44 = vor.u32 %v2458_v38, %v2299_v39 }
  0x77   : > { %2158 = vmatmul.msk.bf16.vlgmr.msrb.gmra.mxu1 %vm330_vm0, %v2076_v5  ;;  %2159 = vmatmul.msk.bf16.vlgmr.msrb.gmra.mxu2 %vm330_vm0, %v2076_v5 }
  0x78   : > { %1312 = vmatpush.bf16.msra.mxu2 %v2237_v45  ;;  %1299 = vmatpush.bf16.msra.mxu1 %v2233_v49  ;;  %v2310_v45 = vor.u32 %v2459_v40, %v2307_v41  ;;  %v2456_v49 = vld [vmem:[%s3546_s1 + $0x3ac] sm:$0xf0] }
  0x79   : > { %1286 = vmatpush.bf16.msra.mxu0 %v2229_v46  ;;  %2160 = vmatmul.msk.bf16.vlgmr.msrb.gmra.mxu3 %vm330_vm0, %v2076_v5  ;;  %v2289_v46 = vld [vmem:[%s3546_s1 + $0x3a8] sm:$0xf]  ;;  %v2282_v56 = vor.u32 %v2456_v49, %v2281_v48 }
  0x7a   : > { %1325 = vmatpush.bf16.msra.mxu3 %v2241_v50  ;;  %2157 = vmatmul.msk.bf16.vlgmr.msrb.gmra.mxu0 %vm330_vm0, %v2076_v5  ;;  %v2454_v50 = vld [vmem:[%s3546_s1 + $0x3a4] sm:$0xf]  ;;  %v2290_v55 = vor.u32 %v2457_v47, %v2289_v46  ;;  %v2270_v5 = vor.u32 %v2450_v63, %v2267_v0 }
  0x7c   : > { %1313 = vmatpush.bf16.msra.mxu2 %v2221_v57  ;;  %1300 = vmatpush.bf16.msra.mxu1 %v2217_v59  ;;  %v2273_v57 = vld [vmem:[%s3546_s1 + $0x388] sm:$0xf]  ;;  %v2286_v59 = vor.u32 %v2454_v50, %v2283_v51 }
  0x7d   : > { %1287 = vmatpush.bf16.msra.mxu0 %v2213_v58  ;;  %v2453_v58 = vld [vmem:[%s3546_s1 + $0x394] sm:$0xf0] }
  0x7e   : > { %1326 = vmatpush.bf16.msra.mxu3 %v2225_v60  ;;  %v2294_v60 = vor.u32 %v2455_v52, %v2291_v53  ;;  %v2274_v3 = vor.u32 %v2453_v58, %v2273_v57 }
  0x80   : > { %1314 = vmatpush.bf16.msra.mxu2 %v2205_v7  ;;  %1301 = vmatpush.bf16.msra.mxu1 %v2201_v12  ;;  %v2246_v7 = vld [vmem:[%s2819_s30 + $0x1c] sm:$0xf]  ;;  %s2466_s30 = sshll.u32 %s2597_s15, 5  ;;  %s1543_s15 = scalar_lea.sflag [#allocation3], %s208_s28 }
  0x81   : > { %1288 = vmatpush.bf16.msra.mxu0 %v2197_v8  ;;  %v229_v8 = vld [vmem:[%s227_s23] sm:$0xff]  ;;  %s1556_s29 = scalar_lea.hbm %s3548_s3, %s2466_s30 }
  0x82   : > { %1327 = vmatpush.bf16.msra.mxu3 %v2209_v13  ;;  %s1560_s6 = sshll.u32 %s1556_s29, 4  ;;  %s1561_s6 = int_to_ptr.hbm [resolvable:$true] %s1560_s6 }
  0x83   : > { %s2541_s7 = sshra.s32 %s1561_s6, 4  ;;  %s2542_s7 = int_to_ptr.hbm [resolvable:$true] %s2541_s7 }
  0x84   : > { %1315 = vmatpush.bf16.msra.mxu2 %v2189_v23  ;;  %1302 = vmatpush.bf16.msra.mxu1 %v2185_v28  ;;  %s2543_s8 = scalar_lea.hbm %s2542_s7, 32  ;;  %p2548_p1 = scmp.lt.s32.totalorder %s2542_s7, %s3548_s3 }
  0x85   : > { %1289 = vmatpush.bf16.msra.mxu0 %v2181_v24  ;;  %p2544_p12 = scmp.ne.s32.totalorder %s2542_s7, %s2543_s8  ;;  %p2549_p2 = scmp.lt.s32.totalorder %s2547_s11, %s2543_s8 }
  0x86   : > { %1328 = vmatpush.bf16.msra.mxu3 %v2193_v29 }
  0x87   : > { %2243 = vmatmul.msk.bf16.vlgmr.msra.gmra.mxu1 %vm330_vm0, %v2161_v54  ;;  %2244 = vmatmul.msk.bf16.vlgmr.msra.gmra.mxu2 %vm330_vm0, %v2161_v54  ;;  %p2545_p13 = pnand %p2544_p12, %p2668_p4  ;;  %p2550_p3 = por %p2549_p2, %p2548_p1 }
  0x88   : > { %1470 = vmatpush.bf16.msrb.mxu2 %v2322_v30  ;;  %1457 = vmatpush.bf16.msrb.mxu1 %v2318_v34 }
  0x89   : > { %1444 = vmatpush.bf16.msrb.mxu0 %v2314_v31  ;;  %2245 = vmatmul.msk.bf16.vlgmr.msra.gmra.mxu3 %vm330_vm0, %v2161_v54  ;;  %p2546_p0 = pneg %p2545_p13 }
  0x8a   : > { %1483 = vmatpush.bf16.msrb.mxu3 %v2326_v35  ;;  %2242 = vmatmul.msk.bf16.vlgmr.msra.gmra.mxu0 %vm330_vm0, %v2161_v54 }
  0x8b   : > { %p2551_p5 = pnand %p2550_p3, %p2546_p0 }
  0x8c   : > { %1471 = vmatpush.bf16.msrb.mxu2 %v2306_v42  ;;  %1458 = vmatpush.bf16.msrb.mxu1 %v2302_v44 }
  0x8d   : > { %1445 = vmatpush.bf16.msrb.mxu0 %v2298_v43 }
  0x8e   : > { %1484 = vmatpush.bf16.msrb.mxu3 %v2310_v45 }
  0x90   : > { %1472 = vmatpush.bf16.msrb.mxu2 %v2290_v55  ;;  %1459 = vmatpush.bf16.msrb.mxu1 %v2286_v59 }
  0x91   : > { %1446 = vmatpush.bf16.msrb.mxu0 %v2282_v56 }
  0x92   : > { %1485 = vmatpush.bf16.msrb.mxu3 %v2294_v60 }
  0x94   : > { %1473 = vmatpush.bf16.msrb.mxu2 %v2274_v3  ;;  %1460 = vmatpush.bf16.msrb.mxu1 %v2270_v5 }
  0x95   : > { %1447 = vmatpush.bf16.msrb.mxu0 %v2266_v4 }
  0x96   : > { %1486 = vmatpush.bf16.msrb.mxu3 %v2278_v6 }
  0x97   : > { %2328 = vmatmul.msk.bf16.vlgmr.msrb.gmra.mxu1 %vm330_vm0, %v2246_v7  ;;  %2329 = vmatmul.msk.bf16.vlgmr.msrb.gmra.mxu2 %vm330_vm0, %v2246_v7 }
  0x99   : > { %2330 = vmatmul.msk.bf16.vlgmr.msrb.gmra.mxu3 %vm330_vm0, %v2246_v7 }
  0x9a   : > { %2327 = vmatmul.msk.bf16.vlgmr.msrb.gmra.mxu0 %vm330_vm0, %v2246_v7 }
  0xa3   : > { %v343_v10 = vpop.f32.mrf.mxu0 }
  0xa4   : > { %v386_v11 = vadd.f32 %v343_v10, %v229_v8  ;;  %v356_v12 = vpop.f32.mrf.mxu1 }
  0xa5   : > { %v387_v13 = vadd.f32 %v356_v12, %v230_v9 }
  0xaa   : > { %v369_v16 = vpop.f32.mrf.mxu2 }
  0xab   : > { %v388_v17 = vadd.f32 %v369_v16, %v231_v14  ;;  %v345_v19 = vpop.f32.mrf.mxu0 }
  0xac   : > { %v382_v18 = vpop.f32.mrf.mxu3  ;;  %v358_v21 = vpop.f32.mrf.mxu1 }
  0xad   : > { %v389_v20 = vadd.f32 %v382_v18, %v232_v15 }
  0xb2   : > { %v371_v22 = vpop.f32.mrf.mxu2 }
  0xb4   : > { %v384_v23 = vpop.f32.mrf.mxu3  ;;  %v514_v25 = vpop.f32.mrf.mxu1 }
  0xb5   : > { %v545_v27 = vadd.f32 %v514_v25, %v387_v13 }
  0xb7   : > { %v501_v24 = vpop.f32.mrf.mxu0 }
  0xb8   : > { %v544_v26 = vadd.f32 %v501_v24, %v386_v11 }
  0xba   : > { %v527_v28 = vpop.f32.mrf.mxu2 }
  0xbb   : > { %v546_v30 = vadd.f32 %v527_v28, %v388_v17 }
  0xbc   : > { %v540_v29 = vpop.f32.mrf.mxu3  ;;  %v516_v33 = vpop.f32.mrf.mxu1 }
  0xbd   : > { %v547_v31 = vadd.f32 %v540_v29, %v389_v20 }
  0xbf   : > { %v503_v32 = vpop.f32.mrf.mxu0 }
  0xc2   : > { %v529_v34 = vpop.f32.mrf.mxu2 }
  0xc4   : > { %v542_v35 = vpop.f32.mrf.mxu3  ;;  %v672_v37 = vpop.f32.mrf.mxu1 }
  0xc5   : > { %v703_v39 = vadd.f32 %v672_v37, %v545_v27 }
  0xc7   : > { %v659_v36 = vpop.f32.mrf.mxu0 }
  0xc8   : > { %v702_v38 = vadd.f32 %v659_v36, %v544_v26 }
  0xca   : > { %v685_v40 = vpop.f32.mrf.mxu2 }
  0xcb   : > { %v704_v42 = vadd.f32 %v685_v40, %v546_v30 }
  0xcc   : > { %v698_v41 = vpop.f32.mrf.mxu3  ;;  %v674_v45 = vpop.f32.mrf.mxu1 }
  0xcd   : > { %v705_v43 = vadd.f32 %v698_v41, %v547_v31 }
  0xcf   : > { %v661_v44 = vpop.f32.mrf.mxu0 }
  0xd2   : > { %v687_v46 = vpop.f32.mrf.mxu2 }
  0xd4   : > { %v700_v47 = vpop.f32.mrf.mxu3  ;;  %v830_v49 = vpop.f32.mrf.mxu1 }
  0xd5   : > { %v861_v15 = vadd.f32 %v830_v49, %v703_v39  ;;  %v2607_v47 = vmov 512.0  }
  0xd6   : > { %2523 = vrcp.f32 %v2607_v47 }
  0xd7   : > { %v817_v48 = vpop.f32.mrf.mxu0 }
  0xd8   : > { %v860_v14 = vadd.f32 %v817_v48, %v702_v38 }
  0xda   : > { %v843_v50 = vpop.f32.mrf.mxu2 }
  0xdb   : > { %v862_v20 = vadd.f32 %v843_v50, %v704_v42 }
  0xdc   : > { %v856_v51 = vpop.f32.mrf.mxu3  ;;  %v832_v53 = vpop.f32.mrf.mxu1 }
  0xdd   : > { %v863_v25 = vadd.f32 %v856_v51, %v705_v43  ;;  %v2524_v48 = vpop.eup %2523 }
  0xde   : > { %v1502_v49 = vmul.f32 512.0, %v2524_v48  ;;  %vm1506_vm1 = vweird.f32 %v2524_v48 }
  0xdf   : > { %v819_v52 = vpop.f32.mrf.mxu0 }
  0xe0   : > { %v1503_v50 = vsub.f32 1.0, %v1502_v49 }
  0xe2   : > { %v845_v54 = vpop.f32.mrf.mxu2  ;;  %v1504_v51 = vmul.f32 %v2524_v48, %v1503_v50 }
  0xe4   : > { %v858_v55 = vpop.f32.mrf.mxu3  ;;  %v988_v57 = vpop.f32.mrf.mxu1  ;;  %v1505_v52 = vadd.f32 %v2524_v48, %v1504_v51 }
  0xe5   : > { %v1019_v17 = vadd.f32 %v988_v57, %v861_v15 }
  0xe6   : > { %v1507_v53 = vsel %vm1506_vm1, %v2524_v48, %v1505_v52 }
  0xe7   : > { %v975_v56 = vpop.f32.mrf.mxu0 }
  0xe8   : > { %v1018_v16 = vadd.f32 %v975_v56, %v860_v14 }
  0xea   : > { %v1001_v58 = vpop.f32.mrf.mxu2 }
  0xeb   : > { %v1020_v26 = vadd.f32 %v1001_v58, %v862_v20 }
  0xec   : > { %v1014_v59 = vpop.f32.mrf.mxu3  ;;  %v990_v61 = vpop.f32.mrf.mxu1 }
  0xed   : > { %v1021_v29 = vadd.f32 %v1014_v59, %v863_v25 }
  0xef   : > { %v977_v60 = vpop.f32.mrf.mxu0 }
  0xf2   : > { %v1003_v62 = vpop.f32.mrf.mxu2 }
  0xf4   : > { %v1016_v63 = vpop.f32.mrf.mxu3  ;;  %v1146_v1 = vpop.f32.mrf.mxu1 }
  0xf5   : > { %v1177_v22 = vadd.f32 %v1146_v1, %v1019_v17 }
  0xf7   : > { %v1133_v0 = vpop.f32.mrf.mxu0 }
  0xf8   : > { %v1176_v21 = vadd.f32 %v1133_v0, %v1018_v16 }
  0xfa   : > { %v1159_v2 = vpop.f32.mrf.mxu2 }
  0xfb   : > { %v1178_v30 = vadd.f32 %v1159_v2, %v1020_v26 }
  0xfc   : > { %v1172_v3 = vpop.f32.mrf.mxu3  ;;  %v1148_v5 = vpop.f32.mrf.mxu1 }
  0xfd   : > { %v1179_v33 = vadd.f32 %v1172_v3, %v1021_v29 }
  0xff   : > { %v1135_v4 = vpop.f32.mrf.mxu0 }
 0x102   : > { %v1161_v6 = vpop.f32.mrf.mxu2 }
 0x104   : > { %v1174_v7 = vpop.f32.mrf.mxu3  ;;  %v1304_v9 = vpop.f32.mrf.mxu1 }
 0x105   : > { %v1335_v28 = vadd.f32 %v1304_v9, %v1177_v22 }
 0x107   : > { %v1291_v8 = vpop.f32.mrf.mxu0 }
 0x108   : > { %v1334_v27 = vadd.f32 %v1291_v8, %v1176_v21 }
 0x10a   : > { %v1317_v10 = vpop.f32.mrf.mxu2 }
 0x10b   : > { %v1336_v34 = vadd.f32 %v1317_v10, %v1178_v30 }
 0x10c   : > { %v1330_v11 = vpop.f32.mrf.mxu3  ;;  %v1306_v13 = vpop.f32.mrf.mxu1 }
 0x10d   : > { %v1337_v37 = vadd.f32 %v1330_v11, %v1179_v33 }
 0x10f   : > { %v1293_v12 = vpop.f32.mrf.mxu0 }
 0x112   : > { %v1319_v18 = vpop.f32.mrf.mxu2 }
 0x114   : > { %v1332_v19 = vpop.f32.mrf.mxu3  ;;  %v1462_v24 = vpop.f32.mrf.mxu1 }
 0x115   : > { %v1493_v32 = vadd.f32 %v1462_v24, %v1335_v28 }
 0x117   : > { %v1449_v23 = vpop.f32.mrf.mxu0 }
 0x118   : > { %v1492_v31 = vadd.f32 %v1449_v23, %v1334_v27 }
 0x11a   : > { %v1475_v35 = vpop.f32.mrf.mxu2  ;;  %v1496_v38 = vadd.f32 %v1493_v32, %v1492_v31 }
 0x11b   : > { %v1494_v39 = vadd.f32 %v1475_v35, %v1336_v34 }
 0x11c   : > { %v1488_v36 = vpop.f32.mrf.mxu3  ;;  %v1464_v41 = vpop.f32.mrf.mxu1 }
 0x11d   : > { %v1495_v42 = vadd.f32 %v1488_v36, %v1337_v37  ;;  %v1497_v44 = vadd.f32 %v1496_v38, %v1494_v39 }
 0x11f   : > { %v1451_v40 = vpop.f32.mrf.mxu0  ;;  %v1498_v45 = vadd.f32 %v1497_v44, %v1495_v42 }
 0x121   : > { %1499 = vadd.xlane.f32.xlu0 %v1498_v45 }
 0x122   : > { %v1477_v43 = vpop.f32.mrf.mxu2 }
 0x124   : > { %v1490_v46 = vpop.f32.mrf.mxu3 }
 0x194   : > { %v1500_v54 = vpop.xlane.xlu0 %1499 }
 0x195   : > { %v1508_v55 = vmul.f32 %v1507_v53, %v1500_v54 }
 0x197   : > { %v1509_v56 = vsub.f32 %v1492_v31, %v1508_v55  ;;  %v1510_v57 = vsub.f32 %v1493_v32, %v1508_v55  ;;  %v1511_v58 = vsub.f32 %v1494_v39, %v1508_v55  ;;  %v1512_v59 = vsub.f32 %v1495_v42, %v1508_v55 }
 0x199   : > { %v1513_v60 = vmul.f32 %v1509_v56, %v1509_v56  ;;  %v1514_v61 = vmul.f32 %v1510_v57, %v1510_v57  ;;  %v1515_v62 = vmul.f32 %v1511_v58, %v1511_v58  ;;  %v1516_v0 = vmul.f32 %v1512_v59, %v1512_v59 }
 0x19b   : > { %v1517_v63 = vadd.f32 %v1514_v61, %v1513_v60 }
 0x19d   : > { %v1518_v1 = vadd.f32 %v1517_v63, %v1515_v62 }
 0x19f   : > { %v1519_v2 = vadd.f32 %v1518_v1, %v1516_v0 }
 0x1a1   : > { %1520 = vadd.xlane.f32.xlu0 %v1519_v2 }
 0x214   : > { %v1521_v3 = vpop.xlane.xlu0 %1520 }
 0x215   : > { %v1522_v4 = vmul.f32 %v1521_v3, %v1507_v53 }
 0x217   : > { %v1523_v5 = vadd.f32 1e-05, %v1522_v4 }
 0x219   : > { %2525 = vrsqrt.f32 %v1523_v5  ;;  %vm1530_vm3 = vweird.f32 %v1523_v5 }
 0x21f   : > { %v2526_v6 = vpop.eup %2525 }
 0x220   : > { %v1525_v7 = vmul.f32 %v2526_v6, %v1523_v5  ;;  %vm1531_vm2 = vweird.f32 %v2526_v6 }
 0x221   : > { %vm1532_vm4 = vmor %vm1530_vm3, %vm1531_vm2 }
 0x222   : > { %v1526_v8 = vmul.f32 %v2526_v6, %v1525_v7 }
 0x224   : > { %v1527_v9 = vmul.f32 0.5, %v1526_v8 }
 0x226   : > { %v1528_v10 = vsub.f32 1.5, %v1527_v9 }
 0x228   : > { %v1529_v11 = vmul.f32 %v2526_v6, %v1528_v10 }
 0x22a   : > { %v1533_v12 = vsel %vm1532_vm4, %v2526_v6, %v1529_v11 }
 0x22b   : > { %v1534_v13 = vmul.f32 %v1533_v12, %v1509_v56  ;;  %v1535_v14 = vmul.f32 %v1533_v12, %v1510_v57  ;;  %v1536_v15 = vmul.f32 %v1533_v12, %v1511_v58  ;;  %v1537_v16 = vmul.f32 %v1533_v12, %v1512_v59 }
 0x22d   : > { %1538 = vst [vmem:[%s210_s4] sm:$0xff] %v1534_v13 }
 0x22e   : > { %1539 = vst [vmem:[%s210_s4 + $0x8] sm:$0xff] %v1535_v14 }
 0x22f   : > { %1540 = vst [vmem:[%s210_s4 + $0x10] sm:$0xff] %v1536_v15 }
 0x230   : > { %1541 = vst [vmem:[%s210_s4 + $0x18] sm:$0xff] %v1537_v16 }
 0x231   : > { %2554 = shalt.err (!%p2551_p5)
}
 0x232   : > { %2467 = dma.vmem_to_hbm [thread:$0]  (%p2668_p4), %s1559_s5, 512, %s1561_s6, %s1543_s15  }
 0x233 PF: > { %p2473_p6 = scmp.ge.s32.totalorder %s2605_s17, 2  ;;  %s1572_s23 = sand.u32 1, %s2585_s12  }
 0x234   : > { %s1573_s28 = scalar_lea.sflag [#allocation3], %s1572_s23 }
 0x235   : > { %p2470_p7 = pnand %p2473_p6, %p2675_p8 }
 0x237   : > { %p2471_p9 = pneg %p2470_p7 }
 0x239   : > { %2580 = dma.done.wait (%p2471_p9), %s1573_s28, 512  }
 0x23a   : > { %2582 = vsyncadd (%p2471_p9), %s1573_s28, 4294966784  ;;  %s16_s17 = sadd.s32 1, %s2605_s17   ;;  %s3551_s12 = smov %s2589_s13 }
 0x23b   : > { %p13_p10 = scmp.ge.s32.totalorder %s16_s17, 4   ;;  %s3552_s13 = smov %s2593_s14 }
 0x23c   : > { %s3553_s14 = smov %s2681_s25  ;;  %s3554_s15 = smov %s2601_s16 }
 0x23d   : > { %s3555_s16 = smov %s3557_s20  ;;  %15 = sbr.rel (!%p13_p10) target bundleno = 4 (0x4), region = 84 }
 0x242   :  { %1579 = vsyncpa [#allocation3], 1 }
 0x243   :  { %1581 = vsyncpa [#allocation3 + $0x1], 1 }

</bundles_post_ra>
